<compile_context>
chip_gen: v7x
topology: tpu7x:2x2x1
jax: 0.10.0
libtpu: 0.0.40
codegen_flags: <defaults>
</compile_context>

<pallas_src>
import functools

import jax
import jax.numpy as jnp
from jax import lax
from jax.experimental import pallas as pl
from jax.experimental.pallas import tpu as pltpu


def _conv3x3_bn_relu(get_patch, w_ref, s_ref, b_ref, rows, W, cin, cout, use_taps):
    """One 3x3 'same' conv + folded-BN + ReLU over `rows` output rows.

    get_patch(ky, kx) -> (rows, W, cin) f32 slice of the zero-padded source.
    w_ref: (9*cin, cout) bf16 weights in im2col tap order (ky, kx, cin).
    s_ref/b_ref: (1, cout) f32 folded BN scale / bias.
    Returns (rows*W, cout) f32 post-ReLU activations.
    """
    if use_taps:
        # 9 accumulating K=cin matmuls -- no im2col slab (preferred for cin >= 128:
        # K=C already fills the MXU; avoids ~9x activation copy traffic + VMEM).
        acc = jnp.zeros((rows * W, cout), jnp.float32)
        t = 0
        for ky in range(3):
            for kx in range(3):
                p = get_patch(ky, kx).astype(jnp.bfloat16).reshape(rows * W, cin)
                acc = acc + jnp.dot(p, w_ref[t * cin:(t + 1) * cin, :],
                                    preferred_element_type=jnp.float32)
                t += 1
        z = acc
    else:
        # Single im2col matmul (K = 9*cin) -- better MXU fill for small cin.
        p = jnp.concatenate(
            [get_patch(ky, kx).astype(jnp.bfloat16)
             for ky in range(3) for kx in range(3)], axis=-1)
        z = jnp.dot(p.reshape(rows * W, 9 * cin), w_ref[...],
                    preferred_element_type=jnp.float32)
    return jnp.maximum(z * s_ref[...] + b_ref[...], 0.0)


def _double_conv_kernel(*refs, has_halo, use_taps1, use_taps2):
    """Fused (conv3x3 + BN + ReLU) x2 for one (batch, H-tile) block.

    With has_halo:
      xc (TH,W,Cin), xu (2,W,Cin), xd (2,W,Cin), w1 (9Cin,Cout) bf16,
      s1/b1 (1,Cout), w2 (9Cout,Cout) bf16, s2/b2 (1,Cout), o (TH,W,Cout),
      xp scratch (TH+4,W+4,Cin) f32, y1 scratch (TH+2,W+2,Cout) f32.
    Without has_halo the xu/xd operands are omitted (single H tile).
    """
    if has_halo:
        (xc_ref, xu_ref, xd_ref, w1_ref, s1_ref, b1_ref,
         w2_ref, s2_ref, b2_ref, o_ref, xp_ref, y1_ref) = refs
    else:
        (xc_ref, w1_ref, s1_ref, b1_ref,
         w2_ref, s2_ref, b2_ref, o_ref, xp_ref, y1_ref) = refs

    i = pl.program_id(1)
    n_h = pl.num_programs(1)
    TH, W, Cin = xc_ref.shape
    Cout = o_ref.shape[-1]

    # ---- assemble the zero-padded input tile in VMEM (in-kernel padding) ----
    # TODO(synk): replace the narrow zero-column stores with an iota/where mask
    #             on the kx=0/2 taps to cut masked-vst pressure (v5e especially).
    xp_ref[:, 0:2, :] = jnp.zeros((TH + 4, 2, Cin), xp_ref.dtype)
    xp_ref[:, W + 2:W + 4, :] = jnp.zeros((TH + 4, 2, Cin), xp_ref.dtype)
    xp_ref[2:TH + 2, 2:W + 2, :] = xc_ref[...]

    if has_halo:
        @pl.when(i > 0)
        def _():
            xp_ref[0:2, 2:W + 2, :] = xu_ref[...]

        @pl.when(i == 0)
        def _():
            xp_ref[0:2, 2:W + 2, :] = jnp.zeros((2, W, Cin), xp_ref.dtype)

        @pl.when(i < n_h - 1)
        def _():
            xp_ref[TH + 2:TH + 4, 2:W + 2, :] = xd_ref[...]

        @pl.when(i == n_h - 1)
        def _():
            xp_ref[TH + 2:TH + 4, 2:W + 2, :] = jnp.zeros((2, W, Cin), xp_ref.dtype)
    else:
        xp_ref[0:2, 2:W + 2, :] = jnp.zeros((2, W, Cin), xp_ref.dtype)
        xp_ref[TH + 2:TH + 4, 2:W + 2, :] = jnp.zeros((2, W, Cin), xp_ref.dtype)

    # ---- stage 1: conv3x3 + BN + ReLU over TH+2 rows (one extra halo row on
    #      each side so stage 2 has valid neighbours) --------------------------
    Hm = TH + 2
    z1 = _conv3x3_bn_relu(
        lambda ky, kx: xp_ref[ky:ky + Hm, 1 + kx:1 + kx + W, :],
        w1_ref, s1_ref, b1_ref, Hm, W, Cin, Cout, use_taps1)
    y1_ref[:, 1:W + 1, :] = z1.reshape(Hm, W, Cout).astype(y1_ref.dtype)
    # zero "same"-padding columns for stage 2
    y1_ref[:, 0:1, :] = jnp.zeros((Hm, 1, Cout), y1_ref.dtype)
    y1_ref[:, W + 1:W + 2, :] = jnp.zeros((Hm, 1, Cout), y1_ref.dtype)

    # zero "same"-padding rows at the top / bottom of the image
    if has_halo:
        @pl.when(i == 0)
        def _():
            y1_ref[0:1, :, :] = jnp.zeros((1, W + 2, Cout), y1_ref.dtype)

        @pl.when(i == n_h - 1)
        def _():
            y1_ref[TH + 1:TH + 2, :, :] = jnp.zeros((1, W + 2, Cout), y1_ref.dtype)
    else:
        y1_ref[0:1, :, :] = jnp.zeros((1, W + 2, Cout), y1_ref.dtype)
        y1_ref[TH + 1:TH + 2, :, :] = jnp.zeros((1, W + 2, Cout), y1_ref.dtype)

    # ---- stage 2: conv3x3 + BN + ReLU ----------------------------------------
    z2 = _conv3x3_bn_relu(
        lambda ky, kx: y1_ref[ky:ky + TH, kx:kx + W, :],
        w2_ref, s2_ref, b2_ref, TH, W, Cout, Cout, use_taps2)
    o_ref[...] = z2.reshape(TH, W, Cout).astype(o_ref.dtype)


@functools.lru_cache(maxsize=None)
def _vmem_capacity_bytes():
    """Per-core VMEM capacity; conservative 64 MiB fallback (valid on v5e/v6e/v7x)."""
    try:
        cap = int(pltpu.get_tpu_info().vmem_capacity_bytes)
        if cap > 0:
            return cap
    except Exception:
        pass
    return 64 * 1024 * 1024


def _vmem_budgets():
    cap = _vmem_capacity_bytes()
    # v7x (64 MiB): limit 48 MiB, tile budget 32 MiB.
    # v5e/v6e (128 MiB): limit 96 MiB, tile budget 64 MiB.
    limit = max(32 * 1024 * 1024, min((3 * cap) // 4, cap - 16 * 1024 * 1024))
    tile_budget = min(cap // 2, (3 * limit) // 4)
    return limit, tile_budget


def _pick_tile_h(H, W, cin, cout, budget_bytes, use_taps1, use_taps2):
    """Largest H-tile (divides H, even unless == H) whose working set fits."""
    f32, bf16 = 4, 2
    # resident weights / BN params (double-buffered by the pipeline today)
    wbytes = 2 * (bf16 * 9 * cin * cout + bf16 * 9 * cout * cout + 4 * f32 * cout)

    def cost(th):
        stream = 2 * f32 * (th * W * cin + 4 * W * cin + th * W * cout)  # dbl-buffered blocks
        scratch = f32 * ((th + 4) * (W + 4) * cin + (th + 2) * (W + 2) * cout)
        t1 = (f32 * (th + 2) * W * cout if use_taps1
              else bf16 * (th + 2) * W * 9 * cin + f32 * (th + 2) * W * cout)
        t2 = (f32 * th * W * cout if use_taps2
              else bf16 * th * W * 9 * cout + f32 * th * W * cout)
        return wbytes + stream + scratch + t1 + t2

    cands = [d for d in range(H, 0, -1)
             if H % d == 0 and (d == H or d % 2 == 0)]
    for d in cands:
        if cost(d) <= budget_bytes:
            return d
    return cands[-1]


def _double_conv_fused(x_nhwc, w1f, s1, b1, w2f, s2, b2, tile_h=None):
    """x_nhwc: (N,H,W,Cin) f32; w1f: (9*Cin,Cout) bf16; w2f: (9*Cout,Cout) bf16."""
    N, H, W, Cin = x_nhwc.shape
    Cout = w1f.shape[-1]
    use_taps1 = Cin >= 128    # K=C already fills the MXU -> accumulate 9 tap matmuls
    use_taps2 = Cout >= 128
    vmem_limit, tile_budget = _vmem_budgets()
    TH = (_pick_tile_h(H, W, Cin, Cout, tile_budget, use_taps1, use_taps2)
          if tile_h is None else tile_h)
    if H % TH != 0 or (TH != H and TH % 2 != 0):
        raise ValueError(f"tile_h={TH} must divide H={H} and be even (or == H)")
    n_h = H // TH
    if n_h > 1 and H % 2 != 0:
        raise ValueError("H must be even when tiling the H axis (2-row halo blocks)")

    const2 = lambda n, i: (0, 0)
    weight_specs = [
        pl.BlockSpec((9 * Cin, Cout), const2),    # resident bf16 weights
        pl.BlockSpec((1, Cout), const2),
        pl.BlockSpec((1, Cout), const2),
        pl.BlockSpec((9 * Cout, Cout), const2),
        pl.BlockSpec((1, Cout), const2),
        pl.BlockSpec((1, Cout), const2),
    ]

    if n_h > 1:
        hb = TH // 2               # halo views are blocked in 2-row chunks
        n_hb = H // 2
        up_map = lambda n, i: (n, jnp.maximum(i * hb - 1, 0), 0, 0)
        down_map = lambda n, i: (n, jnp.minimum(i * hb + hb, n_hb - 1), 0, 0)
        in_specs = ([pl.BlockSpec((None, TH, W, Cin), lambda n, i: (n, i, 0, 0)),
                     pl.BlockSpec((None, 2, W, Cin), up_map),
                     pl.BlockSpec((None, 2, W, Cin), down_map)]
                    + weight_specs)
        data_args = (x_nhwc, x_nhwc, x_nhwc)
    else:
        # Single H tile: no halo operands at all (they were pure DMA overhead).
        in_specs = ([pl.BlockSpec((None, TH, W, Cin), lambda n, i: (n, i, 0, 0))]
                    + weight_specs)
        data_args = (x_nhwc,)

    kernel = functools.partial(_double_conv_kernel, has_halo=(n_h > 1),
                               use_taps1=use_taps1, use_taps2=use_taps2)

    return pl.pallas_call(
        kernel,
        out_shape=jax.ShapeDtypeStruct((N, H, W, Cout), x_nhwc.dtype),
        grid_spec=pltpu.PrefetchScalarGridSpec(
            num_scalar_prefetch=0,
            grid=(N, n_h),
            in_specs=in_specs,
            out_specs=pl.BlockSpec((None, TH, W, Cout), lambda n, i: (n, i, 0, 0)),
            scratch_shapes=[
                pltpu.VMEM((TH + 4, W + 4, Cin), jnp.float32),
                pltpu.VMEM((TH + 2, W + 2, Cout), jnp.float32),
            ],
        ),
        compiler_params=pltpu.CompilerParams(
            dimension_semantics=("parallel", "parallel"),
            vmem_limit_bytes=vmem_limit,
        ),
    )(*data_args,
      w1f, s1.reshape(1, Cout), b1.reshape(1, Cout),
      w2f, s2.reshape(1, Cout), b2.reshape(1, Cout))


def _fold_bn(gamma, beta, mean, var, eps=1e-5):
    scale = gamma / jnp.sqrt(var + eps)
    bias = beta - mean * scale
    return scale.astype(jnp.float32), bias.astype(jnp.float32)


@functools.partial(jax.jit, static_argnames=("tile_h",))
def double_conv(x_nchw, params, tile_h=None):
    """DoubleConv forward. x_nchw: (N, Cin, H, W) float32 -> (N, Cout, H, W)."""
    (w1, g1, b1, m1, v1, w2, g2, b2, m2, v2) = params
    Cout, Cin = w1.shape[0], w1.shape[1]
    # NCHW -> NHWC only for PyTorch API parity (see TODO about NHWC end-to-end).
    x = jnp.transpose(x_nchw, (0, 2, 3, 1))
    s1, o1 = _fold_bn(g1, b1, m1, v1)
    s2, o2 = _fold_bn(g2, b2, m2, v2)
    # PyTorch conv weight (Cout, Cin, kh, kw) -> im2col layout (kh*kw*Cin, Cout),
    # cast to bf16 once here: bf16 MXU operands, f32 accumulation in-kernel.
    w1f = jnp.transpose(w1, (2, 3, 1, 0)).reshape(9 * Cin, Cout).astype(jnp.bfloat16)
    w2f = jnp.transpose(w2, (2, 3, 1, 0)).reshape(9 * Cout, Cout).astype(jnp.bfloat16)
    y = _double_conv_fused(x, w1f, s1, o1, w2f, s2, o2, tile_h=tile_h)
    return jnp.transpose(y, (0, 3, 1, 2))                         # NHWC -> NCHW


def _reference(x_nchw, params):
    """Pure-JAX f32 reference (lax conv, NCHW) for correctness checking."""
    (w1, g1, b1, m1, v1, w2, g2, b2, m2, v2) = params

    def block(x, w, g, b, m, v):
        y = lax.conv_general_dilated(
            x, w, window_strides=(1, 1), padding=((1, 1), (1, 1)),
            dimension_numbers=("NCHW", "OIHW", "NCHW"))
        s, o = _fold_bn(g, b, m, v)
        y = y * s[None, :, None, None] + o[None, :, None, None]
        return jnp.maximum(y, 0.0)

    y = block(x_nchw, w1, g1, b1, m1, v1)
    return block(y, w2, g2, b2, m2, v2)


def make_params(key, in_ch, out_ch):
    ks = jax.random.split(key, 8)
    w1 = 0.1 * jax.random.normal(ks[0], (out_ch, in_ch, 3, 3), jnp.float32)
    w2 = 0.1 * jax.random.normal(ks[1], (out_ch, out_ch, 3, 3), jnp.float32)
    g1 = 1.0 + 0.1 * jax.random.normal(ks[2], (out_ch,), jnp.float32)
    b1 = 0.1 * jax.random.normal(ks[3], (out_ch,), jnp.float32)
    m1 = 0.1 * jax.random.normal(ks[4], (out_ch,), jnp.float32)
    v1 = jax.random.uniform(ks[5], (out_ch,), jnp.float32, 0.5, 1.5)
    g2 = 1.0 + 0.1 * jax.random.normal(ks[6], (out_ch,), jnp.float32)
    b2 = 0.1 * jax.random.normal(ks[7], (out_ch,), jnp.float32)
    m2 = jnp.zeros((out_ch,), jnp.float32)
    v2 = jnp.ones((out_ch,), jnp.float32)
    return (w1, g1, b1, m1, v1, w2, g2, b2, m2, v2)


if __name__ == "__main__":
    key = jax.random.PRNGKey(0)
    k_x, k_p = jax.random.split(key)

    N, IN_CH, OUT_CH, H, W = 2, 4, 8, 16, 16
    x = jax.random.normal(k_x, (N, IN_CH, H, W), jnp.float32)
    params = make_params(k_p, IN_CH, OUT_CH)

    ref = jax.block_until_ready(_reference(x, params))

    # default tiling (single H tile at this toy size -> halo-free kernel variant)
    out = jax.block_until_ready(double_conv(x, params))
    assert out.shape == (N, OUT_CH, H, W)
    err = float(jnp.max(jnp.abs(out - ref)))
    # bf16 MXU operands (f32 accumulate) -> looser tolerance vs the f32 reference.
    assert jnp.allclose(out, ref, atol=5e-2, rtol=5e-2), err

    # explicitly exercise the halo-tiled path (two H tiles per image)
    out_tiled = jax.block_until_ready(double_conv(x, params, tile_h=8))
    err2 = float(jnp.max(jnp.abs(out_tiled - ref)))
    assert jnp.allclose(out_tiled, ref, atol=5e-2, rtol=5e-2), err2

    print("KERNEL_OK")
</pallas_src>

<mosaic_0001>
module attributes {stable_mosaic.version = 11 : i64} {
  func.func @_double_conv_kernel(%arg0: i32, %arg1: i32, %arg2: memref<1x16x16x4xf32, #tpu.memory_space<vmem>>, %arg3: memref<36x8xbf16, #tpu.memory_space<vmem>>, %arg4: memref<1x8xf32, #tpu.memory_space<vmem>>, %arg5: memref<1x8xf32, #tpu.memory_space<vmem>>, %arg6: memref<72x8xbf16, #tpu.memory_space<vmem>>, %arg7: memref<1x8xf32, #tpu.memory_space<vmem>>, %arg8: memref<1x8xf32, #tpu.memory_space<vmem>>, %arg9: memref<1x16x16x8xf32, #tpu.memory_space<vmem>>, %arg10: memref<20x20x4xf32, #tpu.memory_space<vmem>>, %arg11: memref<18x18x8xf32, #tpu.memory_space<vmem>>) attributes {dimension_semantics = [#tpu.dimension_semantics<parallel>, #tpu.dimension_semantics<parallel>], iteration_bounds = array<i64: 2, 1>, scalar_prefetch = 0 : i64, scratch_operands = 2 : i64, tpu.core_type = #tpu.core_type<tc>, window_params = [{transform_indices = @transform_0, window_bounds = array<i64: 1, 16, 16, 4>}, {pipeline_mode = #tpu.pipeline_mode<synchronous>, transform_indices = @transform_1, window_bounds = array<i64: 36, 8>}, {pipeline_mode = #tpu.pipeline_mode<synchronous>, transform_indices = @transform_2, window_bounds = array<i64: 1, 8>}, {pipeline_mode = #tpu.pipeline_mode<synchronous>, transform_indices = @transform_3, window_bounds = array<i64: 1, 8>}, {pipeline_mode = #tpu.pipeline_mode<synchronous>, transform_indices = @transform_4, window_bounds = array<i64: 72, 8>}, {pipeline_mode = #tpu.pipeline_mode<synchronous>, transform_indices = @transform_5, window_bounds = array<i64: 1, 8>}, {pipeline_mode = #tpu.pipeline_mode<synchronous>, transform_indices = @transform_6, window_bounds = array<i64: 1, 8>}, {transform_indices = @transform_7, window_bounds = array<i64: 1, 16, 16, 8>}]} {
    %cst = arith.constant 0.000000e+00 : f32
    %0 = vector.broadcast %cst : f32 to vector<20x2x4xf32>
    %c0 = arith.constant 0 : index
    %c0_0 = arith.constant 0 : index
    %c0_1 = arith.constant 0 : index
    %1 = vector.load %arg10[%c0, %c0_0, %c0_1] : memref<20x20x4xf32, #tpu.memory_space<vmem>>, vector<20x2x4xf32>
    tpu.vector_store %arg10[%c0, %c0_0, %c0_1], %0 {strides = array<i32>} : memref<20x20x4xf32, #tpu.memory_space<vmem>>, vector<20x2x4xf32>,
    %cst_2 = arith.constant 0.000000e+00 : f32
    %2 = vector.broadcast %cst_2 : f32 to vector<20x2x4xf32>
    %c0_3 = arith.constant 0 : index
    %c18 = arith.constant 18 : index
    %c0_4 = arith.constant 0 : index
    %3 = vector.load %arg10[%c0_3, %c18, %c0_4] : memref<20x20x4xf32, #tpu.memory_space<vmem>>, vector<20x2x4xf32>
    tpu.vector_store %arg10[%c0_3, %c18, %c0_4], %2 {strides = array<i32>} : memref<20x20x4xf32, #tpu.memory_space<vmem>>, vector<20x2x4xf32>,
    %c0_5 = arith.constant 0 : index
    %c0_6 = arith.constant 0 : index
    %c0_7 = arith.constant 0 : index
    %c0_8 = arith.constant 0 : index
    %4 = vector.load %arg2[%c0_5, %c0_6, %c0_7, %c0_8] : memref<1x16x16x4xf32, #tpu.memory_space<vmem>>, vector<1x16x16x4xf32>
    %5 = vector.shape_cast %4 : vector<1x16x16x4xf32> to vector<16x16x4xf32>
    %c2 = arith.constant 2 : index
    %c2_9 = arith.constant 2 : index
    %c0_10 = arith.constant 0 : index
    %6 = vector.load %arg10[%c2, %c2_9, %c0_10] : memref<20x20x4xf32, #tpu.memory_space<vmem>>, vector<16x16x4xf32>
    tpu.vector_store %arg10[%c2, %c2_9, %c0_10], %5 {strides = array<i32>} : memref<20x20x4xf32, #tpu.memory_space<vmem>>, vector<16x16x4xf32>,
    %cst_11 = arith.constant 0.000000e+00 : f32
    %7 = vector.broadcast %cst_11 : f32 to vector<2x16x4xf32>
    %c0_12 = arith.constant 0 : index
    %c2_13 = arith.constant 2 : index
    %c0_14 = arith.constant 0 : index
    %8 = vector.load %arg10[%c0_12, %c2_13, %c0_14] : memref<20x20x4xf32, #tpu.memory_space<vmem>>, vector<2x16x4xf32>
    tpu.vector_store %arg10[%c0_12, %c2_13, %c0_14], %7 {strides = array<i32>} : memref<20x20x4xf32, #tpu.memory_space<vmem>>, vector<2x16x4xf32>,
    %cst_15 = arith.constant 0.000000e+00 : f32
    %9 = vector.broadcast %cst_15 : f32 to vector<2x16x4xf32>
    %c18_16 = arith.constant 18 : index
    %c2_17 = arith.constant 2 : index
    %c0_18 = arith.constant 0 : index
    %10 = vector.load %arg10[%c18_16, %c2_17, %c0_18] : memref<20x20x4xf32, #tpu.memory_space<vmem>>, vector<2x16x4xf32>
    tpu.vector_store %arg10[%c18_16, %c2_17, %c0_18], %9 {strides = array<i32>} : memref<20x20x4xf32, #tpu.memory_space<vmem>>, vector<2x16x4xf32>,
    %c0_19 = arith.constant 0 : index
    %c1 = arith.constant 1 : index
    %c0_20 = arith.constant 0 : index
    %11 = vector.load %arg10[%c0_19, %c1, %c0_20] : memref<20x20x4xf32, #tpu.memory_space<vmem>>, vector<18x16x4xf32>
    %12 = arith.truncf %11 : vector<18x16x4xf32> to vector<18x16x4xbf16>
    %c0_21 = arith.constant 0 : index
    %c2_22 = arith.constant 2 : index
    %c0_23 = arith.constant 0 : index
    %13 = vector.load %arg10[%c0_21, %c2_22, %c0_23] : memref<20x20x4xf32, #tpu.memory_space<vmem>>, vector<18x16x4xf32>
    %14 = arith.truncf %13 : vector<18x16x4xf32> to vector<18x16x4xbf16>
    %c0_24 = arith.constant 0 : index
    %c3 = arith.constant 3 : index
    %c0_25 = arith.constant 0 : index
    %15 = vector.load %arg10[%c0_24, %c3, %c0_25] : memref<20x20x4xf32, #tpu.memory_space<vmem>>, vector<18x16x4xf32>
    %16 = arith.truncf %15 : vector<18x16x4xf32> to vector<18x16x4xbf16>
    %c1_26 = arith.constant 1 : index
    %c1_27 = arith.constant 1 : index
    %c0_28 = arith.constant 0 : index
    %17 = vector.load %arg10[%c1_26, %c1_27, %c0_28] : memref<20x20x4xf32, #tpu.memory_space<vmem>>, vector<18x16x4xf32>
    %18 = arith.truncf %17 : vector<18x16x4xf32> to vector<18x16x4xbf16>
    %c1_29 = arith.constant 1 : index
    %c2_30 = arith.constant 2 : index
    %c0_31 = arith.constant 0 : index
    %19 = vector.load %arg10[%c1_29, %c2_30, %c0_31] : memref<20x20x4xf32, #tpu.memory_space<vmem>>, vector<18x16x4xf32>
    %20 = arith.truncf %19 : vector<18x16x4xf32> to vector<18x16x4xbf16>
    %c1_32 = arith.constant 1 : index
    %c3_33 = arith.constant 3 : index
    %c0_34 = arith.constant 0 : index
    %21 = vector.load %arg10[%c1_32, %c3_33, %c0_34] : memref<20x20x4xf32, #tpu.memory_space<vmem>>, vector<18x16x4xf32>
    %22 = arith.truncf %21 : vector<18x16x4xf32> to vector<18x16x4xbf16>
    %c2_35 = arith.constant 2 : index
    %c1_36 = arith.constant 1 : index
    %c0_37 = arith.constant 0 : index
    %23 = vector.load %arg10[%c2_35, %c1_36, %c0_37] : memref<20x20x4xf32, #tpu.memory_space<vmem>>, vector<18x16x4xf32>
    %24 = arith.truncf %23 : vector<18x16x4xf32> to vector<18x16x4xbf16>
    %c2_38 = arith.constant 2 : index
    %c2_39 = arith.constant 2 : index
    %c0_40 = arith.constant 0 : index
    %25 = vector.load %arg10[%c2_38, %c2_39, %c0_40] : memref<20x20x4xf32, #tpu.memory_space<vmem>>, vector<18x16x4xf32>
    %26 = arith.truncf %25 : vector<18x16x4xf32> to vector<18x16x4xbf16>
    %c2_41 = arith.constant 2 : index
    %c3_42 = arith.constant 3 : index
    %c0_43 = arith.constant 0 : index
    %27 = vector.load %arg10[%c2_41, %c3_42, %c0_43] : memref<20x20x4xf32, #tpu.memory_space<vmem>>, vector<18x16x4xf32>
    %28 = arith.truncf %27 : vector<18x16x4xf32> to vector<18x16x4xbf16>
    %29 = tpu.concatenate %12, %14, %16, %18, %20, %22, %24, %26, %28 in 2 : vector<18x16x4xbf16>, vector<18x16x4xbf16>, vector<18x16x4xbf16>, vector<18x16x4xbf16>, vector<18x16x4xbf16>, vector<18x16x4xbf16>, vector<18x16x4xbf16>, vector<18x16x4xbf16>, vector<18x16x4xbf16> -> vector<18x16x36xbf16>
    %30 = vector.shape_cast %29 : vector<18x16x36xbf16> to vector<288x36xbf16>
    %c0_44 = arith.constant 0 : index
    %c0_45 = arith.constant 0 : index
    %31 = vector.load %arg3[%c0_44, %c0_45] : memref<36x8xbf16, #tpu.memory_space<vmem>>, vector<36x8xbf16>
    %cst_46 = arith.constant dense<0.000000e+00> : vector<288x8xf32>
    %32 = tpu.matmul %30, %31, %cst_46 {dimension_numbers = #tpu.dot_dimension_numbers<[1], [0], [0], [1], [0, 0, 1, 1], [], []>} : vector<288x36xbf16>, vector<36x8xbf16>, vector<288x8xf32> -> vector<288x8xf32>
    %c0_47 = arith.constant 0 : index
    %c0_48 = arith.constant 0 : index
    %33 = vector.load %arg4[%c0_47, %c0_48] : memref<1x8xf32, #tpu.memory_space<vmem>>, vector<1x8xf32>
    %34 = vector.broadcast %33 : vector<1x8xf32> to vector<288x8xf32>
    %35 = arith.mulf %32, %34 : vector<288x8xf32>
    %c0_49 = arith.constant 0 : index
    %c0_50 = arith.constant 0 : index
    %36 = vector.load %arg5[%c0_49, %c0_50] : memref<1x8xf32, #tpu.memory_space<vmem>>, vector<1x8xf32>
    %37 = vector.broadcast %36 : vector<1x8xf32> to vector<288x8xf32>
    %38 = arith.addf %35, %37 : vector<288x8xf32>
    %cst_51 = arith.constant 0.000000e+00 : f32
    %39 = vector.broadcast %cst_51 : f32 to vector<288x8xf32>
    %40 = arith.maximumf %38, %39 : vector<288x8xf32>
    %41 = vector.shape_cast %40 : vector<288x8xf32> to vector<18x16x8xf32>
    %c0_52 = arith.constant 0 : index
    %c1_53 = arith.constant 1 : index
    %c0_54 = arith.constant 0 : index
    %42 = vector.load %arg11[%c0_52, %c1_53, %c0_54] : memref<18x18x8xf32, #tpu.memory_space<vmem>>, vector<18x16x8xf32>
    tpu.vector_store %arg11[%c0_52, %c1_53, %c0_54], %41 {strides = array<i32>} : memref<18x18x8xf32, #tpu.memory_space<vmem>>, vector<18x16x8xf32>,
    %cst_55 = arith.constant 0.000000e+00 : f32
    %43 = vector.broadcast %cst_55 : f32 to vector<18x1x8xf32>
    %c0_56 = arith.constant 0 : index
    %c0_57 = arith.constant 0 : index
    %c0_58 = arith.constant 0 : index
    %44 = vector.load %arg11[%c0_56, %c0_57, %c0_58] : memref<18x18x8xf32, #tpu.memory_space<vmem>>, vector<18x1x8xf32>
    tpu.vector_store %arg11[%c0_56, %c0_57, %c0_58], %43 {strides = array<i32>} : memref<18x18x8xf32, #tpu.memory_space<vmem>>, vector<18x1x8xf32>,
    %cst_59 = arith.constant 0.000000e+00 : f32
    %45 = vector.broadcast %cst_59 : f32 to vector<18x1x8xf32>
    %c0_60 = arith.constant 0 : index
    %c17 = arith.constant 17 : index
    %c0_61 = arith.constant 0 : index
    %46 = vector.load %arg11[%c0_60, %c17, %c0_61] : memref<18x18x8xf32, #tpu.memory_space<vmem>>, vector<18x1x8xf32>
    tpu.vector_store %arg11[%c0_60, %c17, %c0_61], %45 {strides = array<i32>} : memref<18x18x8xf32, #tpu.memory_space<vmem>>, vector<18x1x8xf32>,
    %cst_62 = arith.constant 0.000000e+00 : f32
    %47 = vector.broadcast %cst_62 : f32 to vector<1x18x8xf32>
    %c0_63 = arith.constant 0 : index
    %c0_64 = arith.constant 0 : index
    %c0_65 = arith.constant 0 : index
    %48 = vector.load %arg11[%c0_63, %c0_64, %c0_65] : memref<18x18x8xf32, #tpu.memory_space<vmem>>, vector<1x18x8xf32>
    tpu.vector_store %arg11[%c0_63, %c0_64, %c0_65], %47 {strides = array<i32>} : memref<18x18x8xf32, #tpu.memory_space<vmem>>, vector<1x18x8xf32>,
    %cst_66 = arith.constant 0.000000e+00 : f32
    %49 = vector.broadcast %cst_66 : f32 to vector<1x18x8xf32>
    %c17_67 = arith.constant 17 : index
    %c0_68 = arith.constant 0 : index
    %c0_69 = arith.constant 0 : index
    %50 = vector.load %arg11[%c17_67, %c0_68, %c0_69] : memref<18x18x8xf32, #tpu.memory_space<vmem>>, vector<1x18x8xf32>
    tpu.vector_store %arg11[%c17_67, %c0_68, %c0_69], %49 {strides = array<i32>} : memref<18x18x8xf32, #tpu.memory_space<vmem>>, vector<1x18x8xf32>,
    %c0_70 = arith.constant 0 : index
    %c0_71 = arith.constant 0 : index
    %c0_72 = arith.constant 0 : index
    %51 = vector.load %arg11[%c0_70, %c0_71, %c0_72] : memref<18x18x8xf32, #tpu.memory_space<vmem>>, vector<16x16x8xf32>
    %52 = arith.truncf %51 : vector<16x16x8xf32> to vector<16x16x8xbf16>
    %c0_73 = arith.constant 0 : index
    %c1_74 = arith.constant 1 : index
    %c0_75 = arith.constant 0 : index
    %53 = vector.load %arg11[%c0_73, %c1_74, %c0_75] : memref<18x18x8xf32, #tpu.memory_space<vmem>>, vector<16x16x8xf32>
    %54 = arith.truncf %53 : vector<16x16x8xf32> to vector<16x16x8xbf16>
    %c0_76 = arith.constant 0 : index
    %c2_77 = arith.constant 2 : index
    %c0_78 = arith.constant 0 : index
    %55 = vector.load %arg11[%c0_76, %c2_77, %c0_78] : memref<18x18x8xf32, #tpu.memory_space<vmem>>, vector<16x16x8xf32>
    %56 = arith.truncf %55 : vector<16x16x8xf32> to vector<16x16x8xbf16>
    %c1_79 = arith.constant 1 : index
    %c0_80 = arith.constant 0 : index
    %c0_81 = arith.constant 0 : index
    %57 = vector.load %arg11[%c1_79, %c0_80, %c0_81] : memref<18x18x8xf32, #tpu.memory_space<vmem>>, vector<16x16x8xf32>
    %58 = arith.truncf %57 : vector<16x16x8xf32> to vector<16x16x8xbf16>
    %c1_82 = arith.constant 1 : index
    %c1_83 = arith.constant 1 : index
    %c0_84 = arith.constant 0 : index
    %59 = vector.load %arg11[%c1_82, %c1_83, %c0_84] : memref<18x18x8xf32, #tpu.memory_space<vmem>>, vector<16x16x8xf32>
    %60 = arith.truncf %59 : vector<16x16x8xf32> to vector<16x16x8xbf16>
    %c1_85 = arith.constant 1 : index
    %c2_86 = arith.constant 2 : index
    %c0_87 = arith.constant 0 : index
    %61 = vector.load %arg11[%c1_85, %c2_86, %c0_87] : memref<18x18x8xf32, #tpu.memory_space<vmem>>, vector<16x16x8xf32>
    %62 = arith.truncf %61 : vector<16x16x8xf32> to vector<16x16x8xbf16>
    %c2_88 = arith.constant 2 : index
    %c0_89 = arith.constant 0 : index
    %c0_90 = arith.constant 0 : index
    %63 = vector.load %arg11[%c2_88, %c0_89, %c0_90] : memref<18x18x8xf32, #tpu.memory_space<vmem>>, vector<16x16x8xf32>
    %64 = arith.truncf %63 : vector<16x16x8xf32> to vector<16x16x8xbf16>
    %c2_91 = arith.constant 2 : index
    %c1_92 = arith.constant 1 : index
    %c0_93 = arith.constant 0 : index
    %65 = vector.load %arg11[%c2_91, %c1_92, %c0_93] : memref<18x18x8xf32, #tpu.memory_space<vmem>>, vector<16x16x8xf32>
    %66 = arith.truncf %65 : vector<16x16x8xf32> to vector<16x16x8xbf16>
    %c2_94 = arith.constant 2 : index
    %c2_95 = arith.constant 2 : index
    %c0_96 = arith.constant 0 : index
    %67 = vector.load %arg11[%c2_94, %c2_95, %c0_96] : memref<18x18x8xf32, #tpu.memory_space<vmem>>, vector<16x16x8xf32>
    %68 = arith.truncf %67 : vector<16x16x8xf32> to vector<16x16x8xbf16>
    %69 = tpu.concatenate %52, %54, %56, %58, %60, %62, %64, %66, %68 in 2 : vector<16x16x8xbf16>, vector<16x16x8xbf16>, vector<16x16x8xbf16>, vector<16x16x8xbf16>, vector<16x16x8xbf16>, vector<16x16x8xbf16>, vector<16x16x8xbf16>, vector<16x16x8xbf16>, vector<16x16x8xbf16> -> vector<16x16x72xbf16>
    %70 = vector.shape_cast %69 : vector<16x16x72xbf16> to vector<256x72xbf16>
    %c0_97 = arith.constant 0 : index
    %c0_98 = arith.constant 0 : index
    %71 = vector.load %arg6[%c0_97, %c0_98] : memref<72x8xbf16, #tpu.memory_space<vmem>>, vector<72x8xbf16>
    %cst_99 = arith.constant dense<0.000000e+00> : vector<256x8xf32>
    %72 = tpu.matmul %70, %71, %cst_99 {dimension_numbers = #tpu.dot_dimension_numbers<[1], [0], [0], [1], [0, 0, 1, 1], [], []>} : vector<256x72xbf16>, vector<72x8xbf16>, vector<256x8xf32> -> vector<256x8xf32>
    %c0_100 = arith.constant 0 : index
    %c0_101 = arith.constant 0 : index
    %73 = vector.load %arg7[%c0_100, %c0_101] : memref<1x8xf32, #tpu.memory_space<vmem>>, vector<1x8xf32>
    %74 = vector.broadcast %73 : vector<1x8xf32> to vector<256x8xf32>
    %75 = arith.mulf %72, %74 : vector<256x8xf32>
    %c0_102 = arith.constant 0 : index
    %c0_103 = arith.constant 0 : index
    %76 = vector.load %arg8[%c0_102, %c0_103] : memref<1x8xf32, #tpu.memory_space<vmem>>, vector<1x8xf32>
    %77 = vector.broadcast %76 : vector<1x8xf32> to vector<256x8xf32>
    %78 = arith.addf %75, %77 : vector<256x8xf32>
    %cst_104 = arith.constant 0.000000e+00 : f32
    %79 = vector.broadcast %cst_104 : f32 to vector<256x8xf32>
    %80 = arith.maximumf %78, %79 : vector<256x8xf32>
    %81 = vector.shape_cast %80 : vector<256x8xf32> to vector<16x16x8xf32>
    %c0_105 = arith.constant 0 : index
    %c0_106 = arith.constant 0 : index
    %c0_107 = arith.constant 0 : index
    %c0_108 = arith.constant 0 : index
    %82 = vector.load %arg9[%c0_105, %c0_106, %c0_107, %c0_108] : memref<1x16x16x8xf32, #tpu.memory_space<vmem>>, vector<1x16x16x8xf32>
    %83 = vector.shape_cast %82 : vector<1x16x16x8xf32> to vector<16x16x8xf32>
    %84 = vector.shape_cast %81 : vector<16x16x8xf32> to vector<1x16x16x8xf32>
    tpu.vector_store %arg9[%c0_105, %c0_106, %c0_107, %c0_108], %84 {strides = array<i32>} : memref<1x16x16x8xf32, #tpu.memory_space<vmem>>, vector<1x16x16x8xf32>,
    return
  }
  func.func @transform_0(%arg0: i32, %arg1: i32) -> (i32, i32, i32, i32) {
    %c0_i32 = arith.constant 0 : i32
    %c0_i32_0 = arith.constant 0 : i32
    %c0_i32_1 = arith.constant 0 : i32
    return %arg0, %arg1, %c0_i32, %c0_i32_0 : i32, i32, i32, i32
  }
  func.func @transform_1(%arg0: i32, %arg1: i32) -> (i32, i32) {
    %c0_i32 = arith.constant 0 : i32
    %c0_i32_0 = arith.constant 0 : i32
    %c0_i32_1 = arith.constant 0 : i32
    return %c0_i32, %c0_i32_0 : i32, i32
  }
  func.func @transform_2(%arg0: i32, %arg1: i32) -> (i32, i32) {
    %c0_i32 = arith.constant 0 : i32
    %c0_i32_0 = arith.constant 0 : i32
    %c0_i32_1 = arith.constant 0 : i32
    return %c0_i32, %c0_i32_0 : i32, i32
  }
  func.func @transform_3(%arg0: i32, %arg1: i32) -> (i32, i32) {
    %c0_i32 = arith.constant 0 : i32
    %c0_i32_0 = arith.constant 0 : i32
    %c0_i32_1 = arith.constant 0 : i32
    return %c0_i32, %c0_i32_0 : i32, i32
  }
  func.func @transform_4(%arg0: i32, %arg1: i32) -> (i32, i32) {
    %c0_i32 = arith.constant 0 : i32
    %c0_i32_0 = arith.constant 0 : i32
    %c0_i32_1 = arith.constant 0 : i32
    return %c0_i32, %c0_i32_0 : i32, i32
  }
  func.func @transform_5(%arg0: i32, %arg1: i32) -> (i32, i32) {
    %c0_i32 = arith.constant 0 : i32
    %c0_i32_0 = arith.constant 0 : i32
    %c0_i32_1 = arith.constant 0 : i32
    return %c0_i32, %c0_i32_0 : i32, i32
  }
  func.func @transform_6(%arg0: i32, %arg1: i32) -> (i32, i32) {
    %c0_i32 = arith.constant 0 : i32
    %c0_i32_0 = arith.constant 0 : i32
    %c0_i32_1 = arith.constant 0 : i32
    return %c0_i32, %c0_i32_0 : i32, i32
  }
  func.func @transform_7(%arg0: i32, %arg1: i32) -> (i32, i32, i32, i32) {
    %c0_i32 = arith.constant 0 : i32
    %c0_i32_0 = arith.constant 0 : i32
    %c0_i32_1 = arith.constant 0 : i32
    return %arg0, %arg1, %c0_i32, %c0_i32_0 : i32, i32, i32, i32
  }
}

</mosaic_0001>

<bundles_post_ra>
// kernel: double_conv.1
= control target key start
LH: loop header
LB: loop body
LE: loop exit
PB: predicated region body
PF: predicated region fallthrough
CT: control target
= control target key end

     0   :  { %s3990_s24 = smov 0   ;;  %s3992_s25 = smov 0   ;;  %s5404_s0 = inlined_call_operand.vmem [shape: f32[2,16,16,4], index: 0, kind: input, shape index: {}]   ;;  %s5405_s1 = inlined_call_operand.vmem [shape: bf16[36,8], index: 1, kind: input, shape index: {}]   ;;  %s5406_s2 = inlined_call_operand.vmem [shape: f32[1,8], index: 2, kind: input, shape index: {}]   ;;  %s5407_s3 = inlined_call_operand.vmem [shape: f32[1,8], index: 3, kind: input, shape index: {}]   ;;  %s5408_s4 = inlined_call_operand.vmem [shape: bf16[72,8], index: 4, kind: input, shape index: {}]   ;;  %s5409_s5 = inlined_call_operand.vmem [shape: f32[1,8], index: 5, kind: input, shape index: {}]   ;;  %s5410_s6 = inlined_call_operand.vmem [shape: f32[1,8], index: 6, kind: input, shape index: {}]   ;;  %s5411_s7 = inlined_call_operand.vmem [shape: f32[2,16,16,8], index: 7, kind: output, shape index: {}]  }
   0x1   :  { %s3994_s26 = smov 0  }
   0x2 LB: > { %s29_s27 = sadd.s32 1, %s3931_s25  ;;  %p3683_p0 = scmp.ge.s32.totalorder %s3935_s26, 1  ;;  %s3935_s26 = sphi %s3994_s26, %s17_s26   ;;  %s3931_s25 = sphi %s3992_s25, %s5413_s25   ;;  %s3927_s24 = sphi %s3990_s24, %s5412_s24  }
   0x3   : > { %p31_p1 = scmp.ge.s32.totalorder %s29_s27, 2  ;;  %p259_p2 = scmp.lt.s32.totalorder %s3935_s26, 3 }
   0x5   : > { %s5415_s27 = smov (%p31_p1, %s29_s27), 0  ;;  %p260_p3 = pnand %p3683_p0, %p259_p2 }
   0x6   : > { %vm398_vm0 = vcmask (!%p260_p3), 31744   ;;  %vm324_vm1 = vcmask (!%p260_p3), 25600   ;;  %v3937_v0 = vmov (!%p260_p3), 0.0   ;;  %p302_p4 = scmp.lt.s32.totalorder (!%p260_p3), %s3927_s24, 1  ;;  %s3938_s9 = smov (!%p260_p3), 4   ;;  %v3903_v47 = vld [vmem:[%s5405_s1] sm:$0xff] (!%p260_p3)  }
   0x7   : > { %263 = sbr.rel (%p260_p3) target bundleno = 1022 (0x3fe), region = 48  ;;  %431 = vst.msk [vmem:[#allocation2 + $0x2] sm:$0xff] (!%p260_p3), %vm398_vm0, %v3937_v0  ;;  %432 = vst.msk [vmem:[#allocation2 + $0xa] sm:$0xff] (!%p260_p3), %vm398_vm0, %v3937_v0  ;;  %s3939_s10 = smov (!%p260_p3), 8   ;;  %v3904_v50 = vld [vmem:[%s5405_s1 + $0x8] sm:$0xff] (!%p260_p3)   ;;  %3780 = vmatprep.subr.bf16.mxu0 (!%p260_p3), %v3903_v47  ;;  %vm1729_vm2 = vcmask (!%p260_p3), 1041408  }
   0x8   : > { %433 = vst.msk [vmem:[#allocation2 + $0x1a] sm:$0xff] (!%p260_p3), %vm398_vm0, %v3937_v0  ;;  %434 = vst.msk [vmem:[#allocation2 + $0x22] sm:$0xff] (!%p260_p3), %vm398_vm0, %v3937_v0  ;;  %s3940_s11 = smov (!%p260_p3), 12   ;;  %s3941_s12 = smov (!%p260_p3), 16   ;;  %3781 = vmatpush3.bf16.msra.mxu0 (!%p260_p3), %v3903_v47  ;;  %vm1413_vm3 = vcmask (!%p260_p3), 64512   ;;  %vm1450_vm4 = vcmask (!%p260_p3), 97280  }
   0x9   : > { %436 = vst.msk [vmem:[#allocation2 + $0x1b2] sm:$0xff] (!%p260_p3), %vm398_vm0, %v3937_v0  ;;  %437 = vst.msk [vmem:[#allocation2 + $0x1ba] sm:$0xff] (!%p260_p3), %vm398_vm0, %v3937_v0  ;;  %s3942_s13 = smov (!%p260_p3), 20   ;;  %s3943_s14 = smov (!%p260_p3), 24   ;;  %3782 = vmatprep.subr.bf16.mxu0 (!%p260_p3), %v3904_v50  ;;  %vm1487_vm5 = vcmask (!%p260_p3), 130048   ;;  %vm1524_vm6 = vcmask (!%p260_p3), 162816  }
   0xa   : > { %438 = vst.msk [vmem:[#allocation2 + $0x1ca] sm:$0xff] (!%p260_p3), %vm398_vm0, %v3937_v0  ;;  %439 = vst.msk [vmem:[#allocation2 + $0x1d2] sm:$0xff] (!%p260_p3), %vm398_vm0, %v3937_v0  ;;  %s3944_s19 = smov (!%p260_p3), 28   ;;  %v3905_v55 = vld [vmem:[%s5405_s1 + $0x10] ss:$0 sps:$4 sm:$0x33] (!%p260_p3)  }
   0xb   : > { %345 = vst.msk [vmem:[#allocation2 + $0x12] sm:$0x3] (!%p260_p3), %vm324_vm1, %v3937_v0  ;;  %325 = vst.msk [vmem:[#allocation2] sm:$0x3] (!%p260_p3), %vm324_vm1, %v3937_v0  ;;  %s3945_s22 = smov (!%p260_p3), 32   ;;  %v1731_v57 = vsel (!%p260_p3), %vm1729_vm2, %v3905_v55, 0 }
   0xc   : > { %326 = vst.msk [vmem:[#allocation2 + $0x18] sm:$0x3] (!%p260_p3), %vm324_vm1, %v3937_v0  ;;  %327 = vst.msk [vmem:[#allocation2 + $0x30] sm:$0x3] (!%p260_p3), %vm324_vm1, %v3937_v0  ;;  %3783 = vmatpush3.bf16.msra.mxu0 (!%p260_p3), %v3904_v50  ;;  %vm1561_vm7 = vcmask (!%p260_p3), 195584   ;;  %vm1598_vm8 = vcmask (!%p260_p3), 228352  }
   0xd   : > { %328 = vst.msk [vmem:[#allocation2 + $0x48] sm:$0x3] (!%p260_p3), %vm324_vm1, %v3937_v0  ;;  %329 = vst.msk [vmem:[#allocation2 + $0x60] sm:$0x3] (!%p260_p3), %vm324_vm1, %v3937_v0  ;;  %3864 = vmatprep.subr.msk.bf16.mxu0 (!%p260_p3), %vm1729_vm2, %v3905_v55  ;;  %vm1635_vm9 = vcmask (!%p260_p3), 261120   ;;  %vm1692_vm10 = vcmask (!%p260_p3), 293888  }
   0xe   : > { %330 = vst.msk [vmem:[#allocation2 + $0x78] sm:$0x3] %vm324_vm1, %v3937_v0  ;;  %331 = vst.msk [vmem:[#allocation2 + $0x90] sm:$0x3] %vm324_vm1, %v3937_v0  ;;  %s5417_s24 = smov (!%p302_p4, %s3927_s24), 1  ;;  %v494_v4 = vld [vmem:[#allocation2 + $0x2] sm:$0xff] }
   0xf   : > { %332 = vst.msk [vmem:[#allocation2 + $0xa8] sm:$0x3] %vm324_vm1, %v3937_v0  ;;  %333 = vst.msk [vmem:[#allocation2 + $0xc0] sm:$0x3] %vm324_vm1, %v3937_v0  ;;  %s3736_s28 = sshll.u32 %s5417_s24, 8  ;;  %v495_v5 = vld [vmem:[#allocation2 + $0xa] sm:$0xff] }
  0x10   : > { %334 = vst.msk [vmem:[#allocation2 + $0xd8] sm:$0x3] %vm324_vm1, %v3937_v0  ;;  %335 = vst.msk [vmem:[#allocation2 + $0xf0] sm:$0x3] %vm324_vm1, %v3937_v0  ;;  %s4116_s8 = scalar_lea.vmem %s5404_s0, %s3736_s28  ;;  %v548_v6 = vld [vmem:[#allocation2 + $0x3] sm:$0xff]  ;;  %v530_v7 = vpack.c.bf16 %v495_v5, %v494_v4  ;;  %v496_v9 = vld [vmem:[#allocation2 + $0x1a] sm:$0xff]  ;;  %3785 = vmatpush3.bf16.msra.mxu0 %v1731_v57 }
  0x11   : > { %336 = vst.msk [vmem:[#allocation2 + $0x108] sm:$0x3] %vm324_vm1, %v3937_v0  ;;  %337 = vst.msk [vmem:[#allocation2 + $0x120] sm:$0x3] %vm324_vm1, %v3937_v0  ;;  %v365_v1 = vld [vmem:[%s4116_s8] sm:$0xff]  ;;  %v366_v2 = vld [vmem:[%s4116_s8 + $0x8] sm:$0xff] }
  0x12   : > { %338 = vst.msk [vmem:[#allocation2 + $0x138] sm:$0x3] %vm324_vm1, %v3937_v0  ;;  %339 = vst.msk [vmem:[#allocation2 + $0x150] sm:$0x3] %vm324_vm1, %v3937_v0  ;;  %v367_v3 = vld [vmem:[%s4116_s8 + $0x10] sm:$0xff]  ;;  %v497_v10 = vld [vmem:[#allocation2 + $0x22] sm:$0xff]  ;;  %945 = vrot.lane.b32.xlu0 %v530_v7, %s3938_s9 }
  0x13   : > { %340 = vst.msk [vmem:[#allocation2 + $0x168] sm:$0x3] %vm324_vm1, %v3937_v0  ;;  %341 = vst.msk [vmem:[#allocation2 + $0x180] sm:$0x3] %vm324_vm1, %v3937_v0  ;;  %v549_v8 = vld [vmem:[#allocation2 + $0xb] sm:$0xff]  ;;  %v550_v12 = vld [vmem:[#allocation2 + $0x1b] sm:$0xff]  ;;  %v531_v15 = vpack.c.bf16 %v497_v10, %v496_v9 }
  0x14   : > { %342 = vst.msk [vmem:[#allocation2 + $0x198] sm:$0x3] %vm324_vm1, %v3937_v0  ;;  %343 = vst.msk [vmem:[#allocation2 + $0x1b0] sm:$0x3] %vm324_vm1, %v3937_v0  ;;  %v584_v11 = vpack.c.bf16 %v549_v8, %v548_v6  ;;  %v603_v14 = vld [vmem:[#allocation2 + $0x19] sm:$0xff]  ;;  %v604_v16 = vld [vmem:[#allocation2 + $0x21] sm:$0xff] }
  0x15   : > { %344 = vst.msk [vmem:[#allocation2 + $0x1c8] sm:$0x3] %vm324_vm1, %v3937_v0  ;;  %346 = vst.msk [vmem:[#allocation2 + $0x2a] sm:$0x3] %vm324_vm1, %v3937_v0  ;;  %v368_v17 = vld [vmem:[%s4116_s8 + $0x18] sm:$0xff]  ;;  %v369_v18 = vld [vmem:[%s4116_s8 + $0x20] sm:$0xff]  ;;  %v4146_v29 = vpack.c.bf16 %v604_v16, %v603_v14 }
  0x16   : > { %347 = vst.msk [vmem:[#allocation2 + $0x42] sm:$0x3] %vm324_vm1, %v3937_v0  ;;  %348 = vst.msk [vmem:[#allocation2 + $0x5a] sm:$0x3] %vm324_vm1, %v3937_v0  ;;  %999 = vrot.lane.b32.xlu1 %v584_v11, %s3939_s10  ;;  %v370_v20 = vld [vmem:[%s4116_s8 + $0x28] sm:$0xff]  ;;  %v371_v21 = vld [vmem:[%s4116_s8 + $0x30] sm:$0xff]  ;;  %947 = vrot.lane.b32.xlu0 %v531_v15, %s3938_s9 }
  0x17   : > { %349 = vst.msk [vmem:[#allocation2 + $0x72] sm:$0x3] %vm324_vm1, %v3937_v0  ;;  %350 = vst.msk [vmem:[#allocation2 + $0x8a] sm:$0x3] %vm324_vm1, %v3937_v0  ;;  %v372_v22 = vld [vmem:[%s4116_s8 + $0x38] sm:$0xff]  ;;  %v373_v23 = vld [vmem:[%s4116_s8 + $0x40] sm:$0xff] }
  0x18   : > { %351 = vst.msk [vmem:[#allocation2 + $0xa2] sm:$0x3] %vm324_vm1, %v3937_v0  ;;  %352 = vst.msk [vmem:[#allocation2 + $0xba] sm:$0x3] %vm324_vm1, %v3937_v0  ;;  %v374_v24 = vld [vmem:[%s4116_s8 + $0x48] sm:$0xff]  ;;  %v375_v25 = vld [vmem:[%s4116_s8 + $0x50] sm:$0xff] }
  0x19   : > { %353 = vst.msk [vmem:[#allocation2 + $0xd2] sm:$0x3] %vm324_vm1, %v3937_v0  ;;  %354 = vst.msk [vmem:[#allocation2 + $0xea] sm:$0x3] %vm324_vm1, %v3937_v0  ;;  %v376_v26 = vld [vmem:[%s4116_s8 + $0x58] sm:$0xff]  ;;  %v377_v27 = vld [vmem:[%s4116_s8 + $0x60] sm:$0xff] }
  0x1a   : > { %355 = vst.msk [vmem:[#allocation2 + $0x102] sm:$0x3] %vm324_vm1, %v3937_v0  ;;  %356 = vst.msk [vmem:[#allocation2 + $0x11a] sm:$0x3] %vm324_vm1, %v3937_v0  ;;  %v378_v28 = vld [vmem:[%s4116_s8 + $0x68] sm:$0xff]  ;;  %v379_v35 = vld [vmem:[%s4116_s8 + $0x70] sm:$0xff]  ;;  %1053 = vrot.lane.b32.xlu0 %v4146_v29, %s3940_s11 }
  0x1b   : > { %357 = vst.msk [vmem:[#allocation2 + $0x132] sm:$0x3] %vm324_vm1, %v3937_v0  ;;  %358 = vst.msk [vmem:[#allocation2 + $0x14a] sm:$0x3] %vm324_vm1, %v3937_v0  ;;  %v380_v36 = vld [vmem:[%s4116_s8 + $0x78] sm:$0xff]  ;;  %v381_v48 = vld [vmem:[%s4116_s8 + $0x80] sm:$0xff] }
  0x1c   : > { %359 = vst.msk [vmem:[#allocation2 + $0x162] sm:$0x3] %vm324_vm1, %v3937_v0  ;;  %360 = vst.msk [vmem:[#allocation2 + $0x17a] sm:$0x3] %vm324_vm1, %v3937_v0  ;;  %v551_v13 = vld [vmem:[#allocation2 + $0x23] sm:$0xff]  ;;  %v383_v51 = vld [vmem:[%s4116_s8 + $0x90] sm:$0xff] }
  0x1d   : > { %361 = vst.msk [vmem:[#allocation2 + $0x192] sm:$0x3] %vm324_vm1, %v3937_v0  ;;  %362 = vst.msk [vmem:[#allocation2 + $0x1aa] sm:$0x3] %vm324_vm1, %v3937_v0  ;;  %v585_v19 = vpack.c.bf16 %v551_v13, %v550_v12  ;;  %v382_v49 = vld [vmem:[%s4116_s8 + $0x88] sm:$0xff]  ;;  %v384_v52 = vld [vmem:[%s4116_s8 + $0x98] sm:$0xff] }
  0x1e   : > { %363 = vst.msk [vmem:[#allocation2 + $0x1c2] sm:$0x3] %vm324_vm1, %v3937_v0  ;;  %364 = vst.msk [vmem:[#allocation2 + $0x1da] sm:$0x3] %vm324_vm1, %v3937_v0  ;;  %1107 = vrot.lane.b32.xlu0 %v531_v15, %s3941_s12  ;;  %v385_v58 = vld [vmem:[%s4116_s8 + $0xa0] sm:$0xff]  ;;  %v386_v59 = vld [vmem:[%s4116_s8 + $0xa8] sm:$0xff] }
  0x1f   : > { %399 = vst.msk [vmem:[#allocation2 + $0x32] sm:$0xff] %vm398_vm0, %v365_v1  ;;  %400 = vst.msk [vmem:[#allocation2 + $0x3a] sm:$0xff] %vm398_vm0, %v366_v2  ;;  %1001 = vrot.lane.b32.xlu1 %v585_v19, %s3939_s10  ;;  %v387_v5 = vld [vmem:[%s4116_s8 + $0xb0] sm:$0xff]  ;;  %v388_v6 = vld [vmem:[%s4116_s8 + $0xb8] sm:$0xff]  ;;  %vm2068_vm11 = vcmask 57344   ;;  %vm2107_vm12 = vcmask 58368  }
  0x20   : > { %401 = vst.msk [vmem:[#allocation2 + $0x4a] sm:$0xff] %vm398_vm0, %v367_v3  ;;  %402 = vst.msk [vmem:[#allocation2 + $0x52] sm:$0xff] %vm398_vm0, %v368_v17  ;;  %v389_v17 = vld [vmem:[%s4116_s8 + $0xc0] sm:$0xff]  ;;  %s3947_s17 = smov 64   ;;  %s3948_s18 = smov 48   ;;  %vm3276_vm13 = vcmask 1043456  }
  0x21   : > { %403 = vst.msk [vmem:[#allocation2 + $0x62] sm:$0xff] %vm398_vm0, %v369_v18  ;;  %404 = vst.msk [vmem:[#allocation2 + $0x6a] sm:$0xff] %vm398_vm0, %v370_v20  ;;  %v390_v18 = vld [vmem:[%s4116_s8 + $0xc8] sm:$0xff]  ;;  %s3949_s21 = smov 56   ;;  %vm3075_vm14 = vcmask 326656   ;;  %vm3108_vm15 = vcmask 392192  }
  0x22   : > { %405 = vst.msk [vmem:[#allocation2 + $0x7a] sm:$0xff] %vm398_vm0, %v371_v21  ;;  %406 = vst.msk [vmem:[#allocation2 + $0x82] sm:$0xff] %vm398_vm0, %v372_v22  ;;  %1161 = vrot.lane.b32.xlu0 %v585_v19, %s3942_s13  ;;  %vm3174_vm1 = vcmask 523264   ;;  %vm3243_vm2 = vcmask 588800  }
  0x23   : > { %407 = vst.msk [vmem:[#allocation2 + $0x92] sm:$0xff] %vm398_vm0, %v373_v23  ;;  %408 = vst.msk [vmem:[#allocation2 + $0x9a] sm:$0xff] %vm398_vm0, %v374_v24 }
  0x24   : > { %409 = vst.msk [vmem:[#allocation2 + $0xaa] sm:$0xff] %vm398_vm0, %v375_v25  ;;  %410 = vst.msk [vmem:[#allocation2 + $0xb2] sm:$0xff] %vm398_vm0, %v376_v26 }
  0x25   : > { %411 = vst.msk [vmem:[#allocation2 + $0xc2] sm:$0xff] %vm398_vm0, %v377_v27  ;;  %412 = vst.msk [vmem:[#allocation2 + $0xca] sm:$0xff] %vm398_vm0, %v378_v28  ;;  %v391_v27 = vld [vmem:[%s4116_s8 + $0xd0] sm:$0xff]  ;;  %v392_v28 = vld [vmem:[%s4116_s8 + $0xd8] sm:$0xff] }
  0x26   : > { %v605_v30 = vld [vmem:[#allocation2 + $0x31] sm:$0xff]  ;;  %v606_v31 = vld [vmem:[#allocation2 + $0x39] sm:$0xff]  ;;  %413 = vst.msk [vmem:[#allocation2 + $0xda] sm:$0xff] %vm398_vm0, %v379_v35  ;;  %414 = vst.msk [vmem:[#allocation2 + $0xe2] sm:$0xff] %vm398_vm0, %v380_v36 }
  0x27   : > { %v4152_v32 = vpack.c.bf16 %v606_v31, %v605_v30  ;;  %v659_v33 = vld [vmem:[#allocation2 + $0x32] sm:$0xff]  ;;  %v660_v34 = vld [vmem:[#allocation2 + $0x3a] sm:$0xff]  ;;  %v767_v41 = vld [vmem:[#allocation2 + $0x49] sm:$0xff]  ;;  %415 = vst.msk [vmem:[#allocation2 + $0xf2] sm:$0xff] %vm398_vm0, %v381_v48 }
  0x28   : > { %v694_v37 = vpack.c.bf16 %v660_v34, %v659_v33  ;;  %v713_v38 = vld [vmem:[#allocation2 + $0x33] sm:$0xff]  ;;  %v714_v39 = vld [vmem:[#allocation2 + $0x3b] sm:$0xff]  ;;  %v821_v44 = vld [vmem:[#allocation2 + $0x4a] sm:$0xff]  ;;  %416 = vst.msk [vmem:[#allocation2 + $0xfa] sm:$0xff] %vm398_vm0, %v382_v49 }
  0x29   : > { %1055 = vrot.lane.b32.xlu1 %v4152_v32, %s3940_s11  ;;  %v748_v40 = vpack.c.bf16 %v714_v39, %v713_v38  ;;  %v768_v42 = vld [vmem:[#allocation2 + $0x51] sm:$0xff]  ;;  %1215 = vrot.lane.b32.xlu0 %v4152_v32, %s3943_s14  ;;  %417 = vst.msk [vmem:[#allocation2 + $0x10a] sm:$0xff] %vm398_vm0, %v383_v51  ;;  %418 = vst.msk [vmem:[#allocation2 + $0x112] sm:$0xff] %vm398_vm0, %v384_v52  ;;  %v609_v60 = vld [vmem:[#allocation2 + $0x61] sm:$0xff] }
  0x2a   : > { %v4166_v43 = vpack.c.bf16 %v768_v42, %v767_v41  ;;  %v822_v45 = vld [vmem:[#allocation2 + $0x52] sm:$0xff]  ;;  %v610_v61 = vld [vmem:[#allocation2 + $0x69] sm:$0xff]  ;;  %419 = vst.msk [vmem:[#allocation2 + $0x122] sm:$0xff] %vm398_vm0, %v385_v58  ;;  %420 = vst.msk [vmem:[#allocation2 + $0x12a] sm:$0xff] %vm398_vm0, %v386_v59 }
  0x2b   : > { %v856_v46 = vpack.c.bf16 %v822_v45, %v821_v44  ;;  %v875_v53 = vld [vmem:[#allocation2 + $0x4b] sm:$0xff]  ;;  %v876_v54 = vld [vmem:[#allocation2 + $0x53] sm:$0xff]  ;;  %v4201_v62 = vpack.c.bf16 %v610_v61, %v609_v60  ;;  %v663_v63 = vld [vmem:[#allocation2 + $0x62] sm:$0xff]  ;;  %421 = vst.msk [vmem:[#allocation2 + $0x13a] sm:$0xff] %vm398_vm0, %v387_v5 }
  0x2c   : > { %v910_v56 = vpack.c.bf16 %v876_v54, %v875_v53  ;;  %v664_v1 = vld [vmem:[#allocation2 + $0x6a] sm:$0xff]  ;;  %422 = vst.msk [vmem:[#allocation2 + $0x142] sm:$0xff] %vm398_vm0, %v388_v6  ;;  %v771_v8 = vld [vmem:[#allocation2 + $0x79] sm:$0xff]  ;;  %v772_v9 = vld [vmem:[#allocation2 + $0x81] sm:$0xff] }
  0x2d   : > { %1109 = vrot.lane.b32.xlu1 %v694_v37, %s3941_s12  ;;  %1269 = vrot.lane.b32.xlu0 %v694_v37, %s3944_s19  ;;  %v696_v2 = vpack.c.bf16 %v664_v1, %v663_v63  ;;  %v717_v3 = vld [vmem:[#allocation2 + $0x63] sm:$0xff]  ;;  %v718_v4 = vld [vmem:[#allocation2 + $0x6b] sm:$0xff]  ;;  %v4215_v10 = vpack.c.bf16 %v772_v9, %v771_v8  ;;  %v825_v11 = vld [vmem:[#allocation2 + $0x7a] sm:$0xff]  ;;  %423 = vst.msk [vmem:[#allocation2 + $0x152] sm:$0xff] %vm398_vm0, %v389_v17 }
  0x2e   : > { %v750_v7 = vpack.c.bf16 %v718_v4, %v717_v3  ;;  %v826_v12 = vld [vmem:[#allocation2 + $0x82] sm:$0xff]  ;;  %424 = vst.msk [vmem:[#allocation2 + $0x15a] sm:$0xff] %vm398_vm0, %v390_v18  ;;  %v613_v19 = vld [vmem:[#allocation2 + $0x91] sm:$0xff]  ;;  %v614_v20 = vld [vmem:[#allocation2 + $0x99] sm:$0xff] }
  0x2f   : > { %v858_v13 = vpack.c.bf16 %v826_v12, %v825_v11  ;;  %v879_v14 = vld [vmem:[#allocation2 + $0x7b] sm:$0xff]  ;;  %v880_v15 = vld [vmem:[#allocation2 + $0x83] sm:$0xff]  ;;  %v4233_v21 = vpack.c.bf16 %v614_v20, %v613_v19  ;;  %v667_v22 = vld [vmem:[#allocation2 + $0x92] sm:$0xff]  ;;  %425 = vst.msk [vmem:[#allocation2 + $0x16a] sm:$0xff] %vm398_vm0, %v391_v27 }
  0x30   : > { %v912_v16 = vpack.c.bf16 %v880_v15, %v879_v14  ;;  %v668_v23 = vld [vmem:[#allocation2 + $0x9a] sm:$0xff]  ;;  %426 = vst.msk [vmem:[#allocation2 + $0x172] sm:$0xff] %vm398_vm0, %v392_v28  ;;  %v775_v31 = vld [vmem:[#allocation2 + $0xa9] sm:$0xff]  ;;  %v776_v33 = vld [vmem:[#allocation2 + $0xb1] sm:$0xff] }
  0x31   : > { %1163 = vrot.lane.b32.xlu1 %v748_v40, %s3942_s13  ;;  %1323 = vrot.lane.b32.xlu0 %v748_v40, %s3945_s22  ;;  %v698_v24 = vpack.c.bf16 %v668_v23, %v667_v22  ;;  %v721_v25 = vld [vmem:[#allocation2 + $0x93] sm:$0xff]  ;;  %v722_v26 = vld [vmem:[#allocation2 + $0x9b] sm:$0xff]  ;;  %v4247_v34 = vpack.c.bf16 %v776_v33, %v775_v31  ;;  %v829_v35 = vld [vmem:[#allocation2 + $0xaa] sm:$0xff]  ;;  %2069 = vst.msk [vmem:[#allocation3] sm:$0x1] %vm2068_vm11, %v3937_v0 }
  0x32   : > { %v752_v30 = vpack.c.bf16 %v722_v26, %v721_v25  ;;  %v830_v36 = vld [vmem:[#allocation2 + $0xb2] sm:$0xff]  ;;  %v393_v41 = vld [vmem:[%s4116_s8 + $0xe0] sm:$0xff]  ;;  %v394_v42 = vld [vmem:[%s4116_s8 + $0xe8] sm:$0xff]  ;;  %2070 = vst.msk [vmem:[#allocation3 + $0x18] sm:$0x1] %vm2068_vm11, %v3937_v0 }
  0x33   : > { %v883_v38 = vld [vmem:[#allocation2 + $0xab] sm:$0xff]  ;;  %v884_v39 = vld [vmem:[#allocation2 + $0xb3] sm:$0xff]  ;;  %427 = vst.msk [vmem:[#allocation2 + $0x182] sm:$0xff] %vm398_vm0, %v393_v41  ;;  %428 = vst.msk [vmem:[#allocation2 + $0x18a] sm:$0xff] %vm398_vm0, %v394_v42 }
  0x34   : > { %v617_v44 = vld [vmem:[#allocation2 + $0xc1] sm:$0xff]  ;;  %v618_v45 = vld [vmem:[#allocation2 + $0xc9] sm:$0xff]  ;;  %v396_v53 = vld [vmem:[%s4116_s8 + $0xf8] sm:$0xff]  ;;  %2071 = vst.msk [vmem:[#allocation3 + $0x30] sm:$0x1] %vm2068_vm11, %v3937_v0 }
  0x35   : > { %1217 = vrot.lane.b32.xlu1 %v4166_v43, %s3943_s14  ;;  %1325 = vrot.lane.b32.xlu0 %v910_v56, %s3945_s22  ;;  %v671_v47 = vld [vmem:[#allocation2 + $0xc2] sm:$0xff]  ;;  %v672_v48 = vld [vmem:[#allocation2 + $0xca] sm:$0xff]  ;;  %430 = vst.msk [vmem:[#allocation2 + $0x1a2] sm:$0xff] %vm398_vm0, %v396_v53  ;;  %v779_v55 = vld [vmem:[#allocation2 + $0xd9] sm:$0xff] }
  0x36   : > { %v700_v49 = vpack.c.bf16 %v672_v48, %v671_v47  ;;  %v725_v50 = vld [vmem:[#allocation2 + $0xc3] sm:$0xff]  ;;  %v726_v51 = vld [vmem:[#allocation2 + $0xcb] sm:$0xff]  ;;  %v833_v59 = vld [vmem:[#allocation2 + $0xda] sm:$0xff]  ;;  %2072 = vst.msk [vmem:[#allocation3 + $0x48] sm:$0x1] %vm2068_vm11, %v3937_v0 }
  0x37   : > { %v395_v52 = vld [vmem:[%s4116_s8 + $0xf0] sm:$0xff]  ;;  %v754_v54 = vpack.c.bf16 %v726_v51, %v725_v50  ;;  %v834_v60 = vld [vmem:[#allocation2 + $0xe2] sm:$0xff]  ;;  %v676_v23 = vld [vmem:[#allocation2 + $0xfa] sm:$0xff]  ;;  %2073 = vst.msk [vmem:[#allocation3 + $0x60] sm:$0x1] %vm2068_vm11, %v3937_v0 }
  0x38   : > { %429 = vst.msk [vmem:[#allocation2 + $0x19a] sm:$0xff] %vm398_vm0, %v395_v52  ;;  %v862_v63 = vpack.c.bf16 %v834_v60, %v833_v59  ;;  %v887_v3 = vld [vmem:[#allocation2 + $0xdb] sm:$0xff]  ;;  %v888_v4 = vld [vmem:[#allocation2 + $0xe3] sm:$0xff]  ;;  %v621_v15 = vld [vmem:[#allocation2 + $0xf1] sm:$0xff] }
  0x39   : > { %1271 = vrot.lane.b32.xlu1 %v856_v46, %s3944_s19  ;;  %1003 = vrot.lane.b32.xlu0 %v748_v40, %s3939_s10  ;;  %v914_v40 = vpack.c.bf16 %v884_v39, %v883_v38  ;;  %v440_v9 = vld [vmem:[#allocation2 + $0x1] sm:$0xff]  ;;  %v441_v11 = vld [vmem:[#allocation2 + $0x9] sm:$0xff]  ;;  %v675_v22 = vld [vmem:[#allocation2 + $0xf2] sm:$0xff]  ;;  %2074 = vst.msk [vmem:[#allocation3 + $0x78] sm:$0x1] %vm2068_vm11, %v3937_v0 }
  0x3a   : > { %v702_v26 = vpack.c.bf16 %v676_v23, %v675_v22  ;;  %v729_v31 = vld [vmem:[#allocation2 + $0xf3] sm:$0xff]  ;;  %v730_v33 = vld [vmem:[#allocation2 + $0xfb] sm:$0xff]  ;;  %2075 = vst.msk [vmem:[#allocation3 + $0x90] sm:$0x1] %vm2068_vm11, %v3937_v0  ;;  %2076 = vst.msk [vmem:[#allocation3 + $0xa8] sm:$0x1] %vm2068_vm11, %v3937_v0 }
  0x3b   : > { %2077 = vst.msk [vmem:[#allocation3 + $0xc0] sm:$0x1] %vm2068_vm11, %v3937_v0  ;;  %2078 = vst.msk [vmem:[#allocation3 + $0xd8] sm:$0x1] %vm2068_vm11, %v3937_v0 }
  0x3c   : > { %2079 = vst.msk [vmem:[#allocation3 + $0xf0] sm:$0x1] %vm2068_vm11, %v3937_v0  ;;  %2080 = vst.msk [vmem:[#allocation3 + $0x108] sm:$0x1] %vm2068_vm11, %v3937_v0 }
  0x3d   : > { %949 = vrot.lane.b32.xlu1 %v694_v37, %s3938_s9  ;;  %1057 = vrot.lane.b32.xlu0 %v4166_v43, %s3940_s11  ;;  %v860_v37 = vpack.c.bf16 %v830_v36, %v829_v35  ;;  %2081 = vst.msk [vmem:[#allocation3 + $0x120] sm:$0x1] %vm2068_vm11, %v3937_v0  ;;  %2082 = vst.msk [vmem:[#allocation3 + $0x138] sm:$0x1] %vm2068_vm11, %v3937_v0 }
  0x3e   : > { %2083 = vst.msk [vmem:[#allocation3 + $0x150] sm:$0x1] %vm2068_vm11, %v3937_v0  ;;  %2084 = vst.msk [vmem:[#allocation3 + $0x168] sm:$0x1] %vm2068_vm11, %v3937_v0 }
  0x3f   : > { %2085 = vst.msk [vmem:[#allocation3 + $0x180] sm:$0x1] %vm2068_vm11, %v3937_v0  ;;  %2086 = vst.msk [vmem:[#allocation3 + $0x198] sm:$0x1] %vm2068_vm11, %v3937_v0 }
  0x40   : > { %2087 = vst.msk [vmem:[#allocation3 + $0x11] sm:$0x1] %vm2068_vm11, %v3937_v0  ;;  %2088 = vst.msk [vmem:[#allocation3 + $0x29] sm:$0x1] %vm2068_vm11, %v3937_v0 }
  0x41   : > { %951 = vrot.lane.b32.xlu1 %v856_v46, %s3938_s9  ;;  %1111 = vrot.lane.b32.xlu0 %v856_v46, %s3941_s12  ;;  %v4265_v46 = vpack.c.bf16 %v618_v45, %v617_v44  ;;  %v783_v44 = vld [vmem:[#allocation2 + $0x109] sm:$0xff]  ;;  %v784_v45 = vld [vmem:[#allocation2 + $0x111] sm:$0xff]  ;;  %2089 = vst.msk [vmem:[#allocation3 + $0x41] sm:$0x1] %vm2068_vm11, %v3937_v0  ;;  %2090 = vst.msk [vmem:[#allocation3 + $0x59] sm:$0x1] %vm2068_vm11, %v3937_v0 }
  0x42   : > { %v4319_v52 = vpack.c.bf16 %v784_v45, %v783_v44  ;;  %2091 = vst.msk [vmem:[#allocation3 + $0x71] sm:$0x1] %vm2068_vm11, %v3937_v0  ;;  %2092 = vst.msk [vmem:[#allocation3 + $0x89] sm:$0x1] %vm2068_vm11, %v3937_v0 }
  0x43   : > { %2093 = vst.msk [vmem:[#allocation3 + $0xa1] sm:$0x1] %vm2068_vm11, %v3937_v0  ;;  %2094 = vst.msk [vmem:[#allocation3 + $0xb9] sm:$0x1] %vm2068_vm11, %v3937_v0 }
  0x44   : > { %2095 = vst.msk [vmem:[#allocation3 + $0xd1] sm:$0x1] %vm2068_vm11, %v3937_v0  ;;  %2096 = vst.msk [vmem:[#allocation3 + $0xe9] sm:$0x1] %vm2068_vm11, %v3937_v0 }
  0x45   : > { %1005 = vrot.lane.b32.xlu1 %v910_v56, %s3939_s10  ;;  %1165 = vrot.lane.b32.xlu0 %v910_v56, %s3942_s13  ;;  %v780_v56 = vld [vmem:[#allocation2 + $0xe1] sm:$0xff]  ;;  %2097 = vst.msk [vmem:[#allocation3 + $0x101] sm:$0x1] %vm2068_vm11, %v3937_v0  ;;  %2098 = vst.msk [vmem:[#allocation3 + $0x119] sm:$0x1] %vm2068_vm11, %v3937_v0 }
  0x46   : > { %v4279_v57 = vpack.c.bf16 %v780_v56, %v779_v55  ;;  %v837_v55 = vld [vmem:[#allocation2 + $0x10a] sm:$0xff]  ;;  %v838_v56 = vld [vmem:[#allocation2 + $0x112] sm:$0xff]  ;;  %2099 = vst.msk [vmem:[#allocation3 + $0x131] sm:$0x1] %vm2068_vm11, %v3937_v0  ;;  %2100 = vst.msk [vmem:[#allocation3 + $0x149] sm:$0x1] %vm2068_vm11, %v3937_v0 }
  0x47   : > { %v864_v60 = vpack.c.bf16 %v838_v56, %v837_v55  ;;  %2101 = vst.msk [vmem:[#allocation3 + $0x161] sm:$0x1] %vm2068_vm11, %v3937_v0  ;;  %2102 = vst.msk [vmem:[#allocation3 + $0x179] sm:$0x1] %vm2068_vm11, %v3937_v0 }
  0x48   : > { %2103 = vst.msk [vmem:[#allocation3 + $0x191] sm:$0x1] %vm2068_vm11, %v3937_v0  ;;  %2104 = vst.msk [vmem:[#allocation3 + $0x1a9] sm:$0x1] %vm2068_vm11, %v3937_v0 }
  0x49   : > { %1059 = vrot.lane.b32.xlu1 %v4201_v62, %s3940_s11  ;;  %1219 = vrot.lane.b32.xlu0 %v4201_v62, %s3943_s14 }
  0x4d   : > { %1113 = vrot.lane.b32.xlu1 %v696_v2, %s3941_s12  ;;  %1273 = vrot.lane.b32.xlu0 %v696_v2, %s3944_s19 }
  0x51   : > { %1167 = vrot.lane.b32.xlu1 %v750_v7, %s3942_s13  ;;  %1327 = vrot.lane.b32.xlu0 %v750_v7, %s3945_s22 }
  0x55   : > { %1221 = vrot.lane.b32.xlu1 %v4215_v10, %s3943_s14  ;;  %1329 = vrot.lane.b32.xlu0 %v912_v16, %s3945_s22 }
  0x59   : > { %1275 = vrot.lane.b32.xlu1 %v858_v13, %s3944_s19  ;;  %1007 = vrot.lane.b32.xlu0 %v750_v7, %s3939_s10  ;;  %v916_v7 = vpack.c.bf16 %v888_v4, %v887_v3 }
  0x5d   : > { %953 = vrot.lane.b32.xlu1 %v696_v2, %s3938_s9  ;;  %1061 = vrot.lane.b32.xlu0 %v4215_v10, %s3940_s11 }
  0x61   : > { %955 = vrot.lane.b32.xlu1 %v858_v13, %s3938_s9  ;;  %1115 = vrot.lane.b32.xlu0 %v858_v13, %s3941_s12  ;;  %v476_v13 = vpack.c.bf16 %v441_v11, %v440_v9  ;;  %v625_v9 = vld [vmem:[#allocation2 + $0x121] sm:$0xff]  ;;  %v626_v11 = vld [vmem:[#allocation2 + $0x129] sm:$0xff] }
  0x65   : > { %1009 = vrot.lane.b32.xlu1 %v912_v16, %s3939_s10  ;;  %1169 = vrot.lane.b32.xlu0 %v912_v16, %s3942_s13  ;;  %v622_v16 = vld [vmem:[#allocation2 + $0xf9] sm:$0xff] }
  0x66   : > { %v4293_v18 = vpack.c.bf16 %v622_v16, %v621_v15  ;;  %v679_v15 = vld [vmem:[#allocation2 + $0x122] sm:$0xff]  ;;  %v680_v16 = vld [vmem:[#allocation2 + $0x12a] sm:$0xff] }
  0x67   : > { %v704_v22 = vpack.c.bf16 %v680_v16, %v679_v15 }
  0x69   : > { %1063 = vrot.lane.b32.xlu1 %v4233_v21, %s3940_s11  ;;  %1223 = vrot.lane.b32.xlu0 %v4233_v21, %s3943_s14 }
  0x6d   : > { %1117 = vrot.lane.b32.xlu1 %v698_v24, %s3941_s12  ;;  %1277 = vrot.lane.b32.xlu0 %v698_v24, %s3944_s19 }
  0x71   : > { %1171 = vrot.lane.b32.xlu1 %v752_v30, %s3942_s13  ;;  %1331 = vrot.lane.b32.xlu0 %v752_v30, %s3945_s22 }
  0x75   : > { %1225 = vrot.lane.b32.xlu1 %v4247_v34, %s3943_s14  ;;  %1333 = vrot.lane.b32.xlu0 %v914_v40, %s3945_s22 }
  0x79   : > { %1279 = vrot.lane.b32.xlu1 %v860_v37, %s3944_s19  ;;  %1011 = vrot.lane.b32.xlu0 %v752_v30, %s3939_s10 }
  0x7d   : > { %957 = vrot.lane.b32.xlu1 %v698_v24, %s3938_s9  ;;  %1065 = vrot.lane.b32.xlu0 %v4247_v34, %s3940_s11 }
  0x81   : > { %959 = vrot.lane.b32.xlu1 %v860_v37, %s3938_s9  ;;  %1119 = vrot.lane.b32.xlu0 %v860_v37, %s3941_s12 }
  0x84   : > { %v946_v58 = vpop.permute.xlu0 %945 }
  0x85   : > { %1013 = vrot.lane.b32.xlu1 %v914_v40, %s3939_s10  ;;  %1173 = vrot.lane.b32.xlu0 %v914_v40, %s3942_s13  ;;  %v1361_v19 = vsel %vm398_vm0, %v476_v13, %v946_v58  ;;  %v4336_v13 = vpack.c.bf16 %v626_v11, %v625_v9  ;;  %v683_v9 = vld [vmem:[#allocation2 + $0x152] sm:$0xff]  ;;  %v684_v11 = vld [vmem:[#allocation2 + $0x15a] sm:$0xff] }
  0x86   : > { %v706_v16 = vpack.c.bf16 %v684_v11, %v683_v9 }
  0x88   : > { %v1000_v61 = vpop.permute.xlu1 %999  ;;  %v948_v1 = vpop.permute.xlu0 %947 }
  0x89   : > { %1067 = vrot.lane.b32.xlu1 %v4265_v46, %s3940_s11  ;;  %1227 = vrot.lane.b32.xlu0 %v4265_v46, %s3943_s14  ;;  %v1415_v25 = vsel %vm1413_vm3, %v1361_v19, %v1000_v61  ;;  %v1364_v27 = vsel %vm398_vm0, %v4146_v29, %v948_v1  ;;  %v756_v29 = vpack.c.bf16 %v730_v33, %v729_v31  ;;  %v891_v1 = vld [vmem:[#allocation2 + $0x10b] sm:$0xff] }
  0x8c   : > { %v1054_v5 = vpop.permute.xlu0 %1053 }
  0x8d   : > { %1121 = vrot.lane.b32.xlu1 %v700_v49, %s3941_s12  ;;  %1281 = vrot.lane.b32.xlu0 %v700_v49, %s3944_s19  ;;  %v1452_v28 = vsel %vm1450_vm4, %v1415_v25, %v1054_v5 }
  0x90   : > { %v1108_v8 = vpop.permute.xlu0 %1107 }
  0x91   : > { %1175 = vrot.lane.b32.xlu1 %v754_v54, %s3942_s13  ;;  %v1002_v2 = vpop.permute.xlu1 %1001  ;;  %1335 = vrot.lane.b32.xlu0 %v754_v54, %s3945_s22  ;;  %v1489_v35 = vsel %vm1487_vm5, %v1452_v28, %v1108_v8 }
  0x92   : > { %v1417_v38 = vsel %vm1413_vm3, %v1364_v27, %v1002_v2  ;;  %v892_v2 = vld [vmem:[#allocation2 + $0x113] sm:$0xff]  ;;  %v734_v27 = vld [vmem:[#allocation2 + $0x12b] sm:$0xff] }
  0x93   : > { %v918_v5 = vpack.c.bf16 %v892_v2, %v891_v1 }
  0x94   : > { %v1162_v14 = vpop.permute.xlu0 %1161 }
  0x95   : > { %1229 = vrot.lane.b32.xlu1 %v4279_v57, %s3943_s14  ;;  %1337 = vrot.lane.b32.xlu0 %v916_v7, %s3945_s22  ;;  %v1526_v37 = vsel %vm1524_vm6, %v1489_v35, %v1162_v14 }
  0x99   : > { %1283 = vrot.lane.b32.xlu1 %v862_v63, %s3944_s19  ;;  %1015 = vrot.lane.b32.xlu0 %v754_v54, %s3939_s10 }
  0x9b   : > { %v1056_v6 = vpop.permute.xlu1 %1055  ;;  %v1216_v20 = vpop.permute.xlu0 %1215 }
  0x9c   : > { %v1563_v39 = vsel %vm1561_vm7, %v1526_v37, %v1216_v20  ;;  %v1454_v40 = vsel %vm1450_vm4, %v1417_v38, %v1056_v6  ;;  %v787_v38 = vld [vmem:[#allocation2 + $0x139] sm:$0xff] }
  0x9d   : > { %961 = vrot.lane.b32.xlu1 %v700_v49, %s3938_s9  ;;  %1069 = vrot.lane.b32.xlu0 %v4279_v57, %s3940_s11 }
  0x9f   : > { %v1110_v12 = vpop.permute.xlu1 %1109  ;;  %v1270_v30 = vpop.permute.xlu0 %1269 }
  0xa0   : > { %v1600_v41 = vsel %vm1598_vm8, %v1563_v39, %v1270_v30  ;;  %v1491_v47 = vsel %vm1487_vm5, %v1454_v40, %v1110_v12  ;;  %v788_v39 = vld [vmem:[#allocation2 + $0x141] sm:$0xff] }
  0xa1   : > { %963 = vrot.lane.b32.xlu1 %v862_v63, %s3938_s9  ;;  %1123 = vrot.lane.b32.xlu0 %v862_v63, %s3941_s12  ;;  %v4363_v45 = vpack.c.bf16 %v788_v39, %v787_v38 }
  0xa3   : > { %v1164_v17 = vpop.permute.xlu1 %1163  ;;  %v1324_v42 = vpop.permute.xlu0 %1323 }
  0xa4   : > { %v1637_v49 = vsel %vm1635_vm9, %v1600_v41, %v1324_v42  ;;  %v1528_v50 = vsel %vm1524_vm6, %v1491_v47, %v1164_v17 }
  0xa5   : > { %1017 = vrot.lane.b32.xlu1 %v916_v7, %s3939_s10  ;;  %3786 = vmatprep.mubr.msk.bf16.mxu0 %vm1692_vm10, %v1637_v49  ;;  %v841_v49 = vld [vmem:[#allocation2 + $0x13a] sm:$0xff] }
  0xa6   : > { %1177 = vrot.lane.b32.xlu0 %v916_v7, %s3942_s13 }
  0xa7   : > { %v1218_v24 = vpop.permute.xlu1 %1217  ;;  %v1326_v54 = vpop.permute.xlu0 %1325 }
  0xa8   : > { %v1565_v51 = vsel %vm1561_vm7, %v1528_v50, %v1218_v24  ;;  %v842_v50 = vld [vmem:[#allocation2 + $0x142] sm:$0xff] }
  0xa9   : > { %1071 = vrot.lane.b32.xlu1 %v4293_v18, %s3940_s11 }
  0xaa   : > { %1231 = vrot.lane.b32.xlu0 %v4293_v18, %s3943_s14 }
  0xab   : > { %v1272_v36 = vpop.permute.xlu1 %1271  ;;  %v1004_v61 = vpop.permute.xlu0 %1003 }
  0xac   : > { %v1602_v53 = vsel %vm1598_vm8, %v1565_v51, %v1272_v36 }
  0xad   : > { %1125 = vrot.lane.b32.xlu1 %v702_v26, %s3941_s12  ;;  %v1639_v58 = vsel %vm1635_vm9, %v1602_v53, %v1326_v54  ;;  %v866_v54 = vpack.c.bf16 %v842_v50, %v841_v49 }
  0xae   : > { %3787 = vmatmul.mubr.msk.bf16.vlgmr.msra.gmra.mrb[0].mxu0 %vm1692_vm10, %v1639_v58  ;;  %1285 = vrot.lane.b32.xlu0 %v702_v26, %s3944_s19  ;;  %v895_v58 = vld [vmem:[#allocation2 + $0x13b] sm:$0xff] }
  0xaf   : > { %v950_v48 = vpop.permute.xlu1 %949  ;;  %v1058_v3 = vpop.permute.xlu0 %1057 }
  0xb0   : > { %v1367_v19 = vsel %vm398_vm0, %v4152_v32, %v950_v48 }
  0xb1   : > { %1179 = vrot.lane.b32.xlu1 %v756_v29, %s3942_s13  ;;  %v1419_v20 = vsel %vm1413_vm3, %v1367_v19, %v1004_v61 }
  0xb2   : > { %1339 = vrot.lane.b32.xlu0 %v756_v29, %s3945_s22  ;;  %v1456_v24 = vsel %vm1450_vm4, %v1419_v20, %v1058_v3 }
  0xb3   : > { %v952_v59 = vpop.permute.xlu1 %951  ;;  %v1112_v6 = vpop.permute.xlu0 %1111 }
  0xb4   : > { %v1370_v23 = vsel %vm398_vm0, %v4166_v43, %v952_v59  ;;  %v1493_v28 = vsel %vm1487_vm5, %v1456_v24, %v1112_v6  ;;  %v896_v59 = vld [vmem:[#allocation2 + $0x143] sm:$0xff] }
  0xb5   : > { %1233 = vrot.lane.b32.xlu1 %v4319_v52, %s3943_s14 }
  0xb6   : > { %1341 = vrot.lane.b32.xlu0 %v918_v5, %s3945_s22 }
  0xb7   : > { %v1006_v63 = vpop.permute.xlu1 %1005  ;;  %v1166_v8 = vpop.permute.xlu0 %1165 }
  0xb8   : > { %v1530_v30 = vsel %vm1524_vm6, %v1493_v28, %v1166_v8  ;;  %v1421_v31 = vsel %vm1413_vm3, %v1370_v23, %v1006_v63  ;;  %v920_v63 = vpack.c.bf16 %v896_v59, %v895_v58  ;;  %v738_v23 = vld [vmem:[#allocation2 + $0x15b] sm:$0xff] }
  0xb9   : > { %1287 = vrot.lane.b32.xlu1 %v864_v60, %s3944_s19 }
  0xba   : > { %1019 = vrot.lane.b32.xlu0 %v756_v29, %s3939_s10 }
  0xbb   : > { %v1060_v4 = vpop.permute.xlu1 %1059  ;;  %v1220_v14 = vpop.permute.xlu0 %1219 }
  0xbc   : > { %v1567_v33 = vsel %vm1561_vm7, %v1530_v30, %v1220_v14  ;;  %v1458_v43 = vsel %vm1450_vm4, %v1421_v31, %v1060_v4  ;;  %v629_v4 = vld [vmem:[#allocation2 + $0x151] sm:$0xff]  ;;  %v791_v31 = vld [vmem:[#allocation2 + $0x169] sm:$0xff] }
  0xbd   : > { %965 = vrot.lane.b32.xlu1 %v702_v26, %s3938_s9  ;;  %v733_v26 = vld [vmem:[#allocation2 + $0x123] sm:$0xff] }
  0xbe   : > { %1073 = vrot.lane.b32.xlu0 %v4319_v52, %s3940_s11  ;;  %v758_v35 = vpack.c.bf16 %v734_v27, %v733_v26 }
  0xbf   : > { %v1114_v7 = vpop.permute.xlu1 %1113  ;;  %v1274_v25 = vpop.permute.xlu0 %1273 }
  0xc0   : > { %v1604_v36 = vsel %vm1598_vm8, %v1567_v33, %v1274_v25  ;;  %v1495_v29 = vsel %vm1487_vm5, %v1458_v43, %v1114_v7  ;;  %v792_v33 = vld [vmem:[#allocation2 + $0x171] sm:$0xff] }
  0xc1   : > { %967 = vrot.lane.b32.xlu1 %v864_v60, %s3938_s9  ;;  %v4407_v39 = vpack.c.bf16 %v792_v33, %v791_v31 }
  0xc2   : > { %1127 = vrot.lane.b32.xlu0 %v864_v60, %s3941_s12 }
  0xc3   : > { %v1168_v12 = vpop.permute.xlu1 %1167  ;;  %v1328_v37 = vpop.permute.xlu0 %1327 }
  0xc4   : > { %v1641_v40 = vsel %vm1635_vm9, %v1604_v36, %v1328_v37  ;;  %v1532_v42 = vsel %vm1524_vm6, %v1495_v29, %v1168_v12 }
  0xc5   : > { %1021 = vrot.lane.b32.xlu1 %v918_v5, %s3939_s10  ;;  %3790 = vmatprep.mubr.msk.bf16.mxu0 %vm1692_vm10, %v1641_v40 }
  0xc6   : > { %1181 = vrot.lane.b32.xlu0 %v918_v5, %s3942_s13  ;;  %v630_v5 = vld [vmem:[#allocation2 + $0x159] sm:$0xff] }
  0xc7   : > { %v1222_v17 = vpop.permute.xlu1 %1221  ;;  %v1330_v48 = vpop.permute.xlu0 %1329  ;;  %v4380_v7 = vpack.c.bf16 %v630_v5, %v629_v4  ;;  %v687_v4 = vld [vmem:[#allocation2 + $0x182] sm:$0xff]  ;;  %v688_v5 = vld [vmem:[#allocation2 + $0x18a] sm:$0xff] }
  0xc8   : > { %v1569_v44 = vsel %vm1561_vm7, %v1532_v42, %v1222_v17  ;;  %v846_v42 = vld [vmem:[#allocation2 + $0x172] sm:$0xff]  ;;  %v4441_v11 = vpack.c.bf16 %v688_v5, %v687_v4 }
  0xc9   : > { %1075 = vrot.lane.b32.xlu1 %v4336_v13, %s3940_s11 }
  0xca   : > { %1235 = vrot.lane.b32.xlu0 %v4336_v13, %s3943_s14 }
  0xcb   : > { %v1276_v32 = vpop.permute.xlu1 %1275  ;;  %v1008_v55 = vpop.permute.xlu0 %1007 }
  0xcc   : > { %v1606_v47 = vsel %vm1598_vm8, %v1569_v44, %v1276_v32 }
  0xcd   : > { %1129 = vrot.lane.b32.xlu1 %v704_v22, %s3941_s12  ;;  %v1643_v51 = vsel %vm1635_vm9, %v1606_v47, %v1330_v48 }
  0xce   : > { %3791 = vmatmul.mubr.msk.bf16.gmra.mrb[4].mxu0 %vm1692_vm10, %v1643_v51  ;;  %1289 = vrot.lane.b32.xlu0 %v704_v22, %s3944_s19  ;;  %v899_v51 = vld [vmem:[#allocation2 + $0x16b] sm:$0xff] }
  0xcf   : > { %v954_v41 = vpop.permute.xlu1 %953  ;;  %v1062_v60 = vpop.permute.xlu0 %1061 }
  0xd0   : > { %v1373_v14 = vsel %vm398_vm0, %v4201_v62, %v954_v41  ;;  %v845_v41 = vld [vmem:[#allocation2 + $0x16a] sm:$0xff] }
  0xd1   : > { %1183 = vrot.lane.b32.xlu1 %v758_v35, %s3942_s13  ;;  %v1423_v15 = vsel %vm1413_vm3, %v1373_v14, %v1008_v55  ;;  %v868_v48 = vpack.c.bf16 %v846_v42, %v845_v41 }
  0xd2   : > { %1343 = vrot.lane.b32.xlu0 %v758_v35, %s3945_s22  ;;  %v1460_v19 = vsel %vm1450_vm4, %v1423_v15, %v1062_v60 }
  0xd3   : > { %v956_v53 = vpop.permute.xlu1 %955  ;;  %v1116_v1 = vpop.permute.xlu0 %1115 }
  0xd4   : > { %v1376_v17 = vsel %vm398_vm0, %v4215_v10, %v956_v53  ;;  %v1497_v24 = vsel %vm1487_vm5, %v1460_v19, %v1116_v1  ;;  %v900_v53 = vld [vmem:[#allocation2 + $0x173] sm:$0xff] }
  0xd5   : > { %1237 = vrot.lane.b32.xlu1 %v4363_v45, %s3943_s14 }
  0xd6   : > { %1345 = vrot.lane.b32.xlu0 %v920_v63, %s3945_s22 }
  0xd7   : > { %v1010_v56 = vpop.permute.xlu1 %1009  ;;  %v1170_v3 = vpop.permute.xlu0 %1169 }
  0xd8   : > { %v1534_v25 = vsel %vm1524_vm6, %v1497_v24, %v1170_v3  ;;  %v1425_v26 = vsel %vm1413_vm3, %v1376_v17, %v1010_v56  ;;  %v4419_v56 = vpack.c.bf16 %v900_v53, %v899_v51  ;;  %v742_v17 = vld [vmem:[#allocation2 + $0x18b] sm:$0xff] }
  0xd9   : > { %1291 = vrot.lane.b32.xlu1 %v866_v54, %s3944_s19 }
  0xda   : > { %1023 = vrot.lane.b32.xlu0 %v758_v35, %s3939_s10 }
  0xdb   : > { %v1064_v61 = vpop.permute.xlu1 %1063  ;;  %v1224_v8 = vpop.permute.xlu0 %1223 }
  0xdc   : > { %v1571_v27 = vsel %vm1561_vm7, %v1534_v25, %v1224_v8  ;;  %v1462_v10 = vsel %vm1450_vm4, %v1425_v26, %v1064_v61  ;;  %v633_v61 = vld [vmem:[#allocation2 + $0x181] sm:$0xff]  ;;  %v795_v26 = vld [vmem:[#allocation2 + $0x199] sm:$0xff] }
  0xdd   : > { %969 = vrot.lane.b32.xlu1 %v704_v22, %s3938_s9  ;;  %v737_v22 = vld [vmem:[#allocation2 + $0x153] sm:$0xff] }
  0xde   : > { %1077 = vrot.lane.b32.xlu0 %v4363_v45, %s3940_s11  ;;  %v760_v28 = vpack.c.bf16 %v738_v23, %v737_v22 }
  0xdf   : > { %v1118_v2 = vpop.permute.xlu1 %1117  ;;  %v1278_v20 = vpop.permute.xlu0 %1277 }
  0xe0   : > { %v1608_v32 = vsel %vm1598_vm8, %v1571_v27, %v1278_v20  ;;  %v1499_v35 = vsel %vm1487_vm5, %v1462_v10, %v1118_v2  ;;  %v796_v27 = vld [vmem:[#allocation2 + $0x1a1] sm:$0xff] }
  0xe1   : > { %971 = vrot.lane.b32.xlu1 %v866_v54, %s3938_s9  ;;  %v4542_v33 = vpack.c.bf16 %v796_v27, %v795_v26 }
  0xe2   : > { %1131 = vrot.lane.b32.xlu0 %v866_v54, %s3941_s12 }
  0xe3   : > { %v1172_v6 = vpop.permute.xlu1 %1171  ;;  %v1332_v30 = vpop.permute.xlu0 %1331 }
  0xe4   : > { %v1645_v43 = vsel %vm1635_vm9, %v1608_v32, %v1332_v30  ;;  %v1536_v37 = vsel %vm1524_vm6, %v1499_v35, %v1172_v6 }
  0xe5   : > { %1025 = vrot.lane.b32.xlu1 %v920_v63, %s3939_s10  ;;  %3794 = vmatprep.mubr.msk.bf16.mxu0 %vm1692_vm10, %v1645_v43 }
  0xe6   : > { %1185 = vrot.lane.b32.xlu0 %v920_v63, %s3942_s13  ;;  %v634_v63 = vld [vmem:[#allocation2 + $0x189] sm:$0xff] }
  0xe7   : > { %v1226_v12 = vpop.permute.xlu1 %1225  ;;  %v1334_v40 = vpop.permute.xlu0 %1333  ;;  %v4430_v2 = vpack.c.bf16 %v634_v63, %v633_v61  ;;  %v691_v61 = vld [vmem:[#allocation2 + $0x1b2] sm:$0xff]  ;;  %v692_v63 = vld [vmem:[#allocation2 + $0x1ba] sm:$0xff] }
  0xe8   : > { %v1573_v38 = vsel %vm1561_vm7, %v1536_v37, %v1226_v12  ;;  %v850_v37 = vld [vmem:[#allocation2 + $0x1a2] sm:$0xff]  ;;  %v710_v5 = vpack.c.bf16 %v692_v63, %v691_v61 }
  0xe9   : > { %1079 = vrot.lane.b32.xlu1 %v4380_v7, %s3940_s11 }
  0xea   : > { %1239 = vrot.lane.b32.xlu0 %v4380_v7, %s3943_s14 }
  0xeb   : > { %v1280_v62 = vpop.permute.xlu1 %1279  ;;  %v1012_v49 = vpop.permute.xlu0 %1011 }
  0xec   : > { %v1610_v29 = vsel %vm1598_vm8, %v1573_v38, %v1280_v62 }
  0xed   : > { %1133 = vrot.lane.b32.xlu1 %v706_v16, %s3941_s12  ;;  %v1647_v44 = vsel %vm1635_vm9, %v1610_v29, %v1334_v40 }
  0xee   : > { %3795 = vmatmul.mubr.msk.bf16.gmra.mrb[8].mxu0 %vm1692_vm10, %v1647_v44  ;;  %1293 = vrot.lane.b32.xlu0 %v706_v16, %s3944_s19  ;;  %v903_v44 = vld [vmem:[#allocation2 + $0x19b] sm:$0xff] }
  0xef   : > { %v958_v36 = vpop.permute.xlu1 %957  ;;  %v1066_v54 = vpop.permute.xlu0 %1065 }
  0xf0   : > { %v1379_v8 = vsel %vm398_vm0, %v4233_v21, %v958_v36  ;;  %v849_v36 = vld [vmem:[#allocation2 + $0x19a] sm:$0xff] }
  0xf1   : > { %1187 = vrot.lane.b32.xlu1 %v760_v28, %s3942_s13  ;;  %v1427_v9 = vsel %vm1413_vm3, %v1379_v8, %v1012_v49  ;;  %v870_v40 = vpack.c.bf16 %v850_v37, %v849_v36  ;;  %v907_v37 = vld [vmem:[#allocation2 + $0x1cb] sm:$0xff] }
  0xf2   : > { %1347 = vrot.lane.b32.xlu0 %v760_v28, %s3945_s22  ;;  %v1464_v14 = vsel %vm1450_vm4, %v1427_v9, %v1066_v54 }
  0xf3   : > { %v960_v47 = vpop.permute.xlu1 %959  ;;  %v1120_v58 = vpop.permute.xlu0 %1119 }
  0xf4   : > { %v1382_v12 = vsel %vm398_vm0, %v4247_v34, %v960_v47  ;;  %v1501_v21 = vsel %vm1487_vm5, %v1464_v14, %v1120_v58  ;;  %v904_v47 = vld [vmem:[#allocation2 + $0x1a3] sm:$0xff] }
  0xf5   : > { %1241 = vrot.lane.b32.xlu1 %v4407_v39, %s3943_s14 }
  0xf6   : > { %1349 = vrot.lane.b32.xlu0 %v4419_v56, %s3945_s22 }
  0xf7   : > { %v1014_v50 = vpop.permute.xlu1 %1013  ;;  %v1174_v60 = vpop.permute.xlu0 %1173 }
  0xf8   : > { %v1538_v20 = vsel %vm1524_vm6, %v1501_v21, %v1174_v60  ;;  %v1429_v22 = vsel %vm1413_vm3, %v1382_v12, %v1014_v50  ;;  %v924_v50 = vpack.c.bf16 %v904_v47, %v903_v44  ;;  %v746_v12 = vld [vmem:[#allocation2 + $0x1bb] sm:$0xff] }
  0xf9   : > { %1295 = vrot.lane.b32.xlu1 %v868_v48, %s3944_s19 }
  0xfa   : > { %1027 = vrot.lane.b32.xlu0 %v760_v28, %s3939_s10 }
  0xfb   : > { %v1068_v55 = vpop.permute.xlu1 %1067  ;;  %v1228_v3 = vpop.permute.xlu0 %1227 }
  0xfc   : > { %v1575_v23 = vsel %vm1561_vm7, %v1538_v20, %v1228_v3  ;;  %v1466_v24 = vsel %vm1450_vm4, %v1429_v22, %v1068_v55  ;;  %v637_v55 = vld [vmem:[#allocation2 + $0x1b1] sm:$0xff]  ;;  %v799_v22 = vld [vmem:[#allocation2 + $0x1c9] sm:$0xff] }
  0xfd   : > { %973 = vrot.lane.b32.xlu1 %v706_v16, %s3938_s9  ;;  %v741_v16 = vld [vmem:[#allocation2 + $0x183] sm:$0xff] }
  0xfe   : > { %1081 = vrot.lane.b32.xlu0 %v4407_v39, %s3940_s11  ;;  %v4453_v34 = vpack.c.bf16 %v742_v17, %v741_v16 }
  0xff   : > { %v1122_v59 = vpop.permute.xlu1 %1121  ;;  %v1282_v15 = vpop.permute.xlu0 %1281 }
 0x100   : > { %v1612_v62 = vsel %vm1598_vm8, %v1575_v23, %v1282_v15  ;;  %v1503_v28 = vsel %vm1487_vm5, %v1466_v24, %v1122_v59  ;;  %v800_v23 = vld [vmem:[#allocation2 + $0x1d1] sm:$0xff] }
 0x101   : > { %975 = vrot.lane.b32.xlu1 %v868_v48, %s3938_s9  ;;  %v818_v27 = vpack.c.bf16 %v800_v23, %v799_v22 }
 0x102   : > { %1135 = vrot.lane.b32.xlu0 %v868_v48, %s3941_s12 }
 0x103   : > { %v4425_v1 = vpop.permute.xlu1 %1175  ;;  %v1336_v25 = vpop.permute.xlu0 %1335 }
 0x104   : > { %v1649_v10 = vsel %vm1635_vm9, %v1612_v62, %v1336_v25  ;;  %v1540_v30 = vsel %vm1524_vm6, %v1503_v28, %v4425_v1 }
 0x105   : > { %1029 = vrot.lane.b32.xlu1 %v4419_v56, %s3939_s10  ;;  %3798 = vmatprep.mubr.msk.bf16.mxu0 %vm1692_vm10, %v1649_v10 }
 0x106   : > { %1189 = vrot.lane.b32.xlu0 %v4419_v56, %s3942_s13  ;;  %v638_v56 = vld [vmem:[#allocation2 + $0x1b9] sm:$0xff] }
 0x107   : > { %v4432_v6 = vpop.permute.xlu1 %1229  ;;  %v1338_v43 = vpop.permute.xlu0 %1337  ;;  %v656_v59 = vpack.c.bf16 %v638_v56, %v637_v55 }
 0x108   : > { %v1577_v31 = vsel %vm1561_vm7, %v1540_v30, %v4432_v6  ;;  %v854_v30 = vld [vmem:[#allocation2 + $0x1d2] sm:$0xff] }
 0x109   : > { %1083 = vrot.lane.b32.xlu1 %v4430_v2, %s3940_s11 }
 0x10a   : > { %1243 = vrot.lane.b32.xlu0 %v4430_v2, %s3943_s14 }
 0x10b   : > { %v1284_v19 = vpop.permute.xlu1 %1283  ;;  %v1016_v41 = vpop.permute.xlu0 %1015 }
 0x10c   : > { %v1614_v35 = vsel %vm1598_vm8, %v1577_v31, %v1284_v19 }
 0x10d   : > { %1137 = vrot.lane.b32.xlu1 %v4441_v11, %s3941_s12  ;;  %v1651_v38 = vsel %vm1635_vm9, %v1614_v35, %v1338_v43 }
 0x10e   : > { %3799 = vmatmul.mubr.msk.bf16.gmra.mrb[12].mxu0 %vm1692_vm10, %v1651_v38  ;;  %1297 = vrot.lane.b32.xlu0 %v4441_v11, %s3944_s19  ;;  %v908_v38 = vld [vmem:[#allocation2 + $0x1d3] sm:$0xff] }
 0x10f   : > { %v4459_v32 = vpop.permute.xlu1 %961  ;;  %v1070_v48 = vpop.permute.xlu0 %1069 }
 0x110   : > { %v1385_v3 = vsel %vm398_vm0, %v4265_v46, %v4459_v32  ;;  %v853_v32 = vld [vmem:[#allocation2 + $0x1ca] sm:$0xff] }
 0x111   : > { %1191 = vrot.lane.b32.xlu1 %v4453_v34, %s3942_s13  ;;  %v1431_v4 = vsel %vm1413_vm3, %v1385_v3, %v1016_v41  ;;  %v872_v43 = vpack.c.bf16 %v854_v30, %v853_v32 }
 0x112   : > { %1351 = vrot.lane.b32.xlu0 %v4453_v34, %s3945_s22  ;;  %v1468_v8 = vsel %vm1450_vm4, %v1431_v4, %v1070_v48 }
 0x113   : > { %v964_v29 = vpop.permute.xlu1 %963  ;;  %v1124_v51 = vpop.permute.xlu0 %1123 }
 0x114   : > { %v1388_v6 = vsel %vm398_vm0, %v4279_v57, %v964_v29  ;;  %v1505_v14 = vsel %vm1487_vm5, %v1468_v8, %v1124_v51 }
 0x115   : > { %1245 = vrot.lane.b32.xlu1 %v4542_v33, %s3943_s14 }
 0x116   : > { %1353 = vrot.lane.b32.xlu0 %v924_v50, %s3945_s22 }
 0x117   : > { %v1018_v42 = vpop.permute.xlu1 %1017 }
 0x118   : > { %v1178_v54 = vpop.permute.xlu0 %1177  ;;  %v1433_v16 = vsel %vm1413_vm3, %v1388_v6, %v1018_v42 }
 0x119   : > { %1299 = vrot.lane.b32.xlu1 %v870_v40, %s3944_s19  ;;  %v1542_v46 = vsel %vm1524_vm6, %v1505_v14, %v1178_v54 }
 0x11a   : > { %1031 = vrot.lane.b32.xlu0 %v4453_v34, %s3939_s10 }
 0x11b   : > { %v1072_v49 = vpop.permute.xlu1 %1071 }
 0x11c   : > { %v1232_v60 = vpop.permute.xlu0 %1231  ;;  %v1470_v57 = vsel %vm1450_vm4, %v1433_v16, %v1072_v49 }
 0x11d   : > { %977 = vrot.lane.b32.xlu1 %v4441_v11, %s3938_s9  ;;  %v745_v11 = vld [vmem:[#allocation2 + $0x1b3] sm:$0xff]  ;;  %v1579_v17 = vsel %vm1561_vm7, %v1542_v46, %v1232_v60 }
 0x11e   : > { %1085 = vrot.lane.b32.xlu0 %v4542_v33, %s3940_s11  ;;  %v764_v21 = vpack.c.bf16 %v746_v12, %v745_v11 }
 0x11f   : > { %v1126_v53 = vpop.permute.xlu1 %1125 }
 0x120   : > { %v1286_v9 = vpop.permute.xlu0 %1285  ;;  %v1507_v34 = vsel %vm1487_vm5, %v1470_v57, %v1126_v53 }
 0x121   : > { %979 = vrot.lane.b32.xlu1 %v870_v40, %s3938_s9  ;;  %v1616_v19 = vsel %vm1598_vm8, %v1579_v17, %v1286_v9  ;;  %s3946_s9 = smov 40  }
 0x122   : > { %1139 = vrot.lane.b32.xlu0 %v870_v40, %s3941_s12  ;;  %v926_v40 = vpack.c.bf16 %v908_v38, %v907_v37 }
 0x123   : > { %v1180_v58 = vpop.permute.xlu1 %1179 }
 0x124   : > { %v1340_v20 = vpop.permute.xlu0 %1339  ;;  %v1544_v25 = vsel %vm1524_vm6, %v1507_v34, %v1180_v58 }
 0x125   : > { %1033 = vrot.lane.b32.xlu1 %v924_v50, %s3939_s10  ;;  %v1653_v24 = vsel %vm1635_vm9, %v1616_v19, %v1340_v20 }
 0x126   : > { %1193 = vrot.lane.b32.xlu0 %v924_v50, %s3942_s13  ;;  %3802 = vmatprep.mubr.msk.bf16.mxu0 %vm1692_vm10, %v1653_v24 }
 0x127   : > { %v1234_v1 = vpop.permute.xlu1 %1233 }
 0x128   : > { %v1581_v26 = vsel %vm1561_vm7, %v1544_v25, %v1234_v1  ;;  %v1342_v10 = vpop.permute.xlu0 %1341 }
 0x129   : > { %1087 = vrot.lane.b32.xlu1 %v656_v59, %s3940_s11 }
 0x12a   : > { %1247 = vrot.lane.b32.xlu0 %v656_v59, %s3943_s14 }
 0x12b   : > { %v1288_v15 = vpop.permute.xlu1 %1287 }
 0x12c   : > { %v1618_v28 = vsel %vm1598_vm8, %v1581_v26, %v1288_v15  ;;  %v1020_v36 = vpop.permute.xlu0 %1019 }
 0x12d   : > { %1141 = vrot.lane.b32.xlu1 %v710_v5, %s3941_s12  ;;  %v1655_v31 = vsel %vm1635_vm9, %v1618_v28, %v1342_v10 }
 0x12e   : > { %3803 = vmatmul.mubr.msk.bf16.gmra.mrb[16].mxu0 %vm1692_vm10, %v1655_v31  ;;  %1301 = vrot.lane.b32.xlu0 %v710_v5, %s3944_s19 }
 0x12f   : > { %v966_v62 = vpop.permute.xlu1 %965 }
 0x130   : > { %v1074_v41 = vpop.permute.xlu0 %1073  ;;  %v1391_v53 = vsel %vm398_vm0, %v4293_v18, %v966_v62 }
 0x131   : > { %1195 = vrot.lane.b32.xlu1 %v764_v21, %s3942_s13  ;;  %v1435_v54 = vsel %vm1413_vm3, %v1391_v53, %v1020_v36 }
 0x132   : > { %1355 = vrot.lane.b32.xlu0 %v764_v21, %s3945_s22  ;;  %v1472_v56 = vsel %vm1450_vm4, %v1435_v54, %v1074_v41 }
 0x133   : > { %v968_v35 = vpop.permute.xlu1 %967 }
 0x134   : > { %v1128_v44 = vpop.permute.xlu0 %1127  ;;  %v1394_v55 = vsel %vm398_vm0, %v4319_v52, %v968_v35 }
 0x135   : > { %1249 = vrot.lane.b32.xlu1 %v818_v27, %s3943_s14  ;;  %v1509_v59 = vsel %vm1487_vm5, %v1472_v56, %v1128_v44  ;;  %v4640_v56 = vld [vmem:[%s5406_s2] ss:$0 sm:$0xff] }
 0x137   : > { %v1022_v29 = vpop.permute.xlu1 %1021 }
 0x138   : > { %v1182_v48 = vpop.permute.xlu0 %1181  ;;  %v1437_v63 = vsel %vm1413_vm3, %v1394_v55, %v1022_v29 }
 0x139   : > { %1303 = vrot.lane.b32.xlu1 %v872_v43, %s3944_s19  ;;  %v1546_v61 = vsel %vm1524_vm6, %v1509_v59, %v1182_v48 }
 0x13b   : > { %v1076_v42 = vpop.permute.xlu1 %1075 }
 0x13c   : > { %v1236_v50 = vpop.permute.xlu0 %1235  ;;  %v1474_v3 = vsel %vm1450_vm4, %v1437_v63, %v1076_v42 }
 0x13d   : > { %1357 = vrot.lane.b32.xlu1 %v926_v40, %s3945_s22  ;;  %v1583_v1 = vsel %vm1561_vm7, %v1546_v61, %v1236_v50  ;;  %v4645_v61 = vld [vmem:[%s5407_s3] ss:$0 sm:$0xff] }
 0x13f   : > { %v1130_v47 = vpop.permute.xlu1 %1129 }
 0x140   : > { %v1290_v58 = vpop.permute.xlu0 %1289  ;;  %v1511_v5 = vsel %vm1487_vm5, %v1474_v3, %v1130_v47 }
 0x141   : > { %v1620_v18 = vsel %vm1598_vm8, %v1583_v1, %v1290_v58 }
 0x143   : > { %v1184_v49 = vpop.permute.xlu1 %1183 }
 0x144   : > { %v1344_v4 = vpop.permute.xlu0 %1343  ;;  %v1548_v8 = vsel %vm1524_vm6, %v1511_v5, %v1184_v49 }
 0x145   : > { %v1657_v52 = vsel %vm1635_vm9, %v1620_v18, %v1344_v4 }
 0x146   : > { %3806 = vmatprep.mubr.msk.bf16.mxu0 %vm1692_vm10, %v1657_v52 }
 0x147   : > { %v1238_v51 = vpop.permute.xlu1 %1237 }
 0x148   : > { %v1585_v9 = vsel %vm1561_vm7, %v1548_v8, %v1238_v51  ;;  %v1346_v12 = vpop.permute.xlu0 %1345 }
 0x14b   : > { %v1292_v60 = vpop.permute.xlu1 %1291 }
 0x14c   : > { %v1622_v11 = vsel %vm1598_vm8, %v1585_v9, %v1292_v60  ;;  %v1024_v46 = vpop.permute.xlu0 %1023 }
 0x14d   : > { %v1659_v14 = vsel %vm1635_vm9, %v1622_v11, %v1346_v12 }
 0x14e   : > { %3807 = vmatmul.mubr.msk.bf16.gmra.mrb[20].mxu0 %vm1692_vm10, %v1659_v14 }
 0x14f   : > { %v970_v6 = vpop.permute.xlu1 %969 }
 0x150   : > { %v1078_v17 = vpop.permute.xlu0 %1077  ;;  %v1397_v24 = vsel %vm398_vm0, %v4336_v13, %v970_v6 }
 0x151   : > { %v1439_v62 = vsel %vm1413_vm3, %v1397_v24, %v1024_v46 }
 0x152   : > { %v1476_v26 = vsel %vm1450_vm4, %v1439_v62, %v1078_v17 }
 0x153   : > { %v972_v15 = vpop.permute.xlu1 %971 }
 0x154   : > { %v1132_v57 = vpop.permute.xlu0 %1131  ;;  %v1400_v25 = vsel %vm398_vm0, %v4363_v45, %v972_v15 }
 0x155   : > { %v1513_v28 = vsel %vm1487_vm5, %v1476_v26, %v1132_v57 }
 0x157   : > { %v1026_v16 = vpop.permute.xlu1 %1025 }
 0x158   : > { %v1186_v20 = vpop.permute.xlu0 %1185  ;;  %v1441_v30 = vsel %vm1413_vm3, %v1400_v25, %v1026_v16 }
 0x159   : > { %v1550_v32 = vsel %vm1524_vm6, %v1513_v28, %v1186_v20 }
 0x15b   : > { %v1080_v21 = vpop.permute.xlu1 %1079 }
 0x15c   : > { %v1240_v23 = vpop.permute.xlu0 %1239  ;;  %v1478_v35 = vsel %vm1450_vm4, %v1441_v30, %v1080_v21 }
 0x15d   : > { %v1587_v31 = vsel %vm1561_vm7, %v1550_v32, %v1240_v23 }
 0x15f   : > { %v1134_v19 = vpop.permute.xlu1 %1133 }
 0x160   : > { %v1294_v27 = vpop.permute.xlu0 %1293  ;;  %v1515_v36 = vsel %vm1487_vm5, %v1478_v35, %v1134_v19 }
 0x161   : > { %v1624_v13 = vsel %vm1598_vm8, %v1587_v31, %v1294_v27 }
 0x163   : > { %v1188_v22 = vpop.permute.xlu1 %1187 }
 0x164   : > { %v1348_v43 = vpop.permute.xlu0 %1347  ;;  %v1552_v38 = vsel %vm1524_vm6, %v1515_v36, %v1188_v22 }
 0x165   : > { %v1661_v45 = vsel %vm1635_vm9, %v1624_v13, %v1348_v43 }
 0x166   : > { %3810 = vmatprep.mubr.msk.bf16.mxu0 %vm1692_vm10, %v1661_v45 }
 0x167   : > { %v1242_v34 = vpop.permute.xlu1 %1241 }
 0x168   : > { %v1589_v29 = vsel %vm1561_vm7, %v1552_v38, %v1242_v34  ;;  %v1350_v41 = vpop.permute.xlu0 %1349 }
 0x16b   : > { %v1296_v10 = vpop.permute.xlu1 %1295 }
 0x16c   : > { %v1626_v40 = vsel %vm1598_vm8, %v1589_v29, %v1296_v10  ;;  %v1028_v47 = vpop.permute.xlu0 %1027 }
 0x16d   : > { %v1663_v42 = vsel %vm1635_vm9, %v1626_v40, %v1350_v41 }
 0x16e   : > { %3811 = vmatmul.mubr.msk.bf16.gmra.mrb[24].mxu0 %vm1692_vm10, %v1663_v42 }
 0x16f   : > { %v974_v37 = vpop.permute.xlu1 %973 }
 0x170   : > { %v1082_v49 = vpop.permute.xlu0 %1081  ;;  %v1403_v63 = vsel %vm398_vm0, %v4380_v7, %v974_v37 }
 0x171   : > { %v1443_v18 = vsel %vm1413_vm3, %v1403_v63, %v1028_v47 }
 0x172   : > { %v1480_v6 = vsel %vm1450_vm4, %v1443_v18, %v1082_v49 }
 0x173   : > { %v976_v44 = vpop.permute.xlu1 %975 }
 0x174   : > { %v1136_v51 = vpop.permute.xlu0 %1135  ;;  %v1406_v52 = vsel %vm398_vm0, %v4407_v39, %v976_v44 }
 0x175   : > { %v1517_v7 = vsel %vm1487_vm5, %v1480_v6, %v1136_v51 }
 0x177   : > { %v1030_v48 = vpop.permute.xlu1 %1029 }
 0x178   : > { %v1190_v54 = vpop.permute.xlu0 %1189  ;;  %v1445_v21 = vsel %vm1413_vm3, %v1406_v52, %v1030_v48 }
 0x179   : > { %v1554_v16 = vsel %vm1524_vm6, %v1517_v7, %v1190_v54 }
 0x17b   : > { %v1084_v50 = vpop.permute.xlu1 %1083 }
 0x17c   : > { %v1244_v58 = vpop.permute.xlu0 %1243  ;;  %v1482_v22 = vsel %vm1450_vm4, %v1445_v21, %v1084_v50 }
 0x17d   : > { %v1591_v57 = vsel %vm1561_vm7, %v1554_v16, %v1244_v58 }
 0x17f   : > { %v1138_v53 = vpop.permute.xlu1 %1137 }
 0x180   : > { %v1298_v12 = vpop.permute.xlu0 %1297  ;;  %v1519_v62 = vsel %vm1487_vm5, %v1482_v22, %v1138_v53 }
 0x181   : > { %v3788_v60 = vpop.f32.mrb[0].mxu0  ;;  %v1628_v34 = vsel %vm1598_vm8, %v1591_v57, %v1298_v12 }
 0x182   : > { %v1919_v1 = vmul.f32 %v3788_v60, %v4640_v56  ;;  %v1767_v3 = vpop.f32.mrb[1].mxu0 }
 0x183   : > { %v1192_v55 = vpop.permute.xlu1 %1191  ;;  %v1917_v4 = vmul.f32 %v4640_v56, %v1767_v3  ;;  %v3789_v5 = vpop.f32.mrb[2].mxu0 }
 0x184   : > { %v1962_v8 = vadd.f32 %v4645_v61, %v1919_v1  ;;  %v1920_v9 = vmul.f32 %v3789_v5, %v4640_v56  ;;  %v1770_v11 = vpop.f32.mrb[3].mxu0  ;;  %v1352_v24 = vpop.permute.xlu0 %1351  ;;  %v1556_v28 = vsel %vm1524_vm6, %v1519_v62, %v1192_v55 }
 0x185   : > { %v1960_v14 = vadd.f32 %v4645_v61, %v1917_v4  ;;  %v1918_v15 = vmul.f32 %v4640_v56, %v1770_v11  ;;  %v1665_v26 = vsel %vm1635_vm9, %v1628_v34, %v1352_v24 }
 0x186   : > { %v1998_v17 = vmax.f32 %v1962_v8, 0.0  ;;  %v1963_v39 = vadd.f32 %v4645_v61, %v1920_v9  ;;  %3814 = vmatprep.mubr.msk.bf16.mxu0 %vm1692_vm10, %v1665_v26 }
 0x187   : > { %v1246_v59 = vpop.permute.xlu1 %1245  ;;  %v1996_v19 = vmax.f32 %v1960_v14, 0.0  ;;  %v1961_v20 = vadd.f32 %v4645_v61, %v1918_v15 }
 0x188   : > { %2034 = vst.msk [vmem:[#allocation3 + $0x19] sm:$0xff] %vm1413_vm3, %v1998_v17  ;;  %v1999_v23 = vmax.f32 %v1963_v39, 0.0  ;;  %v1593_v10 = vsel %vm1561_vm7, %v1556_v28, %v1246_v59  ;;  %v1354_v30 = vpop.permute.xlu0 %1353 }
 0x189   : > { %2032 = vst.msk [vmem:[#allocation3 + $0x1] sm:$0xff] %vm1413_vm3, %v1996_v19  ;;  %v1997_v25 = vmax.f32 %v1961_v20, 0.0 }
 0x18a   : > { %2105 = vst.msk [vmem:[#allocation3] sm:$0xff] %vm1413_vm3, %v3937_v0  ;;  %2035 = vst.msk [vmem:[#allocation3 + $0x21] sm:$0xff] %vm1413_vm3, %v1999_v23 }
 0x18b   : > { %v1300_v46 = vpop.permute.xlu1 %1299  ;;  %2033 = vst.msk [vmem:[#allocation3 + $0x9] sm:$0xff] %vm1413_vm3, %v1997_v25 }
 0x18c   : > { %2106 = vst.msk [vmem:[#allocation3 + $0x8] sm:$0xff] %vm1413_vm3, %v3937_v0  ;;  %v1630_v32 = vsel %vm1598_vm8, %v1593_v10, %v1300_v46  ;;  %v1032_v13 = vpop.permute.xlu0 %1031 }
 0x18d   : > { %2108 = vst.msk [vmem:[#allocation3 + $0x10] sm:$0x3] %vm2107_vm12, %v3937_v0  ;;  %v1667_v31 = vsel %vm1635_vm9, %v1630_v32, %v1354_v30 }
 0x18e   : > { %3815 = vmatmul.mubr.msk.bf16.gmra.mrb[28].mxu0 %vm1692_vm10, %v1667_v31 }
 0x18f   : > { %v978_v27 = vpop.permute.xlu1 %977  ;;  %v2258_v43 = vld [vmem:[#allocation3 + $0x18] sm:$0xff] }
 0x190   : > { %v2163_v37 = vld [vmem:[#allocation3 + $0x19] sm:$0xff]  ;;  %v1086_v44 = vpop.permute.xlu0 %1085  ;;  %v1409_v5 = vsel %vm398_vm0, %v4430_v2, %v978_v27 }
 0x191   : > { %v2259_v45 = vld [vmem:[#allocation3 + $0x20] sm:$0xff]  ;;  %v1447_v8 = vsel %vm1413_vm3, %v1409_v5, %v1032_v13 }
 0x192   : > { %v2164_v38 = vld [vmem:[#allocation3 + $0x21] sm:$0xff]  ;;  %v4685_v29 = vpack.c.bf16 %v2259_v45, %v2258_v43  ;;  %v1484_v7 = vsel %vm1450_vm4, %v1447_v8, %v1086_v44 }
 0x193   : > { %v980_v35 = vpop.permute.xlu1 %979  ;;  %v2194_v40 = vpack.c.bf16 %v2164_v38, %v2163_v37  ;;  %v2211_v41 = vld [vmem:[#allocation3 + $0x1a] sm:$0xff]  ;;  %v2212_v42 = vld [vmem:[#allocation3 + $0x22] sm:$0xff] }
 0x194   : > { %2659 = vrot.lane.b32.xlu0 %v4685_v29, %s3943_s14  ;;  %v2242_v48 = vpack.c.bf16 %v2212_v42, %v2211_v41  ;;  %v1140_v49 = vpop.permute.xlu0 %1139  ;;  %v2161_v51 = vld [vmem:[#allocation3 + $0x1] sm:$0xff]  ;;  %v2162_v53 = vld [vmem:[#allocation3 + $0x9] sm:$0xff]  ;;  %v1412_v3 = vsel %vm398_vm0, %v4542_v33, %v980_v35  ;;  %vm3141_vm0 = vcmask 457728  }
 0x195   : > { %2565 = vrot.lane.b32.xlu1 %v2194_v40, %s3939_s10  ;;  %v2193_v55 = vpack.c.bf16 %v2162_v53, %v2161_v51  ;;  %v2209_v59 = vld [vmem:[#allocation3 + $0x2] sm:$0xff]  ;;  %v2210_v60 = vld [vmem:[#allocation3 + $0xa] sm:$0xff]  ;;  %v1521_v16 = vsel %vm1487_vm5, %v1484_v7, %v1140_v49  ;;  %v3909_v49 = vld [vmem:[%s5408_s4 + $0x18] sm:$0xff]  }
 0x196   : > { %v2241_v1 = vpack.c.bf16 %v2210_v60, %v2209_v59  ;;  %v3906_v13 = vld [vmem:[%s5408_s4] sm:$0xff]   ;;  %v3907_v42 = vld [vmem:[%s5408_s4 + $0x8] sm:$0xff]  }
 0x197   : > { %v1034_v36 = vpop.permute.xlu1 %1033  ;;  %3822 = vmatprep.subr.bf16.mxu1 %v3906_v13  ;;  %v3910_v51 = vld [vmem:[%s5408_s4 + $0x20] ss:$0 sps:$4 sm:$0xff]  }
 0x198   : > { %2707 = vrot.lane.b32.xlu0 %v2194_v40, %s3945_s22  ;;  %v1194_v54 = vpop.permute.xlu0 %1193  ;;  %v1449_v12 = vsel %vm1413_vm3, %v1412_v3, %v1034_v36  ;;  %3823 = vmatpush3.bf16.msra.mxu1 %v3906_v13 }
 0x199   : > { %2613 = vrot.lane.b32.xlu1 %v2242_v48, %s3941_s12  ;;  %v1558_v19 = vsel %vm1524_vm6, %v1521_v16, %v1194_v54  ;;  %3824 = vmatprep.subr.bf16.mxu1 %v3907_v42 }
 0x19b   : > { %v1088_v47 = vpop.permute.xlu1 %1087 }
 0x19c   : > { %2755 = vrot.lane.b32.xlu0 %v2242_v48, %s3946_s9  ;;  %v1248_v63 = vpop.permute.xlu0 %1247  ;;  %v1486_v46 = vsel %vm1450_vm4, %v1449_v12, %v1088_v47  ;;  %3825 = vmatpush3.bf16.msra.mxu1 %v3907_v42  ;;  %v3908_v48 = vld [vmem:[%s5408_s4 + $0x10] sm:$0xff]  }
 0x19d   : > { %v1595_v34 = vsel %vm1561_vm7, %v1558_v19, %v1248_v63  ;;  %3826 = vmatprep.subr.bf16.mxu1 %v3908_v48 }
 0x19f   : > { %v1142_v50 = vpop.permute.xlu1 %1141 }
 0x1a0   : > { %2563 = vrot.lane.b32.xlu0 %v2193_v55, %s3939_s10  ;;  %v1302_v15 = vpop.permute.xlu0 %1301  ;;  %v1523_v57 = vsel %vm1487_vm5, %v1486_v46, %v1142_v50  ;;  %3827 = vmatpush3.bf16.msra.mxu1 %v3908_v48  ;;  %v3278_v55 = vsel %vm3276_vm13, %v3910_v51, 0 }
 0x1a1   : > { %v3792_v4 = vpop.f32.mrb[4].mxu0  ;;  %v1632_v27 = vsel %vm1598_vm8, %v1595_v34, %v1302_v15  ;;  %3828 = vmatprep.subr.bf16.mxu1 %v3909_v49 }
 0x1a2   : > { %v1923_v52 = vmul.f32 %v3792_v4, %v4640_v56  ;;  %v1783_v6 = vpop.f32.mrb[5].mxu0 }
 0x1a3   : > { %v1196_v58 = vpop.permute.xlu1 %1195  ;;  %v1921_v9 = vmul.f32 %v4640_v56, %v1783_v6  ;;  %v3793_v11 = vpop.f32.mrb[6].mxu0 }
 0x1a4   : > { %v1966_v14 = vadd.f32 %v4645_v61, %v1923_v52  ;;  %v1924_v33 = vmul.f32 %v3793_v11, %v4640_v56  ;;  %2611 = vrot.lane.b32.xlu0 %v2241_v1, %s3941_s12  ;;  %v1786_v2 = vpop.f32.mrb[7].mxu0  ;;  %v1560_v23 = vsel %vm1524_vm6, %v1523_v57, %v1196_v58  ;;  %v1356_v28 = vpop.permute.xlu0 %1355  ;;  %3829 = vmatpush3.bf16.msra.mxu1 %v3909_v49 }
 0x1a5   : > { %v1964_v17 = vadd.f32 %v4645_v61, %v1921_v9  ;;  %v1922_v21 = vmul.f32 %v4640_v56, %v1786_v2  ;;  %v1669_v30 = vsel %vm1635_vm9, %v1632_v27, %v1356_v28  ;;  %3865 = vmatprep.subr.msk.bf16.mxu1 %vm3276_vm13, %v3910_v51 }
 0x1a6   : > { %v2002_v20 = vmax.f32 %v1966_v14, 0.0  ;;  %v1967_v22 = vadd.f32 %v4645_v61, %v1924_v33  ;;  %3818 = vmatprep.mubr.msk.bf16.mxu0 %vm1692_vm10, %v1669_v30 }
 0x1a7   : > { %v1250_v18 = vpop.permute.xlu1 %1249  ;;  %v2000_v24 = vmax.f32 %v1964_v17, 0.0  ;;  %v1965_v62 = vadd.f32 %v4645_v61, %v1922_v21 }
 0x1a8   : > { %v1597_v25 = vsel %vm1561_vm7, %v1560_v23, %v1250_v18  ;;  %2038 = vst.msk [vmem:[#allocation3 + $0x49] sm:$0xff] %vm1413_vm3, %v2002_v20  ;;  %v2003_v26 = vmax.f32 %v1967_v22, 0.0  ;;  %3831 = vmatpush3.bf16.msra.mxu1 %v3278_v55 }
 0x1a9   : > { %2036 = vst.msk [vmem:[#allocation3 + $0x31] sm:$0xff] %vm1413_vm3, %v2000_v24  ;;  %v2001_v32 = vmax.f32 %v1965_v62, 0.0 }
 0x1aa   : > { %2039 = vst.msk [vmem:[#allocation3 + $0x51] sm:$0xff] %vm1413_vm3, %v2003_v26 }
 0x1ab   : > { %v1304_v39 = vpop.permute.xlu1 %1303  ;;  %2037 = vst.msk [vmem:[#allocation3 + $0x39] sm:$0xff] %vm1413_vm3, %v2001_v32 }
 0x1ac   : > { %v1634_v10 = vsel %vm1598_vm8, %v1597_v25, %v1304_v39 }
 0x1af   : > { %v1358_v31 = vpop.permute.xlu1 %1357  ;;  %v2405_v43 = vld [vmem:[#allocation3 + $0x48] sm:$0xff] }
 0x1b0   : > { %v1671_v35 = vsel %vm1635_vm9, %v1634_v10, %v1358_v31  ;;  %v2453_v44 = vld [vmem:[#allocation3 + $0x49] sm:$0xff]  ;;  %v2451_v8 = vld [vmem:[#allocation3 + $0x31] sm:$0xff] }
 0x1b1   : > { %3819 = vmatmul.mubr.msk.bf16.gmra.mrb[32].mxu0 %vm1692_vm10, %v1671_v35  ;;  %v2501_v36 = vld [vmem:[#allocation3 + $0x4a] sm:$0xff]  ;;  %v2502_v45 = vld [vmem:[#allocation3 + $0x52] sm:$0xff] }
 0x1b2   : > { %v2406_v37 = vld [vmem:[#allocation3 + $0x50] sm:$0xff]  ;;  %v2532_v38 = vpack.c.bf16 %v2502_v45, %v2501_v36  ;;  %v2404_v50 = vld [vmem:[#allocation3 + $0x38] sm:$0xff] }
 0x1b3   : > { %v4730_v40 = vpack.c.bf16 %v2406_v37, %v2405_v43  ;;  %v2454_v41 = vld [vmem:[#allocation3 + $0x51] sm:$0xff]  ;;  %v2452_v3 = vld [vmem:[#allocation3 + $0x39] sm:$0xff] }
 0x1b4   : > { %2901 = vrot.lane.b32.xlu0 %v2532_v38, %s3947_s17  ;;  %v2484_v47 = vpack.c.bf16 %v2454_v41, %v2453_v44  ;;  %v2403_v54 = vld [vmem:[#allocation3 + $0x30] sm:$0xff]  ;;  %v2483_v12 = vpack.c.bf16 %v2452_v3, %v2451_v8  ;;  %v2500_v15 = vld [vmem:[#allocation3 + $0x3a] sm:$0xff] }
 0x1b5   : > { %2805 = vrot.lane.b32.xlu1 %v4730_v40, %s3948_s18  ;;  %v4755_v60 = vpack.c.bf16 %v2404_v50, %v2403_v54  ;;  %v2499_v33 = vld [vmem:[#allocation3 + $0x32] sm:$0xff] }
 0x1b6   : > { %v2531_v16 = vpack.c.bf16 %v2500_v15, %v2499_v33 }
 0x1b8   : > { %2663 = vrot.lane.b32.xlu0 %v4730_v40, %s3943_s14 }
 0x1b9   : > { %2853 = vrot.lane.b32.xlu1 %v2484_v47, %s3949_s21 }
 0x1bc   : > { %2711 = vrot.lane.b32.xlu0 %v2484_v47, %s3945_s22 }
 0x1bd   : > { %2569 = vrot.lane.b32.xlu1 %v2484_v47, %s3939_s10 }
 0x1c0   : > { %2759 = vrot.lane.b32.xlu0 %v2532_v38, %s3946_s9 }
 0x1c1   : > { %2617 = vrot.lane.b32.xlu1 %v2532_v38, %s3941_s12  ;;  %v3796_v53 = vpop.f32.mrb[8].mxu0 }
 0x1c2   : > { %v1927_v58 = vmul.f32 %v3796_v53, %v4640_v56  ;;  %v1799_v59 = vpop.f32.mrb[9].mxu0 }
 0x1c3   : > { %v1925_v63 = vmul.f32 %v4640_v56, %v1799_v59  ;;  %v3797_v1 = vpop.f32.mrb[10].mxu0 }
 0x1c4   : > { %v1970_v18 = vadd.f32 %v4645_v61, %v1927_v58  ;;  %v1928_v4 = vmul.f32 %v3797_v1, %v4640_v56  ;;  %2803 = vrot.lane.b32.xlu0 %v4755_v60, %s3948_s18  ;;  %v1802_v5 = vpop.f32.mrb[11].mxu0 }
 0x1c5   : > { %2661 = vrot.lane.b32.xlu1 %v4755_v60, %s3943_s14  ;;  %v1968_v52 = vadd.f32 %v4645_v61, %v1925_v63  ;;  %v1926_v6 = vmul.f32 %v4640_v56, %v1802_v5 }
 0x1c6   : > { %v2006_v9 = vmax.f32 %v1970_v18, 0.0  ;;  %v1971_v11 = vadd.f32 %v4645_v61, %v1928_v4 }
 0x1c7   : > { %v2004_v7 = vmax.f32 %v1968_v52, 0.0  ;;  %v1969_v14 = vadd.f32 %v4645_v61, %v1926_v6 }
 0x1c8   : > { %2042 = vst.msk [vmem:[#allocation3 + $0x79] sm:$0xff] %vm1413_vm3, %v2006_v9  ;;  %v2007_v2 = vmax.f32 %v1971_v11, 0.0  ;;  %2851 = vrot.lane.b32.xlu0 %v2483_v12, %s3949_s21 }
 0x1c9   : > { %2709 = vrot.lane.b32.xlu1 %v2483_v12, %s3945_s22  ;;  %2040 = vst.msk [vmem:[#allocation3 + $0x61] sm:$0xff] %vm1413_vm3, %v2004_v7  ;;  %v2005_v46 = vmax.f32 %v1969_v14, 0.0 }
 0x1ca   : > { %2043 = vst.msk [vmem:[#allocation3 + $0x81] sm:$0xff] %vm1413_vm3, %v2007_v2 }
 0x1cb   : > { %2041 = vst.msk [vmem:[#allocation3 + $0x69] sm:$0xff] %vm1413_vm3, %v2005_v46 }
 0x1cc   : > { %2899 = vrot.lane.b32.xlu0 %v2531_v16, %s3947_s17 }
 0x1cd   : > { %2757 = vrot.lane.b32.xlu1 %v2531_v16, %s3946_s9 }
 0x1cf   : > { %v2409_v17 = vld [vmem:[#allocation3 + $0x78] sm:$0xff] }
 0x1d0   : > { %2615 = vrot.lane.b32.xlu0 %v2531_v16, %s3941_s12  ;;  %v2457_v23 = vld [vmem:[#allocation3 + $0x79] sm:$0xff]  ;;  %v2455_v45 = vld [vmem:[#allocation3 + $0x61] sm:$0xff] }
 0x1d1   : > { %2567 = vrot.lane.b32.xlu1 %v2483_v12, %s3939_s10  ;;  %v2505_v39 = vld [vmem:[#allocation3 + $0x7a] sm:$0xff]  ;;  %v2506_v21 = vld [vmem:[#allocation3 + $0x82] sm:$0xff] }
 0x1d2   : > { %v2410_v57 = vld [vmem:[#allocation3 + $0x80] sm:$0xff]  ;;  %v2534_v19 = vpack.c.bf16 %v2506_v21, %v2505_v39  ;;  %v2408_v24 = vld [vmem:[#allocation3 + $0x68] sm:$0xff] }
 0x1d3   : > { %v4778_v20 = vpack.c.bf16 %v2410_v57, %v2409_v17  ;;  %v2458_v22 = vld [vmem:[#allocation3 + $0x81] sm:$0xff]  ;;  %v2456_v30 = vld [vmem:[#allocation3 + $0x69] sm:$0xff] }
 0x1d4   : > { %2905 = vrot.lane.b32.xlu0 %v2534_v19, %s3947_s17  ;;  %v2486_v34 = vpack.c.bf16 %v2458_v22, %v2457_v23  ;;  %v2407_v25 = vld [vmem:[#allocation3 + $0x60] sm:$0xff]  ;;  %v2485_v41 = vpack.c.bf16 %v2456_v30, %v2455_v45  ;;  %v2504_v48 = vld [vmem:[#allocation3 + $0x6a] sm:$0xff] }
 0x1d5   : > { %2809 = vrot.lane.b32.xlu1 %v4778_v20, %s3948_s18  ;;  %v4791_v28 = vpack.c.bf16 %v2408_v24, %v2407_v25  ;;  %v2503_v47 = vld [vmem:[#allocation3 + $0x62] sm:$0xff] }
 0x1d6   : > { %v2533_v51 = vpack.c.bf16 %v2504_v48, %v2503_v47 }
 0x1d8   : > { %2667 = vrot.lane.b32.xlu0 %v4778_v20, %s3943_s14 }
 0x1d9   : > { %2857 = vrot.lane.b32.xlu1 %v2486_v34, %s3949_s21 }
 0x1dc   : > { %2715 = vrot.lane.b32.xlu0 %v2486_v34, %s3945_s22 }
 0x1dd   : > { %2573 = vrot.lane.b32.xlu1 %v2486_v34, %s3939_s10 }
 0x1e0   : > { %2763 = vrot.lane.b32.xlu0 %v2534_v19, %s3946_s9 }
 0x1e1   : > { %2621 = vrot.lane.b32.xlu1 %v2534_v19, %s3941_s12  ;;  %v3800_v62 = vpop.f32.mrb[12].mxu0 }
 0x1e2   : > { %v1931_v26 = vmul.f32 %v3800_v62, %v4640_v56  ;;  %v1815_v27 = vpop.f32.mrb[13].mxu0 }
 0x1e3   : > { %v1929_v10 = vmul.f32 %v4640_v56, %v1815_v27  ;;  %v3801_v32 = vpop.f32.mrb[14].mxu0 }
 0x1e4   : > { %v1974_v31 = vadd.f32 %v4645_v61, %v1931_v26  ;;  %v1932_v35 = vmul.f32 %v3801_v32, %v4640_v56  ;;  %2807 = vrot.lane.b32.xlu0 %v4791_v28, %s3948_s18  ;;  %v1818_v13 = vpop.f32.mrb[15].mxu0 }
 0x1e5   : > { %2665 = vrot.lane.b32.xlu1 %v4791_v28, %s3943_s14  ;;  %v1972_v43 = vadd.f32 %v4645_v61, %v1929_v10  ;;  %v1930_v36 = vmul.f32 %v4640_v56, %v1818_v13 }
 0x1e6   : > { %v2010_v37 = vmax.f32 %v1974_v31, 0.0  ;;  %v1975_v38 = vadd.f32 %v4645_v61, %v1932_v35 }
 0x1e7   : > { %v2008_v42 = vmax.f32 %v1972_v43, 0.0  ;;  %v1973_v44 = vadd.f32 %v4645_v61, %v1930_v36 }
 0x1e8   : > { %2046 = vst.msk [vmem:[#allocation3 + $0xa9] sm:$0xff] %vm1413_vm3, %v2010_v37  ;;  %v2011_v49 = vmax.f32 %v1975_v38, 0.0  ;;  %2855 = vrot.lane.b32.xlu0 %v2485_v41, %s3949_s21 }
 0x1e9   : > { %2713 = vrot.lane.b32.xlu1 %v2485_v41, %s3945_s22  ;;  %2044 = vst.msk [vmem:[#allocation3 + $0x91] sm:$0xff] %vm1413_vm3, %v2008_v42  ;;  %v2009_v50 = vmax.f32 %v1973_v44, 0.0 }
 0x1ea   : > { %2047 = vst.msk [vmem:[#allocation3 + $0xb1] sm:$0xff] %vm1413_vm3, %v2011_v49 }
 0x1eb   : > { %2045 = vst.msk [vmem:[#allocation3 + $0x99] sm:$0xff] %vm1413_vm3, %v2009_v50 }
 0x1ec   : > { %2903 = vrot.lane.b32.xlu0 %v2533_v51, %s3947_s17 }
 0x1ed   : > { %2761 = vrot.lane.b32.xlu1 %v2533_v51, %s3946_s9 }
 0x1ef   : > { %v2413_v53 = vld [vmem:[#allocation3 + $0xa8] sm:$0xff] }
 0x1f0   : > { %2619 = vrot.lane.b32.xlu0 %v2533_v51, %s3941_s12  ;;  %v2461_v3 = vld [vmem:[#allocation3 + $0xa9] sm:$0xff]  ;;  %v2459_v8 = vld [vmem:[#allocation3 + $0x91] sm:$0xff] }
 0x1f1   : > { %2571 = vrot.lane.b32.xlu1 %v2485_v41, %s3939_s10  ;;  %v2509_v54 = vld [vmem:[#allocation3 + $0xaa] sm:$0xff]  ;;  %v2510_v55 = vld [vmem:[#allocation3 + $0xb2] sm:$0xff] }
 0x1f2   : > { %v2414_v58 = vld [vmem:[#allocation3 + $0xb0] sm:$0xff]  ;;  %v2536_v59 = vpack.c.bf16 %v2510_v55, %v2509_v54  ;;  %v2412_v4 = vld [vmem:[#allocation3 + $0x98] sm:$0xff] }
 0x1f3   : > { %v4814_v63 = vpack.c.bf16 %v2414_v58, %v2413_v53  ;;  %v2462_v1 = vld [vmem:[#allocation3 + $0xb1] sm:$0xff]  ;;  %v2460_v6 = vld [vmem:[#allocation3 + $0x99] sm:$0xff] }
 0x1f4   : > { %2909 = vrot.lane.b32.xlu0 %v2536_v59, %s3947_s17  ;;  %v2488_v18 = vpack.c.bf16 %v2462_v1, %v2461_v3  ;;  %v2411_v5 = vld [vmem:[#allocation3 + $0x90] sm:$0xff]  ;;  %v2487_v9 = vpack.c.bf16 %v2460_v6, %v2459_v8  ;;  %v2508_v12 = vld [vmem:[#allocation3 + $0x9a] sm:$0xff] }
 0x1f5   : > { %2813 = vrot.lane.b32.xlu1 %v4814_v63, %s3948_s18  ;;  %v2439_v52 = vpack.c.bf16 %v2412_v4, %v2411_v5  ;;  %v2507_v11 = vld [vmem:[#allocation3 + $0x92] sm:$0xff] }
 0x1f6   : > { %v2535_v15 = vpack.c.bf16 %v2508_v12, %v2507_v11 }
 0x1f8   : > { %2671 = vrot.lane.b32.xlu0 %v4814_v63, %s3943_s14 }
 0x1f9   : > { %2861 = vrot.lane.b32.xlu1 %v2488_v18, %s3949_s21 }
 0x1fc   : > { %2811 = vrot.lane.b32.xlu0 %v2439_v52, %s3948_s18 }
 0x1fd   : > { %2577 = vrot.lane.b32.xlu1 %v2488_v18, %s3939_s10 }
 0x200   : > { %2859 = vrot.lane.b32.xlu0 %v2487_v9, %s3949_s21 }
 0x201   : > { %2625 = vrot.lane.b32.xlu1 %v2536_v59, %s3941_s12  ;;  %v3804_v7 = vpop.f32.mrb[16].mxu0 }
 0x202   : > { %v1935_v14 = vmul.f32 %v3804_v7, %v4640_v56  ;;  %v1831_v33 = vpop.f32.mrb[17].mxu0 }
 0x203   : > { %v1933_v2 = vmul.f32 %v4640_v56, %v1831_v33  ;;  %v3805_v46 = vpop.f32.mrb[18].mxu0 }
 0x204   : > { %v1978_v16 = vadd.f32 %v4645_v61, %v1935_v14  ;;  %v1936_v17 = vmul.f32 %v3805_v46, %v4640_v56  ;;  %2907 = vrot.lane.b32.xlu0 %v2535_v15, %s3947_s17  ;;  %v1834_v39 = vpop.f32.mrb[19].mxu0  ;;  %v2114_v46 = vld [vmem:[#allocation3 + $0x8] sm:$0xff] }
 0x205   : > { %2669 = vrot.lane.b32.xlu1 %v2439_v52, %s3943_s14  ;;  %v1976_v21 = vadd.f32 %v4645_v61, %v1933_v2  ;;  %v1934_v57 = vmul.f32 %v4640_v56, %v1834_v39  ;;  %v2113_v2 = vld [vmem:[#allocation3] sm:$0xff] }
 0x206   : > { %v2014_v19 = vmax.f32 %v1978_v16, 0.0  ;;  %v1979_v22 = vadd.f32 %v4645_v61, %v1936_v17  ;;  %v4841_v25 = vpop.permute.xlu0 %2659 }
 0x207   : > { %v2012_v23 = vmax.f32 %v1976_v21, 0.0  ;;  %v1977_v34 = vadd.f32 %v4645_v61, %v1934_v57  ;;  %v4856_v45 = vpop.permute.xlu1 %2565  ;;  %v2145_v21 = vpack.c.bf16 %v2114_v46, %v2113_v2 }
 0x208   : > { %2050 = vst.msk [vmem:[#allocation3 + $0xd9] sm:$0xff] %vm1413_vm3, %v2014_v19  ;;  %v2015_v24 = vmax.f32 %v1979_v22, 0.0  ;;  %2623 = vrot.lane.b32.xlu0 %v2535_v15, %s3941_s12 }
 0x209   : > { %2717 = vrot.lane.b32.xlu1 %v2487_v9, %s3945_s22  ;;  %2048 = vst.msk [vmem:[#allocation3 + $0xc1] sm:$0xff] %vm1413_vm3, %v2012_v23  ;;  %v2013_v62 = vmax.f32 %v1977_v34, 0.0 }
 0x20a   : > { %2051 = vst.msk [vmem:[#allocation3 + $0xe1] sm:$0xff] %vm1413_vm3, %v2015_v24  ;;  %v4846_v26 = vpop.permute.xlu0 %2707 }
 0x20b   : > { %2049 = vst.msk [vmem:[#allocation3 + $0xc9] sm:$0xff] %vm1413_vm3, %v2013_v62  ;;  %v4860_v51 = vpop.permute.xlu1 %2613 }
 0x20c   : > { %2719 = vrot.lane.b32.xlu0 %v2488_v18, %s3945_s22 }
 0x20d   : > { %2765 = vrot.lane.b32.xlu1 %v2535_v15, %s3946_s9 }
 0x20e   : > { %v4852_v31 = vpop.permute.xlu0 %2755 }
 0x20f   : > { %v2417_v47 = vld [vmem:[#allocation3 + $0xd8] sm:$0xff] }
 0x210   : > { %2767 = vrot.lane.b32.xlu0 %v2536_v59, %s3946_s9  ;;  %v2415_v27 = vld [vmem:[#allocation3 + $0xc0] sm:$0xff] }
 0x211   : > { %2575 = vrot.lane.b32.xlu1 %v2487_v9, %s3939_s10  ;;  %v2463_v35 = vld [vmem:[#allocation3 + $0xc1] sm:$0xff]  ;;  %v2465_v59 = vld [vmem:[#allocation3 + $0xd9] sm:$0xff] }
 0x212   : > { %v2416_v10 = vld [vmem:[#allocation3 + $0xc8] sm:$0xff]  ;;  %v2564_v38 = vpop.permute.xlu0 %2563  ;;  %v2513_v41 = vld [vmem:[#allocation3 + $0xda] sm:$0xff] }
 0x213   : > { %v2441_v32 = vpack.c.bf16 %v2416_v10, %v2415_v27  ;;  %v2464_v30 = vld [vmem:[#allocation3 + $0xc9] sm:$0xff]  ;;  %v2418_v44 = vld [vmem:[#allocation3 + $0xe0] sm:$0xff]  ;;  %v2933_v22 = vsel %vm1413_vm3, %v2145_v21, %v2564_v38 }
 0x214   : > { %v2489_v13 = vpack.c.bf16 %v2464_v30, %v2463_v35  ;;  %v2511_v43 = vld [vmem:[#allocation3 + $0xc2] sm:$0xff]  ;;  %v2512_v36 = vld [vmem:[#allocation3 + $0xca] sm:$0xff]  ;;  %v2442_v49 = vpack.c.bf16 %v2418_v44, %v2417_v47  ;;  %v2936_v44 = vsel %vm1413_vm3, %v4685_v29, %v4856_v45 }
 0x215   : > { %2815 = vrot.lane.b32.xlu0 %v2441_v32, %s3948_s18  ;;  %2673 = vrot.lane.b32.xlu1 %v2441_v32, %s3943_s14  ;;  %v2537_v37 = vpack.c.bf16 %v2512_v36, %v2511_v43  ;;  %v2514_v42 = vld [vmem:[#allocation3 + $0xe2] sm:$0xff] }
 0x216   : > { %v2538_v48 = vpack.c.bf16 %v2514_v42, %v2513_v41  ;;  %v2466_v50 = vld [vmem:[#allocation3 + $0xe1] sm:$0xff]  ;;  %v2612_v54 = vpop.permute.xlu0 %2611 }
 0x217   : > { %v2490_v18 = vpack.c.bf16 %v2466_v50, %v2465_v59  ;;  %v2980_v27 = vsel %vm1487_vm5, %v2933_v22, %v2612_v54 }
 0x218   : > { %v3012_v30 = vsel %vm1561_vm7, %v2980_v27, %v4841_v25 }
 0x219   : > { %2863 = vrot.lane.b32.xlu0 %v2489_v13, %s3949_s21  ;;  %2721 = vrot.lane.b32.xlu1 %v2489_v13, %s3945_s22  ;;  %v3044_v41 = vsel %vm1635_vm9, %v3012_v30, %v4846_v26 }
 0x21a   : > { %v3077_v26 = vsel %vm3075_vm14, %v3044_v41, %v4852_v31 }
 0x21d   : > { %2911 = vrot.lane.b32.xlu0 %v2537_v37, %s3947_s17  ;;  %2769 = vrot.lane.b32.xlu1 %v2537_v37, %s3946_s9 }
 0x221   : > { %2913 = vrot.lane.b32.xlu0 %v2538_v48, %s3947_s17  ;;  %2817 = vrot.lane.b32.xlu1 %v2442_v49, %s3948_s18  ;;  %v3808_v53 = vpop.f32.mrb[20].mxu0 }
 0x222   : > { %v1939_v55 = vmul.f32 %v3808_v53, %v4640_v56  ;;  %v1847_v58 = vpop.f32.mrb[21].mxu0 }
 0x223   : > { %v1937_v1 = vmul.f32 %v4640_v56, %v1847_v58  ;;  %v3809_v3 = vpop.f32.mrb[22].mxu0 }
 0x224   : > { %v1982_v4 = vadd.f32 %v4645_v61, %v1939_v55  ;;  %v1940_v5 = vmul.f32 %v3809_v3, %v4640_v56  ;;  %v1850_v52 = vpop.f32.mrb[23].mxu0 }
 0x225   : > { %v1980_v6 = vadd.f32 %v4645_v61, %v1937_v1  ;;  %v1938_v8 = vmul.f32 %v4640_v56, %v1850_v52  ;;  %2865 = vrot.lane.b32.xlu1 %v2490_v18, %s3949_s21  ;;  %2627 = vrot.lane.b32.xlu0 %v2537_v37, %s3941_s12 }
 0x226   : > { %v2018_v9 = vmax.f32 %v1982_v4, 0.0  ;;  %v1983_v11 = vadd.f32 %v4645_v61, %v1940_v5  ;;  %v4873_v12 = vpop.permute.xlu0 %2901 }
 0x227   : > { %v4875_v7 = vpop.permute.xlu1 %2805  ;;  %v2016_v14 = vmax.f32 %v1980_v6, 0.0  ;;  %v1981_v33 = vadd.f32 %v4645_v61, %v1938_v8 }
 0x228   : > { %2054 = vst.msk [vmem:[#allocation3 + $0x109] sm:$0xff] %vm1413_vm3, %v2018_v9  ;;  %v2019_v15 = vmax.f32 %v1983_v11, 0.0 }
 0x229   : > { %2052 = vst.msk [vmem:[#allocation3 + $0xf1] sm:$0xff] %vm1413_vm3, %v2016_v14  ;;  %v2017_v16 = vmax.f32 %v1981_v33, 0.0  ;;  %2675 = vrot.lane.b32.xlu0 %v2442_v49, %s3943_s14  ;;  %2579 = vrot.lane.b32.xlu1 %v2489_v13, %s3939_s10 }
 0x22a   : > { %2055 = vst.msk [vmem:[#allocation3 + $0x111] sm:$0xff] %vm1413_vm3, %v2019_v15  ;;  %v4885_v39 = vpop.permute.xlu0 %2663 }
 0x22b   : > { %v4883_v17 = vpop.permute.xlu1 %2853  ;;  %2053 = vst.msk [vmem:[#allocation3 + $0xf9] sm:$0xff] %vm1413_vm3, %v2017_v16 }
 0x22d   : > { %2723 = vrot.lane.b32.xlu0 %v2490_v18, %s3945_s22  ;;  %2581 = vrot.lane.b32.xlu1 %v2490_v18, %s3939_s10 }
 0x22e   : > { %v4890_v57 = vpop.permute.xlu0 %2711 }
 0x22f   : > { %v4892_v19 = vpop.permute.xlu1 %2569  ;;  %v2421_v31 = vld [vmem:[#allocation3 + $0x108] sm:$0xff] }
 0x230   : > { %v2419_v24 = vld [vmem:[#allocation3 + $0xf0] sm:$0xff] }
 0x231   : > { %2771 = vrot.lane.b32.xlu0 %v2538_v48, %s3946_s9  ;;  %2629 = vrot.lane.b32.xlu1 %v2538_v48, %s3941_s12  ;;  %v2467_v43 = vld [vmem:[#allocation3 + $0xf1] sm:$0xff]  ;;  %v2982_v48 = vsel %vm1487_vm5, %v2936_v44, %v4860_v51 }
 0x232   : > { %v4897_v23 = vpop.permute.xlu0 %2759  ;;  %v2420_v62 = vld [vmem:[#allocation3 + $0xf8] sm:$0xff]  ;;  %v2517_v49 = vld [vmem:[#allocation3 + $0x10a] sm:$0xff] }
 0x233   : > { %v4899_v34 = vpop.permute.xlu1 %2617  ;;  %v4902_v10 = vpack.c.bf16 %v2420_v62, %v2419_v24  ;;  %v2468_v32 = vld [vmem:[#allocation3 + $0xf9] sm:$0xff]  ;;  %v2422_v53 = vld [vmem:[#allocation3 + $0x110] sm:$0xff] }
 0x234   : > { %v4910_v36 = vpack.c.bf16 %v2468_v32, %v2467_v43  ;;  %v2515_v37 = vld [vmem:[#allocation3 + $0xf2] sm:$0xff]  ;;  %v2516_v38 = vld [vmem:[#allocation3 + $0xfa] sm:$0xff]  ;;  %v4933_v18 = vpack.c.bf16 %v2422_v53, %v2421_v31 }
 0x235   : > { %2819 = vrot.lane.b32.xlu0 %v4902_v10, %s3948_s18  ;;  %2677 = vrot.lane.b32.xlu1 %v4902_v10, %s3943_s14  ;;  %v2539_v47 = vpack.c.bf16 %v2516_v38, %v2515_v37  ;;  %v2518_v50 = vld [vmem:[#allocation3 + $0x112] sm:$0xff] }
 0x236   : > { %v2804_v35 = vpop.permute.xlu0 %2803  ;;  %v2540_v3 = vpack.c.bf16 %v2518_v50, %v2517_v49  ;;  %v2470_v5 = vld [vmem:[#allocation3 + $0x111] sm:$0xff] }
 0x237   : > { %v2662_v13 = vpop.permute.xlu1 %2661  ;;  %v3110_v54 = vsel %vm3108_vm15, %v3077_v26, %v2804_v35 }
 0x238   : > { %v3014_v55 = vsel %vm1561_vm7, %v2982_v48, %v2662_v13 }
 0x239   : > { %2867 = vrot.lane.b32.xlu0 %v4910_v36, %s3949_s21  ;;  %2725 = vrot.lane.b32.xlu1 %v4910_v36, %s3945_s22 }
 0x23a   : > { %v2852_v42 = vpop.permute.xlu0 %2851 }
 0x23b   : > { %v2710_v25 = vpop.permute.xlu1 %2709  ;;  %v3143_v29 = vsel %vm3141_vm0, %v3110_v54, %v2852_v42 }
 0x23c   : > { %v3046_v45 = vsel %vm1635_vm9, %v3014_v55, %v2710_v25 }
 0x23d   : > { %2915 = vrot.lane.b32.xlu0 %v2539_v47, %s3947_s17  ;;  %2773 = vrot.lane.b32.xlu1 %v2539_v47, %s3946_s9 }
 0x23e   : > { %v2900_v51 = vpop.permute.xlu0 %2899 }
 0x23f   : > { %v2758_v58 = vpop.permute.xlu1 %2757  ;;  %v3176_v1 = vsel %vm3174_vm1, %v3143_v29, %v2900_v51 }
 0x240   : > { %v3079_v59 = vsel %vm3075_vm14, %v3046_v45, %v2758_v58  ;;  %3832 = vmatprep.mubr.msk.bf16.mxu1 %vm3243_vm2, %v3176_v1  ;;  %v2942_v58 = vsel %vm1413_vm3, %v4730_v40, %v4892_v19 }
 0x241   : > { %v3112_v4 = vsel %vm3108_vm15, %v3079_v59, %v4875_v7  ;;  %2917 = vrot.lane.b32.xlu0 %v2540_v3, %s3947_s17  ;;  %2821 = vrot.lane.b32.xlu1 %v4933_v18, %s3948_s18  ;;  %v3812_v52 = vpop.f32.mrb[24].mxu0  ;;  %v2469_v7 = vld [vmem:[#allocation3 + $0x109] sm:$0xff]  ;;  %v2986_v31 = vsel %vm1487_vm5, %v2942_v58, %v4899_v34 }
 0x242   : > { %v3145_v6 = vsel %vm3141_vm0, %v3112_v4, %v4883_v17  ;;  %v1943_v8 = vmul.f32 %v3812_v52, %v4640_v56  ;;  %v2616_v9 = vpop.permute.xlu0 %2615  ;;  %v1863_v33 = vpop.f32.mrb[25].mxu0  ;;  %v2492_v15 = vpack.c.bf16 %v2470_v5, %v2469_v7 }
 0x243   : > { %v2568_v11 = vpop.permute.xlu1 %2567  ;;  %v3178_v14 = vsel %vm3174_vm1, %v3145_v6, %v4873_v12  ;;  %v1941_v46 = vmul.f32 %v4640_v56, %v1863_v33  ;;  %v3813_v16 = vpop.f32.mrb[26].mxu0 }
 0x244   : > { %3833 = vmatmul.mubr.msk.bf16.vlgmr.msra.gmra.mrb[0].mxu1 %vm3243_vm2, %v3178_v14  ;;  %v1986_v2 = vadd.f32 %v4645_v61, %v1943_v8  ;;  %v1944_v21 = vmul.f32 %v3813_v16, %v4640_v56  ;;  %v1866_v17 = vpop.f32.mrb[27].mxu0 }
 0x245   : > { %2869 = vrot.lane.b32.xlu1 %v2492_v15, %s3949_s21  ;;  %2631 = vrot.lane.b32.xlu0 %v2539_v47, %s3941_s12  ;;  %v1984_v12 = vadd.f32 %v4645_v61, %v1941_v46  ;;  %v1942_v24 = vmul.f32 %v4640_v56, %v1866_v17  ;;  %v5025_v46 = vld [vmem:[%s5406_s2] ss:$0 sm:$0xff] }
 0x246   : > { %v2022_v22 = vmax.f32 %v1986_v2, 0.0  ;;  %v4954_v62 = vpop.permute.xlu0 %2905  ;;  %v1987_v32 = vadd.f32 %v4645_v61, %v1944_v21 }
 0x247   : > { %v2810_v27 = vpop.permute.xlu1 %2809  ;;  %v2020_v30 = vmax.f32 %v1984_v12, 0.0  ;;  %v1985_v35 = vadd.f32 %v4645_v61, %v1942_v24 }
 0x248   : > { %2058 = vst.msk [vmem:[#allocation3 + $0x139] sm:$0xff] %vm1413_vm3, %v2022_v22  ;;  %v2023_v13 = vmax.f32 %v1987_v32, 0.0 }
 0x249   : > { %2679 = vrot.lane.b32.xlu0 %v4933_v18, %s3943_s14  ;;  %2583 = vrot.lane.b32.xlu1 %v4910_v36, %s3939_s10  ;;  %2056 = vst.msk [vmem:[#allocation3 + $0x121] sm:$0xff] %vm1413_vm3, %v2020_v30  ;;  %v2021_v56 = vmax.f32 %v1985_v35, 0.0  ;;  %v2939_v36 = vsel %vm1413_vm3, %v4755_v60, %v2568_v11 }
 0x24a   : > { %v4964_v37 = vpop.permute.xlu0 %2667  ;;  %2059 = vst.msk [vmem:[#allocation3 + $0x141] sm:$0xff] %vm1413_vm3, %v2023_v13  ;;  %v2984_v25 = vsel %vm1487_vm5, %v2939_v36, %v2616_v9 }
 0x24b   : > { %v2858_v43 = vpop.permute.xlu1 %2857  ;;  %2057 = vst.msk [vmem:[#allocation3 + $0x129] sm:$0xff] %vm1413_vm3, %v2021_v56  ;;  %v3016_v49 = vsel %vm1561_vm7, %v2984_v25, %v4885_v39 }
 0x24c   : > { %v3048_v55 = vsel %vm1635_vm9, %v3016_v49, %v4890_v57 }
 0x24d   : > { %2727 = vrot.lane.b32.xlu0 %v2492_v15, %s3945_s22  ;;  %2585 = vrot.lane.b32.xlu1 %v2492_v15, %s3939_s10  ;;  %v3081_v57 = vsel %vm3075_vm14, %v3048_v55, %v4897_v23 }
 0x24e   : > { %v4970_v61 = vpop.permute.xlu0 %2715 }
 0x24f   : > { %v4972_v38 = vpop.permute.xlu1 %2573  ;;  %v2425_v9 = vld [vmem:[#allocation3 + $0x138] sm:$0xff] }
 0x250   : > { %v2423_v44 = vld [vmem:[#allocation3 + $0x120] sm:$0xff] }
 0x251   : > { %2775 = vrot.lane.b32.xlu0 %v2540_v3, %s3946_s9  ;;  %2633 = vrot.lane.b32.xlu1 %v2540_v3, %s3941_s12  ;;  %v2471_v53 = vld [vmem:[#allocation3 + $0x121] sm:$0xff]  ;;  %v2473_v24 = vld [vmem:[#allocation3 + $0x139] sm:$0xff] }
 0x252   : > { %v4978_v41 = vpop.permute.xlu0 %2763  ;;  %v2424_v47 = vld [vmem:[#allocation3 + $0x128] sm:$0xff]  ;;  %v2521_v4 = vld [vmem:[#allocation3 + $0x13a] sm:$0xff] }
 0x253   : > { %v4980_v42 = vpop.permute.xlu1 %2621  ;;  %v4983_v48 = vpack.c.bf16 %v2424_v47, %v2423_v44  ;;  %v2472_v26 = vld [vmem:[#allocation3 + $0x129] sm:$0xff]  ;;  %v2426_v52 = vld [vmem:[#allocation3 + $0x140] sm:$0xff] }
 0x254   : > { %v4991_v54 = vpack.c.bf16 %v2472_v26, %v2471_v53  ;;  %v2519_v29 = vld [vmem:[#allocation3 + $0x122] sm:$0xff]  ;;  %v2520_v45 = vld [vmem:[#allocation3 + $0x12a] sm:$0xff]  ;;  %v5016_v7 = vpack.c.bf16 %v2426_v52, %v2425_v9 }
 0x255   : > { %2823 = vrot.lane.b32.xlu0 %v4983_v48, %s3948_s18  ;;  %2681 = vrot.lane.b32.xlu1 %v4983_v48, %s3943_s14  ;;  %v2541_v59 = vpack.c.bf16 %v2520_v45, %v2519_v29  ;;  %v2522_v5 = vld [vmem:[#allocation3 + $0x142] sm:$0xff] }
 0x256   : > { %v2808_v60 = vpop.permute.xlu0 %2807  ;;  %v2542_v14 = vpack.c.bf16 %v2522_v5, %v2521_v4  ;;  %v2474_v2 = vld [vmem:[#allocation3 + $0x141] sm:$0xff] }
 0x257   : > { %v2666_v50 = vpop.permute.xlu1 %2665  ;;  %v3114_v1 = vsel %vm3108_vm15, %v3081_v57, %v2808_v60  ;;  %v2494_v13 = vpack.c.bf16 %v2474_v2, %v2473_v24  ;;  %v2126_v24 = vld [vmem:[#allocation3 + $0x98] sm:$0xff] }
 0x258   : > { %v3018_v3 = vsel %vm1561_vm7, %v2986_v31, %v2666_v50 }
 0x259   : > { %2871 = vrot.lane.b32.xlu0 %v4991_v54, %s3949_s21  ;;  %2729 = vrot.lane.b32.xlu1 %v4991_v54, %s3945_s22 }
 0x25a   : > { %v2856_v39 = vpop.permute.xlu0 %2855 }
 0x25b   : > { %v2714_v51 = vpop.permute.xlu1 %2713  ;;  %v3147_v6 = vsel %vm3141_vm0, %v3114_v1, %v2856_v39 }
 0x25c   : > { %v3050_v8 = vsel %vm1635_vm9, %v3018_v3, %v2714_v51 }
 0x25d   : > { %2919 = vrot.lane.b32.xlu0 %v2541_v59, %s3947_s17  ;;  %2777 = vrot.lane.b32.xlu1 %v2541_v59, %s3946_s9 }
 0x25e   : > { %v2904_v40 = vpop.permute.xlu0 %2903 }
 0x25f   : > { %v2762_v19 = vpop.permute.xlu1 %2761  ;;  %v3180_v23 = vsel %vm3174_vm1, %v3147_v6, %v2904_v40 }
 0x260   : > { %v3083_v34 = vsel %vm3075_vm14, %v3050_v8, %v2762_v19  ;;  %3836 = vmatprep.mubr.msk.bf16.mxu1 %vm3243_vm2, %v3180_v23 }
 0x261   : > { %v3116_v11 = vsel %vm3108_vm15, %v3083_v34, %v2810_v27  ;;  %v3816_v33 = vpop.f32.mrb[28].mxu0  ;;  %2921 = vrot.lane.b32.xlu0 %v2542_v14, %s3947_s17  ;;  %2825 = vrot.lane.b32.xlu1 %v5016_v7, %s3948_s18  ;;  %v5034_v27 = vld [vmem:[%s5407_s3] ss:$0 sm:$0xff] }
 0x262   : > { %v3149_v15 = vsel %vm3141_vm0, %v3116_v11, %v2858_v43  ;;  %v1947_v16 = vmul.f32 %v5025_v46, %v3816_v33  ;;  %v2620_v21 = vpop.permute.xlu0 %2619  ;;  %v1879_v12 = vpop.f32.mrb[29].mxu0  ;;  %v2948_v11 = vsel %vm1413_vm3, %v4778_v20, %v4972_v38 }
 0x263   : > { %v2572_v17 = vpop.permute.xlu1 %2571  ;;  %v3182_v22 = vsel %vm3174_vm1, %v3149_v15, %v4954_v62  ;;  %v1945_v30 = vmul.f32 %v5025_v46, %v1879_v12  ;;  %v3817_v35 = vpop.f32.mrb[30].mxu0 }
 0x264   : > { %3837 = vmatmul.mubr.msk.bf16.gmra.mrb[4].mxu1 %vm3243_vm2, %v3182_v22  ;;  %v1990_v32 = vadd.f32 %v5034_v27, %v1947_v16  ;;  %v1948_v56 = vmul.f32 %v5025_v46, %v3817_v35  ;;  %v1882_v43 = vpop.f32.mrb[31].mxu0  ;;  %v2945_v49 = vsel %vm1413_vm3, %v4791_v28, %v2572_v17 }
 0x265   : > { %v1988_v62 = vadd.f32 %v5034_v27, %v1945_v30  ;;  %v1946_v25 = vmul.f32 %v5025_v46, %v1882_v43  ;;  %2873 = vrot.lane.b32.xlu1 %v2494_v13, %s3949_s21  ;;  %2635 = vrot.lane.b32.xlu0 %v2541_v59, %s3941_s12  ;;  %v2988_v39 = vsel %vm1487_vm5, %v2945_v49, %v2620_v21  ;;  %v2125_v43 = vld [vmem:[#allocation3 + $0x90] sm:$0xff] }
 0x266   : > { %v2026_v36 = vmax.f32 %v1990_v32, 0.0  ;;  %v5043_v44 = vpop.permute.xlu0 %2909  ;;  %v1991_v26 = vadd.f32 %v5034_v27, %v1948_v56  ;;  %v3020_v28 = vsel %vm1561_vm7, %v2988_v39, %v4964_v37 }
 0x267   : > { %v5045_v47 = vpop.permute.xlu1 %2813  ;;  %v2024_v60 = vmax.f32 %v1988_v62, 0.0  ;;  %v1989_v50 = vadd.f32 %v5034_v27, %v1946_v25  ;;  %v2151_v25 = vpack.c.bf16 %v2126_v24, %v2125_v43 }
 0x268   : > { %2062 = vst.msk [vmem:[#allocation3 + $0x169] sm:$0xff] %vm1413_vm3, %v2026_v36  ;;  %v2027_v53 = vmax.f32 %v1991_v26, 0.0 }
 0x269   : > { %2060 = vst.msk [vmem:[#allocation3 + $0x151] sm:$0xff] %vm1413_vm3, %v2024_v60  ;;  %v2025_v55 = vmax.f32 %v1989_v50, 0.0  ;;  %2683 = vrot.lane.b32.xlu0 %v5016_v7, %s3943_s14  ;;  %2587 = vrot.lane.b32.xlu1 %v4991_v54, %s3939_s10  ;;  %v3052_v54 = vsel %vm1635_vm9, %v3020_v28, %v4970_v61 }
 0x26a   : > { %v5057_v45 = vpop.permute.xlu0 %2671  ;;  %2063 = vst.msk [vmem:[#allocation3 + $0x171] sm:$0xff] %vm1413_vm3, %v2027_v53  ;;  %v3085_v37 = vsel %vm3075_vm14, %v3052_v54, %v4978_v41 }
 0x26b   : > { %v2862_v29 = vpop.permute.xlu1 %2861  ;;  %2061 = vst.msk [vmem:[#allocation3 + $0x159] sm:$0xff] %vm1413_vm3, %v2025_v55 }
 0x26d   : > { %2731 = vrot.lane.b32.xlu0 %v2494_v13, %s3945_s22  ;;  %2589 = vrot.lane.b32.xlu1 %v2494_v13, %s3939_s10 }
 0x26e   : > { %v2812_v58 = vpop.permute.xlu0 %2811 }
 0x26f   : > { %v5066_v51 = vpop.permute.xlu1 %2577  ;;  %v3118_v4 = vsel %vm3108_vm15, %v3085_v37, %v2812_v58  ;;  %v2429_v32 = vld [vmem:[#allocation3 + $0x168] sm:$0xff] }
 0x270   : > { %v2427_v59 = vld [vmem:[#allocation3 + $0x150] sm:$0xff] }
 0x271   : > { %2779 = vrot.lane.b32.xlu0 %v2542_v14, %s3946_s9  ;;  %2637 = vrot.lane.b32.xlu1 %v2542_v14, %s3941_s12  ;;  %v2475_v40 = vld [vmem:[#allocation3 + $0x151] sm:$0xff]  ;;  %v2990_v14 = vsel %vm1487_vm5, %v2948_v11, %v4980_v42  ;;  %v2477_v58 = vld [vmem:[#allocation3 + $0x169] sm:$0xff] }
 0x272   : > { %v2860_v57 = vpop.permute.xlu0 %2859  ;;  %v2428_v1 = vld [vmem:[#allocation3 + $0x158] sm:$0xff]  ;;  %v2525_v2 = vld [vmem:[#allocation3 + $0x16a] sm:$0xff] }
 0x273   : > { %v5072_v31 = vpop.permute.xlu1 %2625  ;;  %v5076_v3 = vpack.c.bf16 %v2428_v1, %v2427_v59  ;;  %v2476_v5 = vld [vmem:[#allocation3 + $0x159] sm:$0xff]  ;;  %v3151_v52 = vsel %vm3141_vm0, %v3118_v4, %v2860_v57  ;;  %v2430_v21 = vld [vmem:[#allocation3 + $0x170] sm:$0xff] }
 0x274   : > { %v5086_v41 = vpack.c.bf16 %v2476_v5, %v2475_v40  ;;  %v2523_v19 = vld [vmem:[#allocation3 + $0x152] sm:$0xff]  ;;  %v2524_v23 = vld [vmem:[#allocation3 + $0x15a] sm:$0xff]  ;;  %v5105_v56 = vpack.c.bf16 %v2430_v21, %v2429_v32 }
 0x275   : > { %2827 = vrot.lane.b32.xlu0 %v5076_v3, %s3948_s18  ;;  %2685 = vrot.lane.b32.xlu1 %v5076_v3, %s3943_s14  ;;  %v2543_v33 = vpack.c.bf16 %v2524_v23, %v2523_v19  ;;  %v2526_v16 = vld [vmem:[#allocation3 + $0x172] sm:$0xff] }
 0x276   : > { %v2908_v61 = vpop.permute.xlu0 %2907  ;;  %v2544_v13 = vpack.c.bf16 %v2526_v16, %v2525_v2  ;;  %v2478_v49 = vld [vmem:[#allocation3 + $0x171] sm:$0xff] }
 0x277   : > { %v2670_v6 = vpop.permute.xlu1 %2669  ;;  %v3184_v8 = vsel %vm3174_vm1, %v3151_v52, %v2908_v61  ;;  %v2496_v1 = vpack.c.bf16 %v2478_v49, %v2477_v58 }
 0x278   : > { %3840 = vmatprep.mubr.msk.bf16.mxu1 %vm3243_vm2, %v3184_v8  ;;  %v3022_v15 = vsel %vm1561_vm7, %v2990_v14, %v2670_v6 }
 0x279   : > { %2875 = vrot.lane.b32.xlu0 %v5086_v41, %s3949_s21  ;;  %2733 = vrot.lane.b32.xlu1 %v5086_v41, %s3945_s22 }
 0x27a   : > { %v2624_v9 = vpop.permute.xlu0 %2623 }
 0x27b   : > { %v2718_v34 = vpop.permute.xlu1 %2717 }
 0x27c   : > { %v3054_v17 = vsel %vm1635_vm9, %v3022_v15, %v2718_v34 }
 0x27d   : > { %2923 = vrot.lane.b32.xlu0 %v2543_v33, %s3947_s17  ;;  %2781 = vrot.lane.b32.xlu1 %v2543_v33, %s3946_s9 }
 0x27e   : > { %v2720_v12 = vpop.permute.xlu0 %2719 }
 0x27f   : > { %v2766_v22 = vpop.permute.xlu1 %2765 }
 0x280   : > { %v3087_v20 = vsel %vm3075_vm14, %v3054_v17, %v2766_v22 }
 0x281   : > { %v3120_v42 = vsel %vm3108_vm15, %v3087_v20, %v5045_v47  ;;  %2925 = vrot.lane.b32.xlu0 %v2544_v13, %s3947_s17  ;;  %2829 = vrot.lane.b32.xlu1 %v5105_v56, %s3948_s18 }
 0x282   : > { %v3153_v26 = vsel %vm3141_vm0, %v3120_v42, %v2862_v29  ;;  %v2768_v53 = vpop.permute.xlu0 %2767 }
 0x283   : > { %v3186_v55 = vsel %vm3174_vm1, %v3153_v26, %v5043_v44  ;;  %v2576_v29 = vpop.permute.xlu1 %2575 }
 0x284   : > { %v3820_v38 = vpop.f32.mrb[32].mxu0  ;;  %3841 = vmatmul.mubr.msk.bf16.gmra.mrb[8].mxu1 %vm3243_vm2, %v3186_v55  ;;  %v2951_v59 = vsel %vm1413_vm3, %v2151_v25, %v2576_v29  ;;  %v2130_v25 = vld [vmem:[#allocation3 + $0xc8] sm:$0xff] }
 0x285   : > { %v1951_v30 = vmul.f32 %v5025_v46, %v3820_v38  ;;  %v1895_v35 = vpop.f32.mrb[33].mxu0  ;;  %v2992_v5 = vsel %vm1487_vm5, %v2951_v59, %v2624_v9  ;;  %2877 = vrot.lane.b32.xlu1 %v2496_v1, %s3949_s21  ;;  %2639 = vrot.lane.b32.xlu0 %v2543_v33, %s3941_s12 }
 0x286   : > { %v1949_v36 = vmul.f32 %v5025_v46, %v1895_v35  ;;  %v3821_v62 = vpop.f32.mrb[34].mxu0 }
 0x287   : > { %v1994_v60 = vadd.f32 %v5034_v27, %v1951_v30  ;;  %v1952_v50 = vmul.f32 %v5025_v46, %v3821_v62  ;;  %v1898_v47 = vpop.f32.mrb[35].mxu0  ;;  %v2816_v61 = vpop.permute.xlu0 %2815 }
 0x288   : > { %v1992_v39 = vadd.f32 %v5034_v27, %v1949_v36  ;;  %v1950_v28 = vmul.f32 %v5025_v46, %v1898_v47  ;;  %v3024_v46 = vsel %vm1561_vm7, %v2992_v5, %v5057_v45 }
 0x289   : > { %v2030_v54 = vmax.f32 %v1994_v60, 0.0  ;;  %v1995_v57 = vadd.f32 %v5034_v27, %v1952_v50  ;;  %v3056_v6 = vsel %vm1635_vm9, %v3024_v46, %v2720_v12  ;;  %2687 = vrot.lane.b32.xlu0 %v5105_v56, %s3943_s14  ;;  %2591 = vrot.lane.b32.xlu1 %v5086_v41, %s3939_s10  ;;  %v2954_v41 = vsel %vm1413_vm3, %v4814_v63, %v5066_v51 }
 0x28a   : > { %v2028_v37 = vmax.f32 %v1992_v39, 0.0  ;;  %v1993_v4 = vadd.f32 %v5034_v27, %v1950_v28  ;;  %v2674_v27 = vpop.permute.xlu1 %2673  ;;  %v3089_v45 = vsel %vm3075_vm14, %v3056_v6, %v2768_v53  ;;  %v2994_v14 = vsel %vm1487_vm5, %v2954_v41, %v5072_v31  ;;  %v2129_v53 = vld [vmem:[#allocation3 + $0xc0] sm:$0xff] }
 0x28b   : > { %2066 = vst.msk [vmem:[#allocation3 + $0x199] sm:$0xff] %vm1413_vm3, %v2030_v54  ;;  %v2031_v44 = vmax.f32 %v1995_v57, 0.0  ;;  %v2864_v8 = vpop.permute.xlu0 %2863  ;;  %v3122_v19 = vsel %vm3108_vm15, %v3089_v45, %v2816_v61  ;;  %v3026_v16 = vsel %vm1561_vm7, %v2994_v14, %v2674_v27  ;;  %v2153_v55 = vpack.c.bf16 %v2130_v25, %v2129_v53  ;;  %v2132_v61 = vld [vmem:[#allocation3 + $0xe0] sm:$0xff]  ;;  %v2131_v45 = vld [vmem:[#allocation3 + $0xd8] sm:$0xff] }
 0x28c   : > { %2110 = vst.msk [vmem:[#allocation3 + $0x198] sm:$0xff] %vm1413_vm3, %v3937_v0  ;;  %2064 = vst.msk [vmem:[#allocation3 + $0x181] sm:$0xff] %vm1413_vm3, %v2028_v37  ;;  %v2029_v52 = vmax.f32 %v1993_v4, 0.0 }
 0x28d   : > { %2067 = vst.msk [vmem:[#allocation3 + $0x1a1] sm:$0xff] %vm1413_vm3, %v2031_v44  ;;  %2735 = vrot.lane.b32.xlu0 %v2496_v1, %s3945_s22  ;;  %2593 = vrot.lane.b32.xlu1 %v2496_v1, %s3939_s10 }
 0x28e   : > { %2111 = vst.msk [vmem:[#allocation3 + $0x1a0] sm:$0xff] %vm1413_vm3, %v3937_v0  ;;  %2065 = vst.msk [vmem:[#allocation3 + $0x189] sm:$0xff] %vm1413_vm3, %v2029_v52  ;;  %v2722_v40 = vpop.permute.xlu1 %2721 }
 0x28f   : > { %2112 = vst.msk [vmem:[#allocation3 + $0x1a8] sm:$0x3] %vm2107_vm12, %v3937_v0  ;;  %v3155_v0 = vsel %vm3141_vm0, %v3122_v19, %v2864_v8  ;;  %v2912_v23 = vpop.permute.xlu0 %2911  ;;  %v3058_v17 = vsel %vm1635_vm9, %v3026_v16, %v2722_v40 }
 0x290   : > { %v3188_v9 = vsel %vm3174_vm1, %v3155_v0, %v2912_v23  ;;  %v2154_v0 = vpack.c.bf16 %v2132_v61, %v2131_v45 }
 0x291   : > { %3844 = vmatprep.mubr.msk.bf16.mxu1 %vm3243_vm2, %v3188_v9  ;;  %2783 = vrot.lane.b32.xlu0 %v2544_v13, %s3946_s9 }
 0x292   : > { %v2770_v34 = vpop.permute.xlu1 %2769  ;;  %2641 = vrot.lane.b32.xlu1 %v2544_v13, %s3941_s12 }
 0x293   : > { %v2914_v33 = vpop.permute.xlu0 %2913  ;;  %v2431_v2 = vld [vmem:[#allocation3 + $0x180] sm:$0xff]  ;;  %v3091_v12 = vsel %vm3075_vm14, %v3058_v17, %v2770_v34  ;;  %v2433_v43 = vld [vmem:[#allocation3 + $0x198] sm:$0xff] }
 0x294   : > { %v2479_v31 = vld [vmem:[#allocation3 + $0x181] sm:$0xff] }
 0x295   : > { %v2432_v11 = vld [vmem:[#allocation3 + $0x188] sm:$0xff]  ;;  %v2434_v36 = vld [vmem:[#allocation3 + $0x1a0] sm:$0xff] }
 0x296   : > { %v2818_v15 = vpop.permute.xlu1 %2817  ;;  %v2449_v21 = vpack.c.bf16 %v2432_v11, %v2431_v2  ;;  %v2480_v22 = vld [vmem:[#allocation3 + $0x189] sm:$0xff]  ;;  %v2450_v26 = vpack.c.bf16 %v2434_v36, %v2433_v43  ;;  %v2481_v50 = vld [vmem:[#allocation3 + $0x199] sm:$0xff]  ;;  %v2482_v47 = vld [vmem:[#allocation3 + $0x1a1] sm:$0xff] }
 0x297   : > { %v3124_v63 = vsel %vm3108_vm15, %v3091_v12, %v2818_v15  ;;  %v2628_v24 = vpop.permute.xlu0 %2627  ;;  %v2497_v38 = vpack.c.bf16 %v2480_v22, %v2479_v31  ;;  %v2527_v42 = vld [vmem:[#allocation3 + $0x182] sm:$0xff]  ;;  %v2528_v30 = vld [vmem:[#allocation3 + $0x18a] sm:$0xff]  ;;  %v2498_v39 = vpack.c.bf16 %v2482_v47, %v2481_v50  ;;  %v2529_v54 = vld [vmem:[#allocation3 + $0x19a] sm:$0xff] }
 0x298   : > { %2831 = vrot.lane.b32.xlu0 %v2449_v21, %s3948_s18  ;;  %2689 = vrot.lane.b32.xlu1 %v2449_v21, %s3943_s14  ;;  %v2545_v62 = vpack.c.bf16 %v2528_v30, %v2527_v42  ;;  %v2530_v57 = vld [vmem:[#allocation3 + $0x1a2] sm:$0xff] }
 0x299   : > { %v2546_v1 = vpack.c.bf16 %v2530_v57, %v2529_v54 }
 0x29a   : > { %v2866_v51 = vpop.permute.xlu1 %2865 }
 0x29b   : > { %v3157_v20 = vsel %vm3141_vm0, %v3124_v63, %v2866_v51  ;;  %v2676_v35 = vpop.permute.xlu0 %2675 }
 0x29c   : > { %v3190_v32 = vsel %vm3174_vm1, %v3157_v20, %v2914_v33  ;;  %2879 = vrot.lane.b32.xlu0 %v2497_v38, %s3949_s21  ;;  %2737 = vrot.lane.b32.xlu1 %v2497_v38, %s3945_s22 }
 0x29d   : > { %3845 = vmatmul.mubr.msk.bf16.gmra.mrb[12].mxu1 %vm3243_vm2, %v3190_v32 }
 0x29e   : > { %v2580_v13 = vpop.permute.xlu1 %2579 }
 0x29f   : > { %v2724_v49 = vpop.permute.xlu0 %2723  ;;  %v2957_v28 = vsel %vm1413_vm3, %v2153_v55, %v2580_v13 }
 0x2a0   : > { %2927 = vrot.lane.b32.xlu0 %v2545_v62, %s3947_s17  ;;  %2785 = vrot.lane.b32.xlu1 %v2545_v62, %s3946_s9  ;;  %v2996_v59 = vsel %vm1487_vm5, %v2957_v28, %v2628_v24 }
 0x2a1   : > { %v3028_v5 = vsel %vm1561_vm7, %v2996_v59, %v2676_v35 }
 0x2a2   : > { %v2582_v60 = vpop.permute.xlu1 %2581  ;;  %v3060_v52 = vsel %vm1635_vm9, %v3028_v5, %v2724_v49 }
 0x2a3   : > { %v2772_v29 = vpop.permute.xlu0 %2771  ;;  %v2960_v34 = vsel %vm1413_vm3, %v2154_v0, %v2582_v60 }
 0x2a4   : > { %2833 = vrot.lane.b32.xlu1 %v2450_v26, %s3948_s18  ;;  %v3093_v27 = vsel %vm3075_vm14, %v3060_v52, %v2772_v29  ;;  %s5265_s18 = scalar_lea.vmem %s5411_s7, %s3736_s28 }
 0x2a6   : > { %v2630_v58 = vpop.permute.xlu1 %2629 }
 0x2a7   : > { %v2820_v37 = vpop.permute.xlu0 %2819  ;;  %v2998_v9 = vsel %vm1487_vm5, %v2960_v34, %v2630_v58 }
 0x2a8   : > { %2881 = vrot.lane.b32.xlu1 %v2498_v39, %s3949_s21  ;;  %v3126_v6 = vsel %vm3108_vm15, %v3093_v27, %v2820_v37 }
 0x2aa   : > { %v2678_v4 = vpop.permute.xlu1 %2677 }
 0x2ab   : > { %v2868_v44 = vpop.permute.xlu0 %2867  ;;  %v3030_v14 = vsel %vm1561_vm7, %v2998_v9, %v2678_v4 }
 0x2ac   : > { %2929 = vrot.lane.b32.xlu1 %v2546_v1, %s3947_s17  ;;  %v3159_v8 = vsel %vm3141_vm0, %v3126_v6, %v2868_v44 }
 0x2ae   : > { %v2726_v46 = vpop.permute.xlu1 %2725 }
 0x2af   : > { %v2916_v40 = vpop.permute.xlu0 %2915  ;;  %v3062_v33 = vsel %vm1635_vm9, %v3030_v14, %v2726_v46 }
 0x2b0   : > { %v3192_v23 = vsel %vm3174_vm1, %v3159_v8, %v2916_v40 }
 0x2b1   : > { %3848 = vmatprep.mubr.msk.bf16.mxu1 %vm3243_vm2, %v3192_v23 }
 0x2b2   : > { %v2774_v19 = vpop.permute.xlu1 %2773 }
 0x2b3   : > { %v2918_v11 = vpop.permute.xlu0 %2917  ;;  %v3095_v15 = vsel %vm3075_vm14, %v3062_v33, %v2774_v19 }
 0x2b6   : > { %v2822_v41 = vpop.permute.xlu1 %2821 }
 0x2b7   : > { %v3128_v2 = vsel %vm3108_vm15, %v3095_v15, %v2822_v41  ;;  %v2632_v21 = vpop.permute.xlu0 %2631 }
 0x2ba   : > { %v2870_v16 = vpop.permute.xlu1 %2869 }
 0x2bb   : > { %v3161_v17 = vsel %vm3141_vm0, %v3128_v2, %v2870_v16  ;;  %v2680_v12 = vpop.permute.xlu0 %2679 }
 0x2bc   : > { %v3194_v22 = vsel %vm3174_vm1, %v3161_v17, %v2918_v11 }
 0x2bd   : > { %3849 = vmatmul.mubr.msk.bf16.gmra.mrb[16].mxu1 %vm3243_vm2, %v3194_v22 }
 0x2be   : > { %v2584_v63 = vpop.permute.xlu1 %2583 }
 0x2bf   : > { %v2728_v51 = vpop.permute.xlu0 %2727  ;;  %v2963_v38 = vsel %vm1413_vm3, %v4902_v10, %v2584_v63 }
 0x2c0   : > { %v3000_v32 = vsel %vm1487_vm5, %v2963_v38, %v2632_v21 }
 0x2c1   : > { %v3032_v35 = vsel %vm1561_vm7, %v3000_v32, %v2680_v12 }
 0x2c2   : > { %v2586_v24 = vpop.permute.xlu1 %2585  ;;  %v3064_v36 = vsel %vm1635_vm9, %v3032_v35, %v2728_v51 }
 0x2c3   : > { %v2776_v31 = vpop.permute.xlu0 %2775  ;;  %v2966_v50 = vsel %vm1413_vm3, %v4933_v18, %v2586_v24 }
 0x2c4   : > { %v3097_v62 = vsel %vm3075_vm14, %v3064_v36, %v2776_v31 }
 0x2c6   : > { %v2634_v20 = vpop.permute.xlu1 %2633 }
 0x2c7   : > { %v2824_v42 = vpop.permute.xlu0 %2823  ;;  %v3002_v47 = vsel %vm1487_vm5, %v2966_v50, %v2634_v20 }
 0x2c8   : > { %v3130_v25 = vsel %vm3108_vm15, %v3097_v62, %v2824_v42 }
 0x2ca   : > { %v2682_v30 = vpop.permute.xlu1 %2681 }
 0x2cb   : > { %v2872_v13 = vpop.permute.xlu0 %2871  ;;  %v3034_v39 = vsel %vm1561_vm7, %v3002_v47, %v2682_v30 }
 0x2cc   : > { %v3163_v26 = vsel %vm3141_vm0, %v3130_v25, %v2872_v13 }
 0x2ce   : > { %v2730_v43 = vpop.permute.xlu1 %2729 }
 0x2cf   : > { %v2920_v49 = vpop.permute.xlu0 %2919  ;;  %v3066_v28 = vsel %vm1635_vm9, %v3034_v39, %v2730_v43 }
 0x2d0   : > { %v3196_v10 = vsel %vm3174_vm1, %v3163_v26, %v2920_v49 }
 0x2d1   : > { %3852 = vmatprep.mubr.msk.bf16.mxu1 %vm3243_vm2, %v3196_v10 }
 0x2d2   : > { %v2778_v60 = vpop.permute.xlu1 %2777 }
 0x2d3   : > { %v2922_v53 = vpop.permute.xlu0 %2921  ;;  %v3099_v29 = vsel %vm3075_vm14, %v3066_v28, %v2778_v60  ;;  %v5250_v28 = vld [vmem:[%s5410_s6] ss:$0 sm:$0xff] }
 0x2d6   : > { %v2826_v55 = vpop.permute.xlu1 %2825 }
 0x2d7   : > { %v3132_v58 = vsel %vm3108_vm15, %v3099_v29, %v2826_v55  ;;  %v2636_v57 = vpop.permute.xlu0 %2635 }
 0x2da   : > { %v2874_v54 = vpop.permute.xlu1 %2873 }
 0x2db   : > { %v3165_v59 = vsel %vm3141_vm0, %v3132_v58, %v2874_v54  ;;  %v2684_v18 = vpop.permute.xlu0 %2683 }
 0x2dc   : > { %v3198_v1 = vsel %vm3174_vm1, %v3165_v59, %v2922_v53  ;;  %v5243_v53 = vld [vmem:[%s5409_s5] ss:$0 sm:$0xff] }
 0x2dd   : > { %3853 = vmatmul.mubr.msk.bf16.gmra.mrb[20].mxu1 %vm3243_vm2, %v3198_v1 }
 0x2de   : > { %v2588_v37 = vpop.permute.xlu1 %2587 }
 0x2df   : > { %v2732_v4 = vpop.permute.xlu0 %2731  ;;  %v2969_v44 = vsel %vm1413_vm3, %v4983_v48, %v2588_v37 }
 0x2e0   : > { %v3004_v61 = vsel %vm1487_vm5, %v2969_v44, %v2636_v57 }
 0x2e1   : > { %v3036_v45 = vsel %vm1561_vm7, %v3004_v61, %v2684_v18 }
 0x2e2   : > { %v2590_v5 = vpop.permute.xlu1 %2589  ;;  %v3068_v19 = vsel %vm1635_vm9, %v3036_v45, %v2732_v4 }
 0x2e3   : > { %v2780_v46 = vpop.permute.xlu0 %2779  ;;  %v2972_v41 = vsel %vm1413_vm3, %v5016_v7, %v2590_v5 }
 0x2e4   : > { %v3101_v0 = vsel %vm3075_vm14, %v3068_v19, %v2780_v46 }
 0x2e6   : > { %v2638_v52 = vpop.permute.xlu1 %2637 }
 0x2e7   : > { %v2828_v27 = vpop.permute.xlu0 %2827  ;;  %v3006_v14 = vsel %vm1487_vm5, %v2972_v41, %v2638_v52 }
 0x2e8   : > { %v3134_v23 = vsel %vm3108_vm15, %v3101_v0, %v2828_v27 }
 0x2ea   : > { %v2686_v6 = vpop.permute.xlu1 %2685 }
 0x2eb   : > { %v2876_v8 = vpop.permute.xlu0 %2875  ;;  %v3038_v2 = vsel %vm1561_vm7, %v3006_v14, %v2686_v6 }
 0x2ec   : > { %v3167_v34 = vsel %vm3141_vm0, %v3134_v23, %v2876_v8 }
 0x2ee   : > { %v2734_v40 = vpop.permute.xlu1 %2733 }
 0x2ef   : > { %v2924_v9 = vpop.permute.xlu0 %2923  ;;  %v3070_v16 = vsel %vm1635_vm9, %v3038_v2, %v2734_v40 }
 0x2f0   : > { %v3200_v11 = vsel %vm3174_vm1, %v3167_v34, %v2924_v9 }
 0x2f1   : > { %3856 = vmatprep.mubr.msk.bf16.mxu1 %vm3243_vm2, %v3200_v11 }
 0x2f2   : > { %v2782_v48 = vpop.permute.xlu1 %2781 }
 0x2f3   : > { %v2926_v33 = vpop.permute.xlu0 %2925  ;;  %v3103_v21 = vsel %vm3075_vm14, %v3070_v16, %v2782_v48 }
 0x2f6   : > { %v2830_v15 = vpop.permute.xlu1 %2829 }
 0x2f7   : > { %v3136_v17 = vsel %vm3108_vm15, %v3103_v21, %v2830_v15  ;;  %v2640_v12 = vpop.permute.xlu0 %2639 }
 0x2fa   : > { %v2878_v22 = vpop.permute.xlu1 %2877 }
 0x2fb   : > { %v3169_v63 = vsel %vm3141_vm0, %v3136_v17, %v2878_v22  ;;  %v2688_v7 = vpop.permute.xlu0 %2687 }
 0x2fc   : > { %v3202_v51 = vsel %vm3174_vm1, %v3169_v63, %v2926_v33 }
 0x2fd   : > { %3857 = vmatmul.mubr.msk.bf16.gmra.mrb[24].mxu1 %vm3243_vm2, %v3202_v51 }
 0x2fe   : > { %v2592_v24 = vpop.permute.xlu1 %2591 }
 0x2ff   : > { %v2736_v31 = vpop.permute.xlu0 %2735  ;;  %v2975_v38 = vsel %vm1413_vm3, %v5076_v3, %v2592_v24 }
 0x300   : > { %v3008_v30 = vsel %vm1487_vm5, %v2975_v38, %v2640_v12 }
 0x301   : > { %v3040_v43 = vsel %vm1561_vm7, %v3008_v30, %v2688_v7 }
 0x302   : > { %v2594_v20 = vpop.permute.xlu1 %2593  ;;  %v3072_v25 = vsel %vm1635_vm9, %v3040_v43, %v2736_v31 }
 0x303   : > { %v2784_v32 = vpop.permute.xlu0 %2783  ;;  %v2978_v55 = vsel %vm1413_vm3, %v5105_v56, %v2594_v20 }
 0x304   : > { %v3105_v26 = vsel %vm3075_vm14, %v3072_v25, %v2784_v32 }
 0x306   : > { %v2642_v42 = vpop.permute.xlu1 %2641 }
 0x307   : > { %v3010_v29 = vsel %vm1487_vm5, %v2978_v55, %v2642_v42 }
 0x30a   : > { %v2832_v35 = vpop.permute.xlu0 %2831  ;;  %v2690_v13 = vpop.permute.xlu1 %2689 }
 0x30b   : > { %v3138_v49 = vsel %vm3108_vm15, %v3105_v26, %v2832_v35  ;;  %v3042_v57 = vsel %vm1561_vm7, %v3010_v29, %v2690_v13 }
 0x30e   : > { %v2880_v36 = vpop.permute.xlu0 %2879  ;;  %v2738_v62 = vpop.permute.xlu1 %2737 }
 0x30f   : > { %v3171_v60 = vsel %vm3141_vm0, %v3138_v49, %v2880_v36  ;;  %v3074_v37 = vsel %vm1635_vm9, %v3042_v57, %v2738_v62 }
 0x312   : > { %v2928_v10 = vpop.permute.xlu0 %2927  ;;  %v2786_v3 = vpop.permute.xlu1 %2785 }
 0x313   : > { %v3204_v50 = vsel %vm3174_vm1, %v3171_v60, %v2928_v10  ;;  %v3107_v44 = vsel %vm3075_vm14, %v3074_v37, %v2786_v3 }
 0x314   : > { %3860 = vmatprep.mubr.msk.bf16.mxu1 %vm3243_vm2, %v3204_v50 }
 0x316   : > { %v2834_v47 = vpop.permute.xlu1 %2833 }
 0x317   : > { %v3834_v39 = vpop.f32.mrb[0].mxu1  ;;  %v3140_v61 = vsel %vm3108_vm15, %v3107_v44, %v2834_v47 }
 0x318   : > { %v3450_v58 = vmul.f32 %v3834_v39, %v5243_v53  ;;  %v3314_v54 = vpop.f32.mrb[1].mxu1 }
 0x319   : > { %v3448_v59 = vmul.f32 %v5243_v53, %v3314_v54  ;;  %v3835_v18 = vpop.f32.mrb[2].mxu1 }
 0x31a   : > { %v2882_v1 = vpop.permute.xlu1 %2881  ;;  %v3489_v56 = vadd.f32 %v5250_v28, %v3450_v58  ;;  %v3451_v4 = vmul.f32 %v3835_v18, %v5243_v53  ;;  %v3317_v5 = vpop.f32.mrb[3].mxu1 }
 0x31b   : > { %v3487_v46 = vadd.f32 %v5250_v28, %v3448_v59  ;;  %v3449_v52 = vmul.f32 %v5243_v53, %v3317_v5  ;;  %v3173_v8 = vsel %vm3141_vm0, %v3140_v61, %v2882_v1 }
 0x31c   : > { %v3521_v27 = vmax.f32 %v3489_v56, 0.0  ;;  %v3490_v6 = vadd.f32 %v5250_v28, %v3451_v4 }
 0x31d   : > { %v3519_v45 = vmax.f32 %v3487_v46, 0.0  ;;  %v3488_v40 = vadd.f32 %v5250_v28, %v3449_v52 }
 0x31e   : > { %v2930_v19 = vpop.permute.xlu1 %2929  ;;  %3553 = vst.msk [vmem:[%s5265_s18 + $0x10] sm:$0xff] %vm1413_vm3, %v3521_v27  ;;  %v3522_v0 = vmax.f32 %v3490_v6, 0.0 }
 0x31f   : > { %v3206_v23 = vsel %vm3174_vm1, %v3173_v8, %v2930_v19  ;;  %3551 = vst.msk [vmem:[%s5265_s18] sm:$0xff] %vm1413_vm3, %v3519_v45  ;;  %v3520_v34 = vmax.f32 %v3488_v40, 0.0 }
 0x320   : > { %3861 = vmatmul.mubr.msk.bf16.gmra.mrb[28].mxu1 %vm3243_vm2, %v3206_v23  ;;  %3554 = vst.msk [vmem:[%s5265_s18 + $0x18] sm:$0xff] %vm1413_vm3, %v3522_v0 }
 0x321   : > { %3552 = vst.msk [vmem:[%s5265_s18 + $0x8] sm:$0xff] %vm1413_vm3, %v3520_v34 }
 0x337   : > { %v3838_v9 = vpop.f32.mrb[4].mxu1 }
 0x338   : > { %v3454_v48 = vmul.f32 %v3838_v9, %v5243_v53  ;;  %v3330_v11 = vpop.f32.mrb[5].mxu1 }
 0x339   : > { %v3452_v41 = vmul.f32 %v5243_v53, %v3330_v11  ;;  %v3839_v14 = vpop.f32.mrb[6].mxu1 }
 0x33a   : > { %v3493_v33 = vadd.f32 %v5250_v28, %v3454_v48  ;;  %v3455_v15 = vmul.f32 %v3839_v14, %v5243_v53  ;;  %v3333_v2 = vpop.f32.mrb[7].mxu1 }
 0x33b   : > { %v3491_v16 = vadd.f32 %v5250_v28, %v3452_v41  ;;  %v3453_v21 = vmul.f32 %v5243_v53, %v3333_v2 }
 0x33c   : > { %v3525_v17 = vmax.f32 %v3493_v33, 0.0  ;;  %v3494_v22 = vadd.f32 %v5250_v28, %v3455_v15 }
 0x33d   : > { %v3523_v12 = vmax.f32 %v3491_v16, 0.0  ;;  %v3492_v63 = vadd.f32 %v5250_v28, %v3453_v21 }
 0x33e   : > { %3557 = vst.msk [vmem:[%s5265_s18 + $0x30] sm:$0xff] %vm1413_vm3, %v3525_v17  ;;  %v3526_v51 = vmax.f32 %v3494_v22, 0.0 }
 0x33f   : > { %3555 = vst.msk [vmem:[%s5265_s18 + $0x20] sm:$0xff] %vm1413_vm3, %v3523_v12  ;;  %v3524_v7 = vmax.f32 %v3492_v63, 0.0 }
 0x340   : > { %3558 = vst.msk [vmem:[%s5265_s18 + $0x38] sm:$0xff] %vm1413_vm3, %v3526_v51 }
 0x341   : > { %3556 = vst.msk [vmem:[%s5265_s18 + $0x28] sm:$0xff] %vm1413_vm3, %v3524_v7 }
 0x357   : > { %v3842_v24 = vpop.f32.mrb[8].mxu1 }
 0x358   : > { %v3458_v31 = vmul.f32 %v3842_v24, %v5243_v53  ;;  %v3346_v20 = vpop.f32.mrb[9].mxu1 }
 0x359   : > { %v3456_v38 = vmul.f32 %v5243_v53, %v3346_v20  ;;  %v3843_v32 = vpop.f32.mrb[10].mxu1 }
 0x35a   : > { %v3497_v42 = vadd.f32 %v5250_v28, %v3458_v31  ;;  %v3459_v30 = vmul.f32 %v3843_v32, %v5243_v53  ;;  %v3349_v35 = vpop.f32.mrb[11].mxu1 }
 0x35b   : > { %v3495_v13 = vadd.f32 %v5250_v28, %v3456_v38  ;;  %v3457_v43 = vmul.f32 %v5243_v53, %v3349_v35 }
 0x35c   : > { %v3529_v36 = vmax.f32 %v3497_v42, 0.0  ;;  %v3498_v62 = vadd.f32 %v5250_v28, %v3459_v30 }
 0x35d   : > { %v3527_v25 = vmax.f32 %v3495_v13, 0.0  ;;  %v3496_v26 = vadd.f32 %v5250_v28, %v3457_v43 }
 0x35e   : > { %3561 = vst.msk [vmem:[%s5265_s18 + $0x50] sm:$0xff] %vm1413_vm3, %v3529_v36  ;;  %v3530_v49 = vmax.f32 %v3498_v62, 0.0 }
 0x35f   : > { %3559 = vst.msk [vmem:[%s5265_s18 + $0x40] sm:$0xff] %vm1413_vm3, %v3527_v25  ;;  %v3528_v60 = vmax.f32 %v3496_v26, 0.0 }
 0x360   : > { %3562 = vst.msk [vmem:[%s5265_s18 + $0x58] sm:$0xff] %vm1413_vm3, %v3530_v49 }
 0x361   : > { %3560 = vst.msk [vmem:[%s5265_s18 + $0x48] sm:$0xff] %vm1413_vm3, %v3528_v60 }
 0x370   : > { %v3846_v10 = vpop.f32.mrb[12].mxu1 }
 0x371   : > { %v3462_v3 = vmul.f32 %v3846_v10, %v5243_v53  ;;  %v3362_v50 = vpop.f32.mrb[13].mxu1 }
 0x372   : > { %v3460_v47 = vmul.f32 %v5243_v53, %v3362_v50  ;;  %v3847_v55 = vpop.f32.mrb[14].mxu1 }
 0x373   : > { %v3501_v39 = vadd.f32 %v5250_v28, %v3462_v3  ;;  %v3463_v29 = vmul.f32 %v3847_v55, %v5243_v53  ;;  %v3365_v58 = vpop.f32.mrb[15].mxu1 }
 0x374   : > { %v3499_v54 = vadd.f32 %v5250_v28, %v3460_v47  ;;  %v3461_v57 = vmul.f32 %v5243_v53, %v3365_v58 }
 0x375   : > { %v3533_v59 = vmax.f32 %v3501_v39, 0.0  ;;  %v3502_v1 = vadd.f32 %v5250_v28, %v3463_v29 }
 0x376   : > { %v3531_v18 = vmax.f32 %v3499_v54, 0.0  ;;  %v3500_v37 = vadd.f32 %v5250_v28, %v3461_v57 }
 0x377   : > { %3565 = vst.msk [vmem:[%s5265_s18 + $0x70] sm:$0xff] %vm1413_vm3, %v3533_v59  ;;  %v3534_v56 = vmax.f32 %v3502_v1, 0.0 }
 0x378   : > { %3563 = vst.msk [vmem:[%s5265_s18 + $0x60] sm:$0xff] %vm1413_vm3, %v3531_v18  ;;  %v3532_v4 = vmax.f32 %v3500_v37, 0.0 }
 0x379   : > { %3566 = vst.msk [vmem:[%s5265_s18 + $0x78] sm:$0xff] %vm1413_vm3, %v3534_v56 }
 0x37a   : > { %3564 = vst.msk [vmem:[%s5265_s18 + $0x68] sm:$0xff] %vm1413_vm3, %v3532_v4 }
 0x390   : > { %v3850_v5 = vpop.f32.mrb[16].mxu1 }
 0x391   : > { %v3466_v44 = vmul.f32 %v3850_v5, %v5243_v53  ;;  %v3378_v46 = vpop.f32.mrb[17].mxu1 }
 0x392   : > { %v3464_v52 = vmul.f32 %v5243_v53, %v3378_v46  ;;  %v3851_v61 = vpop.f32.mrb[18].mxu1 }
 0x393   : > { %v3505_v27 = vadd.f32 %v5250_v28, %v3466_v44  ;;  %v3467_v6 = vmul.f32 %v3851_v61, %v5243_v53  ;;  %v3381_v45 = vpop.f32.mrb[19].mxu1 }
 0x394   : > { %v3503_v8 = vadd.f32 %v5250_v28, %v3464_v52  ;;  %v3465_v40 = vmul.f32 %v5243_v53, %v3381_v45 }
 0x395   : > { %v3537_v19 = vmax.f32 %v3505_v27, 0.0  ;;  %v3506_v0 = vadd.f32 %v5250_v28, %v3467_v6 }
 0x396   : > { %v3535_v23 = vmax.f32 %v3503_v8, 0.0  ;;  %v3504_v34 = vadd.f32 %v5250_v28, %v3465_v40 }
 0x397   : > { %3569 = vst.msk [vmem:[%s5265_s18 + $0x90] sm:$0xff] %vm1413_vm3, %v3537_v19  ;;  %v3538_v9 = vmax.f32 %v3506_v0, 0.0 }
 0x398   : > { %3567 = vst.msk [vmem:[%s5265_s18 + $0x80] sm:$0xff] %vm1413_vm3, %v3535_v23  ;;  %v3536_v48 = vmax.f32 %v3504_v34, 0.0 }
 0x399   : > { %3570 = vst.msk [vmem:[%s5265_s18 + $0x98] sm:$0xff] %vm1413_vm3, %v3538_v9 }
 0x39a   : > { %3568 = vst.msk [vmem:[%s5265_s18 + $0x88] sm:$0xff] %vm1413_vm3, %v3536_v48 }
 0x3b0   : > { %v3854_v11 = vpop.f32.mrb[20].mxu1 }
 0x3b1   : > { %v3470_v41 = vmul.f32 %v3854_v11, %v5243_v53  ;;  %v3394_v14 = vpop.f32.mrb[21].mxu1 }
 0x3b2   : > { %v3468_v33 = vmul.f32 %v5243_v53, %v3394_v14  ;;  %v3855_v15 = vpop.f32.mrb[22].mxu1 }
 0x3b3   : > { %v3509_v2 = vadd.f32 %v5250_v28, %v3470_v41  ;;  %v3471_v16 = vmul.f32 %v3855_v15, %v5243_v53  ;;  %v3397_v21 = vpop.f32.mrb[23].mxu1 }
 0x3b4   : > { %v3507_v17 = vadd.f32 %v5250_v28, %v3468_v33  ;;  %v3469_v22 = vmul.f32 %v5243_v53, %v3397_v21 }
 0x3b5   : > { %v3541_v12 = vmax.f32 %v3509_v2, 0.0  ;;  %v3510_v63 = vadd.f32 %v5250_v28, %v3471_v16 }
 0x3b6   : > { %v3539_v51 = vmax.f32 %v3507_v17, 0.0  ;;  %v3508_v7 = vadd.f32 %v5250_v28, %v3469_v22 }
 0x3b7   : > { %3573 = vst.msk [vmem:[%s5265_s18 + $0xb0] sm:$0xff] %vm1413_vm3, %v3541_v12  ;;  %v3542_v24 = vmax.f32 %v3510_v63, 0.0 }
 0x3b8   : > { %3571 = vst.msk [vmem:[%s5265_s18 + $0xa0] sm:$0xff] %vm1413_vm3, %v3539_v51  ;;  %v3540_v31 = vmax.f32 %v3508_v7, 0.0 }
 0x3b9   : > { %3574 = vst.msk [vmem:[%s5265_s18 + $0xb8] sm:$0xff] %vm1413_vm3, %v3542_v24 }
 0x3ba   : > { %3572 = vst.msk [vmem:[%s5265_s18 + $0xa8] sm:$0xff] %vm1413_vm3, %v3540_v31 }
 0x3d0   : > { %v3858_v20 = vpop.f32.mrb[24].mxu1 }
 0x3d1   : > { %v3474_v38 = vmul.f32 %v3858_v20, %v5243_v53  ;;  %v3410_v32 = vpop.f32.mrb[25].mxu1 }
 0x3d2   : > { %v3472_v42 = vmul.f32 %v5243_v53, %v3410_v32  ;;  %v3859_v30 = vpop.f32.mrb[26].mxu1 }
 0x3d3   : > { %v3513_v35 = vadd.f32 %v5250_v28, %v3474_v38  ;;  %v3475_v13 = vmul.f32 %v3859_v30, %v5243_v53  ;;  %v3413_v43 = vpop.f32.mrb[27].mxu1 }
 0x3d4   : > { %v3511_v36 = vadd.f32 %v5250_v28, %v3472_v42  ;;  %v3473_v62 = vmul.f32 %v5243_v53, %v3413_v43 }
 0x3d5   : > { %v3545_v25 = vmax.f32 %v3513_v35, 0.0  ;;  %v3514_v26 = vadd.f32 %v5250_v28, %v3475_v13 }
 0x3d6   : > { %v3543_v49 = vmax.f32 %v3511_v36, 0.0  ;;  %v3512_v60 = vadd.f32 %v5250_v28, %v3473_v62 }
 0x3d7   : > { %3577 = vst.msk [vmem:[%s5265_s18 + $0xd0] sm:$0xff] %vm1413_vm3, %v3545_v25  ;;  %v3546_v10 = vmax.f32 %v3514_v26, 0.0 }
 0x3d8   : > { %3575 = vst.msk [vmem:[%s5265_s18 + $0xc0] sm:$0xff] %vm1413_vm3, %v3543_v49  ;;  %v3544_v3 = vmax.f32 %v3512_v60, 0.0 }
 0x3d9   : > { %3578 = vst.msk [vmem:[%s5265_s18 + $0xd8] sm:$0xff] %vm1413_vm3, %v3546_v10 }
 0x3da   : > { %3576 = vst.msk [vmem:[%s5265_s18 + $0xc8] sm:$0xff] %vm1413_vm3, %v3544_v3 }
 0x3f3   : > { %v3862_v50 = vpop.f32.mrb[28].mxu1 }
 0x3f4   : > { %v3478_v47 = vmul.f32 %v3862_v50, %v5243_v53  ;;  %v3426_v55 = vpop.f32.mrb[29].mxu1 }
 0x3f5   : > { %v3476_v39 = vmul.f32 %v5243_v53, %v3426_v55  ;;  %v3863_v29 = vpop.f32.mrb[30].mxu1 }
 0x3f6   : > { %v3517_v58 = vadd.f32 %v5250_v28, %v3478_v47  ;;  %v3479_v54 = vmul.f32 %v3863_v29, %v5243_v53  ;;  %v3429_v57 = vpop.f32.mrb[31].mxu1 }
 0x3f7   : > { %v3515_v59 = vadd.f32 %v5250_v28, %v3476_v39  ;;  %v3477_v1 = vmul.f32 %v5243_v53, %v3429_v57 }
 0x3f8   : > { %v3549_v18 = vmax.f32 %v3517_v58, 0.0  ;;  %v3518_v37 = vadd.f32 %v5250_v28, %v3479_v54 }
 0x3f9   : > { %v3547_v56 = vmax.f32 %v3515_v59, 0.0  ;;  %v3516_v4 = vadd.f32 %v5250_v28, %v3477_v1 }
 0x3fa   : > { %3581 = vst.msk [vmem:[%s5265_s18 + $0xf0] sm:$0xff] %vm1413_vm3, %v3549_v18  ;;  %v3550_v5 = vmax.f32 %v3518_v37, 0.0 }
 0x3fb   : > { %3579 = vst.msk [vmem:[%s5265_s18 + $0xe0] sm:$0xff] %vm1413_vm3, %v3547_v56  ;;  %v3548_v44 = vmax.f32 %v3516_v4, 0.0 }
 0x3fc   : > { %3582 = vst.msk [vmem:[%s5265_s18 + $0xf8] sm:$0xff] %vm1413_vm3, %v3550_v5 }
 0x3fd   : > { %3580 = vst.msk [vmem:[%s5265_s18 + $0xe8] sm:$0xff] %vm1413_vm3, %v3548_v44 }
 0x3fe PF: > { %s17_s26 = sadd.s32 1, %s3935_s26   ;;  %s5412_s24 = smov %s3931_s25 }
 0x3ff   : > { %p14_p5 = scmp.ge.s32.totalorder %s17_s26, 4   ;;  %s5413_s25 = smov %s5415_s27 }
 0x401   :  { %16 = sbr.rel (!%p14_p5) target bundleno = 2 (0x2), region = 84 }

</bundles_post_ra>
